<compile_context>
chip_gen: v7x
topology: tpu7x:2x2x1
jax: 0.10.0
libtpu: 0.0.40
codegen_flags: <defaults>
</compile_context>

<pallas_src>
import numpy as np
import jax
import jax.numpy as jnp
from jax.experimental import pallas as pl
from jax.experimental.pallas import tpu as pltpu

NUM_HEADS = 8  # ASSA(dim=d_model, num_heads=8)


def _layernorm(x, g, b, eps=1e-5):
    mu = jnp.mean(x, axis=-1, keepdims=True)
    var = jnp.mean((x - mu) ** 2, axis=-1, keepdims=True)
    return (x - mu) * jax.lax.rsqrt(var + eps) * g + b


def encoder_layer1_kernel(
    w12_ref,                                    # SMEM (2,): softmax of sparse-attn mixing weights
    x_ref,                                      # VMEM (Bt, L, D) f32
    wqkv_ref, bqkv_ref, wp_ref, bp_ref,
    n1g_ref, n1b_ref,
    w1lh_ref, b1lh_ref,
    w2low_ref, b2low_ref, w2high_ref, b2high_ref,
    gwl_ref, gbl_ref, gwh_ref, gbh_ref,
    w1lo_ref, b1lo_ref, w1hig_ref, b1hig_ref,
    w2sum_ref, b2sum_ref,
    n2g_ref, n2b_ref,
    o_ref,                                      # VMEM (Bt, L, D)
):
    bt, L, D = x_ref.shape
    H = NUM_HEADS
    dh = D // H
    F = w1lo_ref.shape[1]
    R = bt * L
    bf16 = jnp.bfloat16
    w1 = w12_ref[0]
    w2 = w12_ref[1]

    x = x_ref[...].reshape(R, D)                # (R, D) f32
    xb = x.astype(bf16)

    # ---------------- WindowAttention_sparse ----------------
    # fused QKV projection; 1/sqrt(dh) already folded into the q columns.
    qkv = jnp.dot(xb, wqkv_ref[...], preferred_element_type=jnp.float32) + bqkv_ref[...]
    qkv3 = qkv.reshape(bt, L, 3 * D)
    wp = wp_ref[...]                            # (D, D) bf16

    # Per-head, Bt-batched contractions; each head's context is accumulated
    # directly through its slice of the output projection (no concatenate).
    attn_out = jnp.zeros((R, D), jnp.float32)
    for h in range(H):
        lo = h * dh
        qh = qkv3[:, :, lo:lo + dh].astype(bf16)                  # (bt, L, dh)
        kh = qkv3[:, :, D + lo:D + lo + dh].astype(bf16)
        vh = qkv3[:, :, 2 * D + lo:2 * D + lo + dh].astype(bf16)
        s = jnp.einsum('bqd,bkd->bqk', qh, kh,
                       preferred_element_type=jnp.float32)        # (bt, L, L)
        m = jnp.max(s, axis=-1, keepdims=True)
        e = jnp.exp(s - m)
        attn0 = e * pl.reciprocal(jnp.sum(e, axis=-1, keepdims=True), approx=True)
        r = jnp.maximum(s, 0.0)
        attn = attn0 * w1 + (r * r) * w2                          # sparse-attn mix
        ctx = jnp.einsum('bqk,bkd->bqd', attn.astype(bf16), vh,
                         preferred_element_type=jnp.float32)      # (bt, L, dh)
        attn_out = attn_out + jnp.dot(
            ctx.reshape(R, dh).astype(bf16), wp[lo:lo + dh, :],
            preferred_element_type=jnp.float32)
    attn_out = attn_out + bp_ref[...]

    # residual + norm1 (dropout = identity)
    x1 = _layernorm(x + attn_out, n1g_ref[...], n1b_ref[...])     # (R, D) f32
    x1b = x1.astype(bf16)

    # ---------------- FFT band split + first conv1d(k=1) FFN pair ----------------
    # Band-split matrices are folded into the layer-1 weights (host side) and
    # the low/high layer-1 matmuls are fused into one (D, 2F) matmul.
    h1 = jnp.dot(x1b, w1lh_ref[...], preferred_element_type=jnp.float32) + b1lh_ref[...]
    h1 = jnp.maximum(h1, 0.0).astype(bf16)                        # (R, 2F)
    y_low = jnp.dot(h1[:, :F], w2low_ref[...],
                    preferred_element_type=jnp.float32) + b2low_ref[...]
    y_high = jnp.dot(h1[:, F:], w2high_ref[...],
                     preferred_element_type=jnp.float32) + b2high_ref[...]

    # ---------------- GateFusion ----------------
    zl = jnp.dot(y_low.astype(bf16), gwl_ref[...],
                 preferred_element_type=jnp.float32) + gbl_ref[...]
    zh = jnp.dot(y_high.astype(bf16), gwh_ref[...],
                 preferred_element_type=jnp.float32) + gbh_ref[...]
    gl = pl.reciprocal(1.0 + jnp.exp(-zl), approx=True)           # sigmoid
    gh = pl.reciprocal(1.0 + jnp.exp(-zh), approx=True)
    y_low_f = gl * y_low + (1.0 - gl) * y_high
    y_high_f = gh * y_high + (1.0 - gh) * y_low

    # ---------------- second conv1d(k=1) FFN pair ----------------
    # Output matmuls and the final y_low2 + y_high2 add collapse into one
    # (2F, D) matmul on the concatenated hidden activations.
    h_lo = jnp.maximum(jnp.dot(y_low_f.astype(bf16), w1lo_ref[...],
                               preferred_element_type=jnp.float32) + b1lo_ref[...], 0.0)
    h_hi = jnp.maximum(jnp.dot(y_high_f.astype(bf16), w1hig_ref[...],
                               preferred_element_type=jnp.float32) + b1hig_ref[...], 0.0)
    h2 = jnp.concatenate([h_lo, h_hi], axis=-1).astype(bf16)      # (R, 2F)
    y = jnp.dot(h2, w2sum_ref[...], preferred_element_type=jnp.float32) + b2sum_ref[...]

    out = _layernorm(x1 + y, n2g_ref[...], n2b_ref[...])          # norm2
    o_ref[...] = out.reshape(bt, L, D).astype(o_ref.dtype)


# ---------------------------------------------------------------------------
# Parameter setup (deterministic, in-script) and host-side glue
# ---------------------------------------------------------------------------
def fft_bandpass_matrices(D):
    """Real (D, D) matrices so that  y @ M == Re(ifft(mask * fft(y, axis=-1)))."""
    d = np.arange(D)
    Fm = np.exp(-2j * np.pi * np.outer(d, d) / D)          # forward DFT (y @ Fm)
    Finv = np.exp(2j * np.pi * np.outer(d, d) / D) / D     # inverse DFT
    tf = D // 4
    m_low = np.zeros(D); m_low[:tf] = 1.0
    m_high = np.zeros(D); m_high[-tf:] = 1.0
    M_low = np.real(Fm @ np.diag(m_low) @ Finv).astype(np.float32)
    M_high = np.real(Fm @ np.diag(m_high) @ Finv).astype(np.float32)
    return jnp.asarray(M_low), jnp.asarray(M_high)


def make_params(key, d_model, d_ff):
    D, Fd = d_model, d_ff

    def lin(k, fan_in, shape):
        bound = 1.0 / np.sqrt(fan_in)
        return jax.random.uniform(k, shape, jnp.float32, -bound, bound)

    keys = iter(jax.random.split(key, 64))
    p = {}
    # attention qkv / proj (weights stored pre-transposed: (in, out))
    p['wq'] = lin(next(keys), D, (D, D));       p['bq'] = lin(next(keys), D, (1, D))
    p['wkv'] = lin(next(keys), D, (D, 2 * D));  p['bkv'] = lin(next(keys), D, (1, 2 * D))
    p['wp'] = lin(next(keys), D, (D, D));       p['bp'] = lin(next(keys), D, (1, D))
    p['w_sparse'] = jnp.ones((2,), jnp.float32)          # WindowAttention_sparse.w = ones(2)
    # layernorms (torch default init)
    p['n1g'] = jnp.ones((1, D), jnp.float32);   p['n1b'] = jnp.zeros((1, D), jnp.float32)
    p['n2g'] = jnp.ones((1, D), jnp.float32);   p['n2b'] = jnp.zeros((1, D), jnp.float32)
    # conv1d(k=1) blocks: low/high (first pass), lo/hig (second pass)
    for name in ['low', 'high', 'lo', 'hig']:
        p[f'w1{name}'] = lin(next(keys), D, (D, Fd));  p[f'b1{name}'] = lin(next(keys), D, (1, Fd))
        p[f'w2{name}'] = lin(next(keys), Fd, (Fd, D)); p[f'b2{name}'] = lin(next(keys), Fd, (1, D))
    # gate fusion
    p['gwl'] = lin(next(keys), D, (D, D));      p['gbl'] = lin(next(keys), D, (1, D))
    p['gwh'] = lin(next(keys), D, (D, D));      p['gbh'] = lin(next(keys), D, (1, D))
    return p


def encoder_layer1_forward(x, params, m_low, m_high, batch_tile=None):
    B, L, D = x.shape
    bf16 = jnp.bfloat16
    scale = (D // NUM_HEADS) ** -0.5

    # batch tile: aim for a few hundred rows per grid step (weights are resident).
    bt = batch_tile if batch_tile is not None else min(B, max(1, 256 // max(L, 1)))
    while B % bt:
        bt -= 1

    e = jnp.exp(params['w_sparse'])
    w12 = (e / jnp.sum(e)).astype(jnp.float32)              # [w1, w2] scalars

    # --- host-side weight fusions (all exact linear-algebra identities) ---
    wqkv = jnp.concatenate([params['wq'] * scale, params['wkv']], axis=1).astype(bf16)
    bqkv = jnp.concatenate([params['bq'] * scale, params['bkv']], axis=1)
    # FFT band-split folded into first-FFN layer-1 weights; low|high fused.
    w1lh = jnp.concatenate([m_low @ params['w1low'], m_high @ params['w1high']],
                           axis=1).astype(bf16)
    b1lh = jnp.concatenate([params['b1low'], params['b1high']], axis=1)
    # second-FFN output layers stacked along the contraction axis.
    w2sum = jnp.concatenate([params['w2lo'], params['w2hig']], axis=0).astype(bf16)
    b2sum = params['b2lo'] + params['b2hig']

    weights = [
        wqkv, bqkv, params['wp'].astype(bf16), params['bp'],
        params['n1g'], params['n1b'],
        w1lh, b1lh,
        params['w2low'].astype(bf16), params['b2low'],
        params['w2high'].astype(bf16), params['b2high'],
        params['gwl'].astype(bf16), params['gbl'],
        params['gwh'].astype(bf16), params['gbh'],
        params['w1lo'].astype(bf16), params['b1lo'],
        params['w1hig'].astype(bf16), params['b1hig'],
        w2sum, b2sum,
        params['n2g'], params['n2b'],
    ]

    def const_spec(a):
        nd = a.ndim
        return pl.BlockSpec(a.shape, lambda b, _nd=nd: (0,) * _nd)

    in_specs = [pl.BlockSpec(memory_space=pltpu.MemorySpace.SMEM),      # w12 scalars
                pl.BlockSpec((bt, L, D), lambda b: (b, 0, 0))]          # x batch tile
    in_specs += [const_spec(a) for a in weights]                        # resident weights

    return pl.pallas_call(
        encoder_layer1_kernel,
        out_shape=jax.ShapeDtypeStruct((B, L, D), x.dtype),
        grid=(B // bt,),
        in_specs=in_specs,
        out_specs=pl.BlockSpec((bt, L, D), lambda b: (b, 0, 0)),
        compiler_params=pltpu.CompilerParams(
            dimension_semantics=("parallel",),          # megacore on v7x, no-op on v5e/v6e
            vmem_limit_bytes=64 * 1024 * 1024),
    )(w12, x, *weights)


# ---------------------------------------------------------------------------
# Pure-JAX reference (f32, uses jnp.fft for the band split) for validation
# ---------------------------------------------------------------------------
def reference_forward(x, params):
    B, L, D = x.shape
    H, dh = NUM_HEADS, D // NUM_HEADS
    scale = dh ** -0.5

    def ln(v, g, b, eps=1e-5):
        mu = jnp.mean(v, axis=-1, keepdims=True)
        var = jnp.mean((v - mu) ** 2, axis=-1, keepdims=True)
        return (v - mu) / jnp.sqrt(var + eps) * g + b

    q = x @ params['wq'] + params['bq']
    kv = x @ params['wkv'] + params['bkv']
    k, v = kv[..., :D], kv[..., D:]
    heads = lambda t: t.reshape(B, L, H, dh).transpose(0, 2, 1, 3)
    qh, kh, vh = heads(q) * scale, heads(k), heads(v)
    logits = jnp.einsum('bhqd,bhkd->bhqk', qh, kh)
    attn0 = jax.nn.softmax(logits, axis=-1)
    attn1 = jnp.maximum(logits, 0.0) ** 2
    e = jnp.exp(params['w_sparse'])
    attn = attn0 * (e[0] / e.sum()) + attn1 * (e[1] / e.sum())
    o = jnp.einsum('bhqk,bhkd->bhqd', attn, vh).transpose(0, 2, 1, 3).reshape(B, L, D)
    o = o @ params['wp'] + params['bp']
    x1 = ln(x + o, params['n1g'], params['n1b'])

    y_fft = jnp.fft.fft(x1, axis=-1)
    tf = D // 4
    low = jnp.zeros_like(y_fft).at[..., :tf].set(y_fft[..., :tf])
    high = jnp.zeros_like(y_fft).at[..., D - tf:].set(y_fft[..., D - tf:])
    y_low = jnp.real(jnp.fft.ifft(low, axis=-1))
    y_high = jnp.real(jnp.fft.ifft(high, axis=-1))

    def ffn(y, a):
        h = jnp.maximum(y @ params[f'w1{a}'] + params[f'b1{a}'], 0.0)
        return h @ params[f'w2{a}'] + params[f'b2{a}']

    y_low, y_high = ffn(y_low, 'low'), ffn(y_high, 'high')
    gl = jax.nn.sigmoid(y_low @ params['gwl'] + params['gbl'])
    gh = jax.nn.sigmoid(y_high @ params['gwh'] + params['gbh'])
    ylf = gl * y_low + (1 - gl) * y_high
    yhf = gh * y_high + (1 - gh) * y_low
    y = ffn(ylf, 'lo') + ffn(yhf, 'hig')
    return ln(x1 + y, params['n2g'], params['n2b'])


if __name__ == "__main__":
    B, L, D = 2, 8, 32          # batch, seq, d_model (d_model % 8 == 0)
    d_ff = 4 * D
    key = jax.random.PRNGKey(0)
    kx, kp = jax.random.split(key)
    x = jax.random.normal(kx, (B, L, D), jnp.float32)
    params = make_params(kp, D, d_ff)
    m_low, m_high = fft_bandpass_matrices(D)

    out = encoder_layer1_forward(x, params, m_low, m_high)
    out = jax.block_until_ready(out)

    ref = reference_forward(x, params)
    # atol slightly relaxed vs. a pure-f32 kernel: matmuls use bf16 MXU inputs
    # (f32 accumulation) and approx-reciprocal softmax/sigmoid per the review.
    np.testing.assert_allclose(np.asarray(out), np.asarray(ref), rtol=5e-2, atol=1e-1)
    print("KERNEL_OK")
</pallas_src>

<mosaic_0001>
module attributes {stable_mosaic.version = 11 : i64} {
  func.func @encoder_layer1_kernel(%arg0: i32, %arg1: memref<2xf32, #tpu.memory_space<smem>>, %arg2: memref<2x8x32xf32, #tpu.memory_space<vmem>>, %arg3: memref<32x96xbf16, #tpu.memory_space<vmem>>, %arg4: memref<1x96xf32, #tpu.memory_space<vmem>>, %arg5: memref<32x32xbf16, #tpu.memory_space<vmem>>, %arg6: memref<1x32xf32, #tpu.memory_space<vmem>>, %arg7: memref<1x32xf32, #tpu.memory_space<vmem>>, %arg8: memref<1x32xf32, #tpu.memory_space<vmem>>, %arg9: memref<32x256xbf16, #tpu.memory_space<vmem>>, %arg10: memref<1x256xf32, #tpu.memory_space<vmem>>, %arg11: memref<128x32xbf16, #tpu.memory_space<vmem>>, %arg12: memref<1x32xf32, #tpu.memory_space<vmem>>, %arg13: memref<128x32xbf16, #tpu.memory_space<vmem>>, %arg14: memref<1x32xf32, #tpu.memory_space<vmem>>, %arg15: memref<32x32xbf16, #tpu.memory_space<vmem>>, %arg16: memref<1x32xf32, #tpu.memory_space<vmem>>, %arg17: memref<32x32xbf16, #tpu.memory_space<vmem>>, %arg18: memref<1x32xf32, #tpu.memory_space<vmem>>, %arg19: memref<32x128xbf16, #tpu.memory_space<vmem>>, %arg20: memref<1x128xf32, #tpu.memory_space<vmem>>, %arg21: memref<32x128xbf16, #tpu.memory_space<vmem>>, %arg22: memref<1x128xf32, #tpu.memory_space<vmem>>, %arg23: memref<256x32xbf16, #tpu.memory_space<vmem>>, %arg24: memref<1x32xf32, #tpu.memory_space<vmem>>, %arg25: memref<1x32xf32, #tpu.memory_space<vmem>>, %arg26: memref<1x32xf32, #tpu.memory_space<vmem>>, %arg27: memref<2x8x32xf32, #tpu.memory_space<vmem>>) attributes {dimension_semantics = [#tpu.dimension_semantics<parallel>], iteration_bounds = array<i64: 1>, scalar_prefetch = 0 : i64, scratch_operands = 0 : i64, tpu.core_type = #tpu.core_type<tc>, window_params = [{transform_indices = @transform_0, window_bounds = array<i64: 2>}, {transform_indices = @transform_1, window_bounds = array<i64: 2, 8, 32>}, {pipeline_mode = #tpu.pipeline_mode<synchronous>, transform_indices = @transform_2, window_bounds = array<i64: 32, 96>}, {pipeline_mode = #tpu.pipeline_mode<synchronous>, transform_indices = @transform_3, window_bounds = array<i64: 1, 96>}, {pipeline_mode = #tpu.pipeline_mode<synchronous>, transform_indices = @transform_4, window_bounds = array<i64: 32, 32>}, {pipeline_mode = #tpu.pipeline_mode<synchronous>, transform_indices = @transform_5, window_bounds = array<i64: 1, 32>}, {pipeline_mode = #tpu.pipeline_mode<synchronous>, transform_indices = @transform_6, window_bounds = array<i64: 1, 32>}, {pipeline_mode = #tpu.pipeline_mode<synchronous>, transform_indices = @transform_7, window_bounds = array<i64: 1, 32>}, {pipeline_mode = #tpu.pipeline_mode<synchronous>, transform_indices = @transform_8, window_bounds = array<i64: 32, 256>}, {pipeline_mode = #tpu.pipeline_mode<synchronous>, transform_indices = @transform_9, window_bounds = array<i64: 1, 256>}, {pipeline_mode = #tpu.pipeline_mode<synchronous>, transform_indices = @transform_10, window_bounds = array<i64: 128, 32>}, {pipeline_mode = #tpu.pipeline_mode<synchronous>, transform_indices = @transform_11, window_bounds = array<i64: 1, 32>}, {pipeline_mode = #tpu.pipeline_mode<synchronous>, transform_indices = @transform_12, window_bounds = array<i64: 128, 32>}, {pipeline_mode = #tpu.pipeline_mode<synchronous>, transform_indices = @transform_13, window_bounds = array<i64: 1, 32>}, {pipeline_mode = #tpu.pipeline_mode<synchronous>, transform_indices = @transform_14, window_bounds = array<i64: 32, 32>}, {pipeline_mode = #tpu.pipeline_mode<synchronous>, transform_indices = @transform_15, window_bounds = array<i64: 1, 32>}, {pipeline_mode = #tpu.pipeline_mode<synchronous>, transform_indices = @transform_16, window_bounds = array<i64: 32, 32>}, {pipeline_mode = #tpu.pipeline_mode<synchronous>, transform_indices = @transform_17, window_bounds = array<i64: 1, 32>}, {pipeline_mode = #tpu.pipeline_mode<synchronous>, transform_indices = @transform_18, window_bounds = array<i64: 32, 128>}, {pipeline_mode = #tpu.pipeline_mode<synchronous>, transform_indices = @transform_19, window_bounds = array<i64: 1, 128>}, {pipeline_mode = #tpu.pipeline_mode<synchronous>, transform_indices = @transform_20, window_bounds = array<i64: 32, 128>}, {pipeline_mode = #tpu.pipeline_mode<synchronous>, transform_indices = @transform_21, window_bounds = array<i64: 1, 128>}, {pipeline_mode = #tpu.pipeline_mode<synchronous>, transform_indices = @transform_22, window_bounds = array<i64: 256, 32>}, {pipeline_mode = #tpu.pipeline_mode<synchronous>, transform_indices = @transform_23, window_bounds = array<i64: 1, 32>}, {pipeline_mode = #tpu.pipeline_mode<synchronous>, transform_indices = @transform_24, window_bounds = array<i64: 1, 32>}, {pipeline_mode = #tpu.pipeline_mode<synchronous>, transform_indices = @transform_25, window_bounds = array<i64: 1, 32>}, {transform_indices = @transform_26, window_bounds = array<i64: 2, 8, 32>}]} {
    %c0 = arith.constant 0 : index
    %0 = memref.load %arg1[%c0] : memref<2xf32, #tpu.memory_space<smem>>
    %c1 = arith.constant 1 : index
    %1 = memref.load %arg1[%c1] : memref<2xf32, #tpu.memory_space<smem>>
    %c0_0 = arith.constant 0 : index
    %c0_1 = arith.constant 0 : index
    %c0_2 = arith.constant 0 : index
    %2 = vector.load %arg2[%c0_0, %c0_1, %c0_2] : memref<2x8x32xf32, #tpu.memory_space<vmem>>, vector<2x8x32xf32>
    %3 = vector.shape_cast %2 : vector<2x8x32xf32> to vector<16x32xf32>
    %4 = arith.truncf %3 : vector<16x32xf32> to vector<16x32xbf16>
    %c0_3 = arith.constant 0 : index
    %c0_4 = arith.constant 0 : index
    %5 = vector.load %arg3[%c0_3, %c0_4] : memref<32x96xbf16, #tpu.memory_space<vmem>>, vector<32x96xbf16>
    %cst = arith.constant dense<0.000000e+00> : vector<16x96xf32>
    %6 = tpu.matmul %4, %5, %cst {dimension_numbers = #tpu.dot_dimension_numbers<[1], [0], [0], [1], [0, 0, 1, 1], [], []>} : vector<16x32xbf16>, vector<32x96xbf16>, vector<16x96xf32> -> vector<16x96xf32>
    %c0_5 = arith.constant 0 : index
    %c0_6 = arith.constant 0 : index
    %7 = vector.load %arg4[%c0_5, %c0_6] : memref<1x96xf32, #tpu.memory_space<vmem>>, vector<1x96xf32>
    %8 = vector.broadcast %7 : vector<1x96xf32> to vector<16x96xf32>
    %9 = arith.addf %6, %8 : vector<16x96xf32>
    %10 = vector.shape_cast %9 : vector<16x96xf32> to vector<2x8x96xf32>
    %c0_7 = arith.constant 0 : index
    %c0_8 = arith.constant 0 : index
    %11 = vector.load %arg5[%c0_7, %c0_8] : memref<32x32xbf16, #tpu.memory_space<vmem>>, vector<32x32xbf16>
    %cst_9 = arith.constant 0.000000e+00 : f32
    %12 = vector.broadcast %cst_9 : f32 to vector<16x32xf32>
    %13 = vector.extract_strided_slice %10 {offsets = [0, 0, 0], sizes = [2, 8, 4], strides = [1, 1, 1]} : vector<2x8x96xf32> to vector<2x8x4xf32>
    %14 = arith.truncf %13 : vector<2x8x4xf32> to vector<2x8x4xbf16>
    %15 = vector.extract_strided_slice %10 {offsets = [0, 0, 32], sizes = [2, 8, 4], strides = [1, 1, 1]} : vector<2x8x96xf32> to vector<2x8x4xf32>
    %16 = arith.truncf %15 : vector<2x8x4xf32> to vector<2x8x4xbf16>
    %17 = vector.extract_strided_slice %10 {offsets = [0, 0, 64], sizes = [2, 8, 4], strides = [1, 1, 1]} : vector<2x8x96xf32> to vector<2x8x4xf32>
    %18 = arith.truncf %17 : vector<2x8x4xf32> to vector<2x8x4xbf16>
    "tpu.trace_start"() <{level = 10 : i32, message = "bqd,bkd->bqk"}> : () -> ()
    %cst_10 = arith.constant dense<0.000000e+00> : vector<2x8x8xf32>
    %19 = tpu.matmul %14, %16, %cst_10 {dimension_numbers = #tpu.dot_dimension_numbers<[2], [2], [1], [1], [0, 0, 0, 1, 1, 1], [0], [0]>} : vector<2x8x4xbf16>, vector<2x8x4xbf16>, vector<2x8x8xf32> -> vector<2x8x8xf32>
    "tpu.trace_stop"() : () -> ()
    %cst_11 = arith.constant dense<0xFF800000> : vector<2x8xf32>
    %20 = vector.multi_reduction <maximumf>, %19, %cst_11 [2] : vector<2x8x8xf32> to vector<2x8xf32>
    %21 = vector.shape_cast %20 : vector<2x8xf32> to vector<2x8x1xf32>
    %22 = vector.broadcast %21 : vector<2x8x1xf32> to vector<2x8x8xf32>
    %23 = arith.subf %19, %22 : vector<2x8x8xf32>
    %24 = math.exp %23 : vector<2x8x8xf32>
    %cst_12 = arith.constant dense<0.000000e+00> : vector<2x8xf32>
    %25 = vector.multi_reduction <add>, %24, %cst_12 [2] : vector<2x8x8xf32> to vector<2x8xf32>
    %26 = vector.shape_cast %25 : vector<2x8xf32> to vector<2x8x1xf32>
    %27 = tpu.reciprocal %26 {approx = true} : vector<2x8x1xf32> -> vector<2x8x1xf32>
    %28 = vector.broadcast %27 : vector<2x8x1xf32> to vector<2x8x8xf32>
    %29 = arith.mulf %24, %28 : vector<2x8x8xf32>
    %cst_13 = arith.constant 0.000000e+00 : f32
    %30 = vector.broadcast %cst_13 : f32 to vector<2x8x8xf32>
    %31 = arith.maximumf %19, %30 : vector<2x8x8xf32>
    %32 = vector.broadcast %0 : f32 to vector<2x8x8xf32>
    %33 = arith.mulf %29, %32 : vector<2x8x8xf32>
    %34 = arith.mulf %31, %31 : vector<2x8x8xf32>
    %35 = vector.broadcast %1 : f32 to vector<2x8x8xf32>
    %36 = arith.mulf %34, %35 : vector<2x8x8xf32>
    %37 = arith.addf %33, %36 : vector<2x8x8xf32>
    %38 = arith.truncf %37 : vector<2x8x8xf32> to vector<2x8x8xbf16>
    "tpu.trace_start"() <{level = 10 : i32, message = "bqk,bkd->bqd"}> : () -> ()
    %cst_14 = arith.constant dense<0.000000e+00> : vector<2x8x4xf32>
    %39 = tpu.matmul %38, %18, %cst_14 {dimension_numbers = #tpu.dot_dimension_numbers<[2], [1], [1], [2], [0, 0, 0, 1, 1, 2], [0], [0]>} : vector<2x8x8xbf16>, vector<2x8x4xbf16>, vector<2x8x4xf32> -> vector<2x8x4xf32>
    "tpu.trace_stop"() : () -> ()
    %40 = vector.shape_cast %39 : vector<2x8x4xf32> to vector<16x4xf32>
    %41 = arith.truncf %40 : vector<16x4xf32> to vector<16x4xbf16>
    %42 = vector.extract_strided_slice %11 {offsets = [0, 0], sizes = [4, 32], strides = [1, 1]} : vector<32x32xbf16> to vector<4x32xbf16>
    %cst_15 = arith.constant dense<0.000000e+00> : vector<16x32xf32>
    %43 = tpu.matmul %41, %42, %cst_15 {dimension_numbers = #tpu.dot_dimension_numbers<[1], [0], [0], [1], [0, 0, 1, 1], [], []>} : vector<16x4xbf16>, vector<4x32xbf16>, vector<16x32xf32> -> vector<16x32xf32>
    %44 = arith.addf %12, %43 : vector<16x32xf32>
    %45 = vector.extract_strided_slice %10 {offsets = [0, 0, 4], sizes = [2, 8, 4], strides = [1, 1, 1]} : vector<2x8x96xf32> to vector<2x8x4xf32>
    %46 = arith.truncf %45 : vector<2x8x4xf32> to vector<2x8x4xbf16>
    %47 = vector.extract_strided_slice %10 {offsets = [0, 0, 36], sizes = [2, 8, 4], strides = [1, 1, 1]} : vector<2x8x96xf32> to vector<2x8x4xf32>
    %48 = arith.truncf %47 : vector<2x8x4xf32> to vector<2x8x4xbf16>
    %49 = vector.extract_strided_slice %10 {offsets = [0, 0, 68], sizes = [2, 8, 4], strides = [1, 1, 1]} : vector<2x8x96xf32> to vector<2x8x4xf32>
    %50 = arith.truncf %49 : vector<2x8x4xf32> to vector<2x8x4xbf16>
    "tpu.trace_start"() <{level = 10 : i32, message = "bqd,bkd->bqk"}> : () -> ()
    %cst_16 = arith.constant dense<0.000000e+00> : vector<2x8x8xf32>
    %51 = tpu.matmul %46, %48, %cst_16 {dimension_numbers = #tpu.dot_dimension_numbers<[2], [2], [1], [1], [0, 0, 0, 1, 1, 1], [0], [0]>} : vector<2x8x4xbf16>, vector<2x8x4xbf16>, vector<2x8x8xf32> -> vector<2x8x8xf32>
    "tpu.trace_stop"() : () -> ()
    %cst_17 = arith.constant dense<0xFF800000> : vector<2x8xf32>
    %52 = vector.multi_reduction <maximumf>, %51, %cst_17 [2] : vector<2x8x8xf32> to vector<2x8xf32>
    %53 = vector.shape_cast %52 : vector<2x8xf32> to vector<2x8x1xf32>
    %54 = vector.broadcast %53 : vector<2x8x1xf32> to vector<2x8x8xf32>
    %55 = arith.subf %51, %54 : vector<2x8x8xf32>
    %56 = math.exp %55 : vector<2x8x8xf32>
    %cst_18 = arith.constant dense<0.000000e+00> : vector<2x8xf32>
    %57 = vector.multi_reduction <add>, %56, %cst_18 [2] : vector<2x8x8xf32> to vector<2x8xf32>
    %58 = vector.shape_cast %57 : vector<2x8xf32> to vector<2x8x1xf32>
    %59 = tpu.reciprocal %58 {approx = true} : vector<2x8x1xf32> -> vector<2x8x1xf32>
    %60 = vector.broadcast %59 : vector<2x8x1xf32> to vector<2x8x8xf32>
    %61 = arith.mulf %56, %60 : vector<2x8x8xf32>
    %cst_19 = arith.constant 0.000000e+00 : f32
    %62 = vector.broadcast %cst_19 : f32 to vector<2x8x8xf32>
    %63 = arith.maximumf %51, %62 : vector<2x8x8xf32>
    %64 = vector.broadcast %0 : f32 to vector<2x8x8xf32>
    %65 = arith.mulf %61, %64 : vector<2x8x8xf32>
    %66 = arith.mulf %63, %63 : vector<2x8x8xf32>
    %67 = vector.broadcast %1 : f32 to vector<2x8x8xf32>
    %68 = arith.mulf %66, %67 : vector<2x8x8xf32>
    %69 = arith.addf %65, %68 : vector<2x8x8xf32>
    %70 = arith.truncf %69 : vector<2x8x8xf32> to vector<2x8x8xbf16>
    "tpu.trace_start"() <{level = 10 : i32, message = "bqk,bkd->bqd"}> : () -> ()
    %cst_20 = arith.constant dense<0.000000e+00> : vector<2x8x4xf32>
    %71 = tpu.matmul %70, %50, %cst_20 {dimension_numbers = #tpu.dot_dimension_numbers<[2], [1], [1], [2], [0, 0, 0, 1, 1, 2], [0], [0]>} : vector<2x8x8xbf16>, vector<2x8x4xbf16>, vector<2x8x4xf32> -> vector<2x8x4xf32>
    "tpu.trace_stop"() : () -> ()
    %72 = vector.shape_cast %71 : vector<2x8x4xf32> to vector<16x4xf32>
    %73 = arith.truncf %72 : vector<16x4xf32> to vector<16x4xbf16>
    %74 = vector.extract_strided_slice %11 {offsets = [4, 0], sizes = [4, 32], strides = [1, 1]} : vector<32x32xbf16> to vector<4x32xbf16>
    %cst_21 = arith.constant dense<0.000000e+00> : vector<16x32xf32>
    %75 = tpu.matmul %73, %74, %cst_21 {dimension_numbers = #tpu.dot_dimension_numbers<[1], [0], [0], [1], [0, 0, 1, 1], [], []>} : vector<16x4xbf16>, vector<4x32xbf16>, vector<16x32xf32> -> vector<16x32xf32>
    %76 = arith.addf %44, %75 : vector<16x32xf32>
    %77 = vector.extract_strided_slice %10 {offsets = [0, 0, 8], sizes = [2, 8, 4], strides = [1, 1, 1]} : vector<2x8x96xf32> to vector<2x8x4xf32>
    %78 = arith.truncf %77 : vector<2x8x4xf32> to vector<2x8x4xbf16>
    %79 = vector.extract_strided_slice %10 {offsets = [0, 0, 40], sizes = [2, 8, 4], strides = [1, 1, 1]} : vector<2x8x96xf32> to vector<2x8x4xf32>
    %80 = arith.truncf %79 : vector<2x8x4xf32> to vector<2x8x4xbf16>
    %81 = vector.extract_strided_slice %10 {offsets = [0, 0, 72], sizes = [2, 8, 4], strides = [1, 1, 1]} : vector<2x8x96xf32> to vector<2x8x4xf32>
    %82 = arith.truncf %81 : vector<2x8x4xf32> to vector<2x8x4xbf16>
    "tpu.trace_start"() <{level = 10 : i32, message = "bqd,bkd->bqk"}> : () -> ()
    %cst_22 = arith.constant dense<0.000000e+00> : vector<2x8x8xf32>
    %83 = tpu.matmul %78, %80, %cst_22 {dimension_numbers = #tpu.dot_dimension_numbers<[2], [2], [1], [1], [0, 0, 0, 1, 1, 1], [0], [0]>} : vector<2x8x4xbf16>, vector<2x8x4xbf16>, vector<2x8x8xf32> -> vector<2x8x8xf32>
    "tpu.trace_stop"() : () -> ()
    %cst_23 = arith.constant dense<0xFF800000> : vector<2x8xf32>
    %84 = vector.multi_reduction <maximumf>, %83, %cst_23 [2] : vector<2x8x8xf32> to vector<2x8xf32>
    %85 = vector.shape_cast %84 : vector<2x8xf32> to vector<2x8x1xf32>
    %86 = vector.broadcast %85 : vector<2x8x1xf32> to vector<2x8x8xf32>
    %87 = arith.subf %83, %86 : vector<2x8x8xf32>
    %88 = math.exp %87 : vector<2x8x8xf32>
    %cst_24 = arith.constant dense<0.000000e+00> : vector<2x8xf32>
    %89 = vector.multi_reduction <add>, %88, %cst_24 [2] : vector<2x8x8xf32> to vector<2x8xf32>
    %90 = vector.shape_cast %89 : vector<2x8xf32> to vector<2x8x1xf32>
    %91 = tpu.reciprocal %90 {approx = true} : vector<2x8x1xf32> -> vector<2x8x1xf32>
    %92 = vector.broadcast %91 : vector<2x8x1xf32> to vector<2x8x8xf32>
    %93 = arith.mulf %88, %92 : vector<2x8x8xf32>
    %cst_25 = arith.constant 0.000000e+00 : f32
    %94 = vector.broadcast %cst_25 : f32 to vector<2x8x8xf32>
    %95 = arith.maximumf %83, %94 : vector<2x8x8xf32>
    %96 = vector.broadcast %0 : f32 to vector<2x8x8xf32>
    %97 = arith.mulf %93, %96 : vector<2x8x8xf32>
    %98 = arith.mulf %95, %95 : vector<2x8x8xf32>
    %99 = vector.broadcast %1 : f32 to vector<2x8x8xf32>
    %100 = arith.mulf %98, %99 : vector<2x8x8xf32>
    %101 = arith.addf %97, %100 : vector<2x8x8xf32>
    %102 = arith.truncf %101 : vector<2x8x8xf32> to vector<2x8x8xbf16>
    "tpu.trace_start"() <{level = 10 : i32, message = "bqk,bkd->bqd"}> : () -> ()
    %cst_26 = arith.constant dense<0.000000e+00> : vector<2x8x4xf32>
    %103 = tpu.matmul %102, %82, %cst_26 {dimension_numbers = #tpu.dot_dimension_numbers<[2], [1], [1], [2], [0, 0, 0, 1, 1, 2], [0], [0]>} : vector<2x8x8xbf16>, vector<2x8x4xbf16>, vector<2x8x4xf32> -> vector<2x8x4xf32>
    "tpu.trace_stop"() : () -> ()
    %104 = vector.shape_cast %103 : vector<2x8x4xf32> to vector<16x4xf32>
    %105 = arith.truncf %104 : vector<16x4xf32> to vector<16x4xbf16>
    %106 = vector.extract_strided_slice %11 {offsets = [8, 0], sizes = [4, 32], strides = [1, 1]} : vector<32x32xbf16> to vector<4x32xbf16>
    %cst_27 = arith.constant dense<0.000000e+00> : vector<16x32xf32>
    %107 = tpu.matmul %105, %106, %cst_27 {dimension_numbers = #tpu.dot_dimension_numbers<[1], [0], [0], [1], [0, 0, 1, 1], [], []>} : vector<16x4xbf16>, vector<4x32xbf16>, vector<16x32xf32> -> vector<16x32xf32>
    %108 = arith.addf %76, %107 : vector<16x32xf32>
    %109 = vector.extract_strided_slice %10 {offsets = [0, 0, 12], sizes = [2, 8, 4], strides = [1, 1, 1]} : vector<2x8x96xf32> to vector<2x8x4xf32>
    %110 = arith.truncf %109 : vector<2x8x4xf32> to vector<2x8x4xbf16>
    %111 = vector.extract_strided_slice %10 {offsets = [0, 0, 44], sizes = [2, 8, 4], strides = [1, 1, 1]} : vector<2x8x96xf32> to vector<2x8x4xf32>
    %112 = arith.truncf %111 : vector<2x8x4xf32> to vector<2x8x4xbf16>
    %113 = vector.extract_strided_slice %10 {offsets = [0, 0, 76], sizes = [2, 8, 4], strides = [1, 1, 1]} : vector<2x8x96xf32> to vector<2x8x4xf32>
    %114 = arith.truncf %113 : vector<2x8x4xf32> to vector<2x8x4xbf16>
    "tpu.trace_start"() <{level = 10 : i32, message = "bqd,bkd->bqk"}> : () -> ()
    %cst_28 = arith.constant dense<0.000000e+00> : vector<2x8x8xf32>
    %115 = tpu.matmul %110, %112, %cst_28 {dimension_numbers = #tpu.dot_dimension_numbers<[2], [2], [1], [1], [0, 0, 0, 1, 1, 1], [0], [0]>} : vector<2x8x4xbf16>, vector<2x8x4xbf16>, vector<2x8x8xf32> -> vector<2x8x8xf32>
    "tpu.trace_stop"() : () -> ()
    %cst_29 = arith.constant dense<0xFF800000> : vector<2x8xf32>
    %116 = vector.multi_reduction <maximumf>, %115, %cst_29 [2] : vector<2x8x8xf32> to vector<2x8xf32>
    %117 = vector.shape_cast %116 : vector<2x8xf32> to vector<2x8x1xf32>
    %118 = vector.broadcast %117 : vector<2x8x1xf32> to vector<2x8x8xf32>
    %119 = arith.subf %115, %118 : vector<2x8x8xf32>
    %120 = math.exp %119 : vector<2x8x8xf32>
    %cst_30 = arith.constant dense<0.000000e+00> : vector<2x8xf32>
    %121 = vector.multi_reduction <add>, %120, %cst_30 [2] : vector<2x8x8xf32> to vector<2x8xf32>
    %122 = vector.shape_cast %121 : vector<2x8xf32> to vector<2x8x1xf32>
    %123 = tpu.reciprocal %122 {approx = true} : vector<2x8x1xf32> -> vector<2x8x1xf32>
    %124 = vector.broadcast %123 : vector<2x8x1xf32> to vector<2x8x8xf32>
    %125 = arith.mulf %120, %124 : vector<2x8x8xf32>
    %cst_31 = arith.constant 0.000000e+00 : f32
    %126 = vector.broadcast %cst_31 : f32 to vector<2x8x8xf32>
    %127 = arith.maximumf %115, %126 : vector<2x8x8xf32>
    %128 = vector.broadcast %0 : f32 to vector<2x8x8xf32>
    %129 = arith.mulf %125, %128 : vector<2x8x8xf32>
    %130 = arith.mulf %127, %127 : vector<2x8x8xf32>
    %131 = vector.broadcast %1 : f32 to vector<2x8x8xf32>
    %132 = arith.mulf %130, %131 : vector<2x8x8xf32>
    %133 = arith.addf %129, %132 : vector<2x8x8xf32>
    %134 = arith.truncf %133 : vector<2x8x8xf32> to vector<2x8x8xbf16>
    "tpu.trace_start"() <{level = 10 : i32, message = "bqk,bkd->bqd"}> : () -> ()
    %cst_32 = arith.constant dense<0.000000e+00> : vector<2x8x4xf32>
    %135 = tpu.matmul %134, %114, %cst_32 {dimension_numbers = #tpu.dot_dimension_numbers<[2], [1], [1], [2], [0, 0, 0, 1, 1, 2], [0], [0]>} : vector<2x8x8xbf16>, vector<2x8x4xbf16>, vector<2x8x4xf32> -> vector<2x8x4xf32>
    "tpu.trace_stop"() : () -> ()
    %136 = vector.shape_cast %135 : vector<2x8x4xf32> to vector<16x4xf32>
    %137 = arith.truncf %136 : vector<16x4xf32> to vector<16x4xbf16>
    %138 = vector.extract_strided_slice %11 {offsets = [12, 0], sizes = [4, 32], strides = [1, 1]} : vector<32x32xbf16> to vector<4x32xbf16>
    %cst_33 = arith.constant dense<0.000000e+00> : vector<16x32xf32>
    %139 = tpu.matmul %137, %138, %cst_33 {dimension_numbers = #tpu.dot_dimension_numbers<[1], [0], [0], [1], [0, 0, 1, 1], [], []>} : vector<16x4xbf16>, vector<4x32xbf16>, vector<16x32xf32> -> vector<16x32xf32>
    %140 = arith.addf %108, %139 : vector<16x32xf32>
    %141 = vector.extract_strided_slice %10 {offsets = [0, 0, 16], sizes = [2, 8, 4], strides = [1, 1, 1]} : vector<2x8x96xf32> to vector<2x8x4xf32>
    %142 = arith.truncf %141 : vector<2x8x4xf32> to vector<2x8x4xbf16>
    %143 = vector.extract_strided_slice %10 {offsets = [0, 0, 48], sizes = [2, 8, 4], strides = [1, 1, 1]} : vector<2x8x96xf32> to vector<2x8x4xf32>
    %144 = arith.truncf %143 : vector<2x8x4xf32> to vector<2x8x4xbf16>
    %145 = vector.extract_strided_slice %10 {offsets = [0, 0, 80], sizes = [2, 8, 4], strides = [1, 1, 1]} : vector<2x8x96xf32> to vector<2x8x4xf32>
    %146 = arith.truncf %145 : vector<2x8x4xf32> to vector<2x8x4xbf16>
    "tpu.trace_start"() <{level = 10 : i32, message = "bqd,bkd->bqk"}> : () -> ()
    %cst_34 = arith.constant dense<0.000000e+00> : vector<2x8x8xf32>
    %147 = tpu.matmul %142, %144, %cst_34 {dimension_numbers = #tpu.dot_dimension_numbers<[2], [2], [1], [1], [0, 0, 0, 1, 1, 1], [0], [0]>} : vector<2x8x4xbf16>, vector<2x8x4xbf16>, vector<2x8x8xf32> -> vector<2x8x8xf32>
    "tpu.trace_stop"() : () -> ()
    %cst_35 = arith.constant dense<0xFF800000> : vector<2x8xf32>
    %148 = vector.multi_reduction <maximumf>, %147, %cst_35 [2] : vector<2x8x8xf32> to vector<2x8xf32>
    %149 = vector.shape_cast %148 : vector<2x8xf32> to vector<2x8x1xf32>
    %150 = vector.broadcast %149 : vector<2x8x1xf32> to vector<2x8x8xf32>
    %151 = arith.subf %147, %150 : vector<2x8x8xf32>
    %152 = math.exp %151 : vector<2x8x8xf32>
    %cst_36 = arith.constant dense<0.000000e+00> : vector<2x8xf32>
    %153 = vector.multi_reduction <add>, %152, %cst_36 [2] : vector<2x8x8xf32> to vector<2x8xf32>
    %154 = vector.shape_cast %153 : vector<2x8xf32> to vector<2x8x1xf32>
    %155 = tpu.reciprocal %154 {approx = true} : vector<2x8x1xf32> -> vector<2x8x1xf32>
    %156 = vector.broadcast %155 : vector<2x8x1xf32> to vector<2x8x8xf32>
    %157 = arith.mulf %152, %156 : vector<2x8x8xf32>
    %cst_37 = arith.constant 0.000000e+00 : f32
    %158 = vector.broadcast %cst_37 : f32 to vector<2x8x8xf32>
    %159 = arith.maximumf %147, %158 : vector<2x8x8xf32>
    %160 = vector.broadcast %0 : f32 to vector<2x8x8xf32>
    %161 = arith.mulf %157, %160 : vector<2x8x8xf32>
    %162 = arith.mulf %159, %159 : vector<2x8x8xf32>
    %163 = vector.broadcast %1 : f32 to vector<2x8x8xf32>
    %164 = arith.mulf %162, %163 : vector<2x8x8xf32>
    %165 = arith.addf %161, %164 : vector<2x8x8xf32>
    %166 = arith.truncf %165 : vector<2x8x8xf32> to vector<2x8x8xbf16>
    "tpu.trace_start"() <{level = 10 : i32, message = "bqk,bkd->bqd"}> : () -> ()
    %cst_38 = arith.constant dense<0.000000e+00> : vector<2x8x4xf32>
    %167 = tpu.matmul %166, %146, %cst_38 {dimension_numbers = #tpu.dot_dimension_numbers<[2], [1], [1], [2], [0, 0, 0, 1, 1, 2], [0], [0]>} : vector<2x8x8xbf16>, vector<2x8x4xbf16>, vector<2x8x4xf32> -> vector<2x8x4xf32>
    "tpu.trace_stop"() : () -> ()
    %168 = vector.shape_cast %167 : vector<2x8x4xf32> to vector<16x4xf32>
    %169 = arith.truncf %168 : vector<16x4xf32> to vector<16x4xbf16>
    %170 = vector.extract_strided_slice %11 {offsets = [16, 0], sizes = [4, 32], strides = [1, 1]} : vector<32x32xbf16> to vector<4x32xbf16>
    %cst_39 = arith.constant dense<0.000000e+00> : vector<16x32xf32>
    %171 = tpu.matmul %169, %170, %cst_39 {dimension_numbers = #tpu.dot_dimension_numbers<[1], [0], [0], [1], [0, 0, 1, 1], [], []>} : vector<16x4xbf16>, vector<4x32xbf16>, vector<16x32xf32> -> vector<16x32xf32>
    %172 = arith.addf %140, %171 : vector<16x32xf32>
    %173 = vector.extract_strided_slice %10 {offsets = [0, 0, 20], sizes = [2, 8, 4], strides = [1, 1, 1]} : vector<2x8x96xf32> to vector<2x8x4xf32>
    %174 = arith.truncf %173 : vector<2x8x4xf32> to vector<2x8x4xbf16>
    %175 = vector.extract_strided_slice %10 {offsets = [0, 0, 52], sizes = [2, 8, 4], strides = [1, 1, 1]} : vector<2x8x96xf32> to vector<2x8x4xf32>
    %176 = arith.truncf %175 : vector<2x8x4xf32> to vector<2x8x4xbf16>
    %177 = vector.extract_strided_slice %10 {offsets = [0, 0, 84], sizes = [2, 8, 4], strides = [1, 1, 1]} : vector<2x8x96xf32> to vector<2x8x4xf32>
    %178 = arith.truncf %177 : vector<2x8x4xf32> to vector<2x8x4xbf16>
    "tpu.trace_start"() <{level = 10 : i32, message = "bqd,bkd->bqk"}> : () -> ()
    %cst_40 = arith.constant dense<0.000000e+00> : vector<2x8x8xf32>
    %179 = tpu.matmul %174, %176, %cst_40 {dimension_numbers = #tpu.dot_dimension_numbers<[2], [2], [1], [1], [0, 0, 0, 1, 1, 1], [0], [0]>} : vector<2x8x4xbf16>, vector<2x8x4xbf16>, vector<2x8x8xf32> -> vector<2x8x8xf32>
    "tpu.trace_stop"() : () -> ()
    %cst_41 = arith.constant dense<0xFF800000> : vector<2x8xf32>
    %180 = vector.multi_reduction <maximumf>, %179, %cst_41 [2] : vector<2x8x8xf32> to vector<2x8xf32>
    %181 = vector.shape_cast %180 : vector<2x8xf32> to vector<2x8x1xf32>
    %182 = vector.broadcast %181 : vector<2x8x1xf32> to vector<2x8x8xf32>
    %183 = arith.subf %179, %182 : vector<2x8x8xf32>
    %184 = math.exp %183 : vector<2x8x8xf32>
    %cst_42 = arith.constant dense<0.000000e+00> : vector<2x8xf32>
    %185 = vector.multi_reduction <add>, %184, %cst_42 [2] : vector<2x8x8xf32> to vector<2x8xf32>
    %186 = vector.shape_cast %185 : vector<2x8xf32> to vector<2x8x1xf32>
    %187 = tpu.reciprocal %186 {approx = true} : vector<2x8x1xf32> -> vector<2x8x1xf32>
    %188 = vector.broadcast %187 : vector<2x8x1xf32> to vector<2x8x8xf32>
    %189 = arith.mulf %184, %188 : vector<2x8x8xf32>
    %cst_43 = arith.constant 0.000000e+00 : f32
    %190 = vector.broadcast %cst_43 : f32 to vector<2x8x8xf32>
    %191 = arith.maximumf %179, %190 : vector<2x8x8xf32>
    %192 = vector.broadcast %0 : f32 to vector<2x8x8xf32>
    %193 = arith.mulf %189, %192 : vector<2x8x8xf32>
    %194 = arith.mulf %191, %191 : vector<2x8x8xf32>
    %195 = vector.broadcast %1 : f32 to vector<2x8x8xf32>
    %196 = arith.mulf %194, %195 : vector<2x8x8xf32>
    %197 = arith.addf %193, %196 : vector<2x8x8xf32>
    %198 = arith.truncf %197 : vector<2x8x8xf32> to vector<2x8x8xbf16>
    "tpu.trace_start"() <{level = 10 : i32, message = "bqk,bkd->bqd"}> : () -> ()
    %cst_44 = arith.constant dense<0.000000e+00> : vector<2x8x4xf32>
    %199 = tpu.matmul %198, %178, %cst_44 {dimension_numbers = #tpu.dot_dimension_numbers<[2], [1], [1], [2], [0, 0, 0, 1, 1, 2], [0], [0]>} : vector<2x8x8xbf16>, vector<2x8x4xbf16>, vector<2x8x4xf32> -> vector<2x8x4xf32>
    "tpu.trace_stop"() : () -> ()
    %200 = vector.shape_cast %199 : vector<2x8x4xf32> to vector<16x4xf32>
    %201 = arith.truncf %200 : vector<16x4xf32> to vector<16x4xbf16>
    %202 = vector.extract_strided_slice %11 {offsets = [20, 0], sizes = [4, 32], strides = [1, 1]} : vector<32x32xbf16> to vector<4x32xbf16>
    %cst_45 = arith.constant dense<0.000000e+00> : vector<16x32xf32>
    %203 = tpu.matmul %201, %202, %cst_45 {dimension_numbers = #tpu.dot_dimension_numbers<[1], [0], [0], [1], [0, 0, 1, 1], [], []>} : vector<16x4xbf16>, vector<4x32xbf16>, vector<16x32xf32> -> vector<16x32xf32>
    %204 = arith.addf %172, %203 : vector<16x32xf32>
    %205 = vector.extract_strided_slice %10 {offsets = [0, 0, 24], sizes = [2, 8, 4], strides = [1, 1, 1]} : vector<2x8x96xf32> to vector<2x8x4xf32>
    %206 = arith.truncf %205 : vector<2x8x4xf32> to vector<2x8x4xbf16>
    %207 = vector.extract_strided_slice %10 {offsets = [0, 0, 56], sizes = [2, 8, 4], strides = [1, 1, 1]} : vector<2x8x96xf32> to vector<2x8x4xf32>
    %208 = arith.truncf %207 : vector<2x8x4xf32> to vector<2x8x4xbf16>
    %209 = vector.extract_strided_slice %10 {offsets = [0, 0, 88], sizes = [2, 8, 4], strides = [1, 1, 1]} : vector<2x8x96xf32> to vector<2x8x4xf32>
    %210 = arith.truncf %209 : vector<2x8x4xf32> to vector<2x8x4xbf16>
    "tpu.trace_start"() <{level = 10 : i32, message = "bqd,bkd->bqk"}> : () -> ()
    %cst_46 = arith.constant dense<0.000000e+00> : vector<2x8x8xf32>
    %211 = tpu.matmul %206, %208, %cst_46 {dimension_numbers = #tpu.dot_dimension_numbers<[2], [2], [1], [1], [0, 0, 0, 1, 1, 1], [0], [0]>} : vector<2x8x4xbf16>, vector<2x8x4xbf16>, vector<2x8x8xf32> -> vector<2x8x8xf32>
    "tpu.trace_stop"() : () -> ()
    %cst_47 = arith.constant dense<0xFF800000> : vector<2x8xf32>
    %212 = vector.multi_reduction <maximumf>, %211, %cst_47 [2] : vector<2x8x8xf32> to vector<2x8xf32>
    %213 = vector.shape_cast %212 : vector<2x8xf32> to vector<2x8x1xf32>
    %214 = vector.broadcast %213 : vector<2x8x1xf32> to vector<2x8x8xf32>
    %215 = arith.subf %211, %214 : vector<2x8x8xf32>
    %216 = math.exp %215 : vector<2x8x8xf32>
    %cst_48 = arith.constant dense<0.000000e+00> : vector<2x8xf32>
    %217 = vector.multi_reduction <add>, %216, %cst_48 [2] : vector<2x8x8xf32> to vector<2x8xf32>
    %218 = vector.shape_cast %217 : vector<2x8xf32> to vector<2x8x1xf32>
    %219 = tpu.reciprocal %218 {approx = true} : vector<2x8x1xf32> -> vector<2x8x1xf32>
    %220 = vector.broadcast %219 : vector<2x8x1xf32> to vector<2x8x8xf32>
    %221 = arith.mulf %216, %220 : vector<2x8x8xf32>
    %cst_49 = arith.constant 0.000000e+00 : f32
    %222 = vector.broadcast %cst_49 : f32 to vector<2x8x8xf32>
    %223 = arith.maximumf %211, %222 : vector<2x8x8xf32>
    %224 = vector.broadcast %0 : f32 to vector<2x8x8xf32>
    %225 = arith.mulf %221, %224 : vector<2x8x8xf32>
    %226 = arith.mulf %223, %223 : vector<2x8x8xf32>
    %227 = vector.broadcast %1 : f32 to vector<2x8x8xf32>
    %228 = arith.mulf %226, %227 : vector<2x8x8xf32>
    %229 = arith.addf %225, %228 : vector<2x8x8xf32>
    %230 = arith.truncf %229 : vector<2x8x8xf32> to vector<2x8x8xbf16>
    "tpu.trace_start"() <{level = 10 : i32, message = "bqk,bkd->bqd"}> : () -> ()
    %cst_50 = arith.constant dense<0.000000e+00> : vector<2x8x4xf32>
    %231 = tpu.matmul %230, %210, %cst_50 {dimension_numbers = #tpu.dot_dimension_numbers<[2], [1], [1], [2], [0, 0, 0, 1, 1, 2], [0], [0]>} : vector<2x8x8xbf16>, vector<2x8x4xbf16>, vector<2x8x4xf32> -> vector<2x8x4xf32>
    "tpu.trace_stop"() : () -> ()
    %232 = vector.shape_cast %231 : vector<2x8x4xf32> to vector<16x4xf32>
    %233 = arith.truncf %232 : vector<16x4xf32> to vector<16x4xbf16>
    %234 = vector.extract_strided_slice %11 {offsets = [24, 0], sizes = [4, 32], strides = [1, 1]} : vector<32x32xbf16> to vector<4x32xbf16>
    %cst_51 = arith.constant dense<0.000000e+00> : vector<16x32xf32>
    %235 = tpu.matmul %233, %234, %cst_51 {dimension_numbers = #tpu.dot_dimension_numbers<[1], [0], [0], [1], [0, 0, 1, 1], [], []>} : vector<16x4xbf16>, vector<4x32xbf16>, vector<16x32xf32> -> vector<16x32xf32>
    %236 = arith.addf %204, %235 : vector<16x32xf32>
    %237 = vector.extract_strided_slice %10 {offsets = [0, 0, 28], sizes = [2, 8, 4], strides = [1, 1, 1]} : vector<2x8x96xf32> to vector<2x8x4xf32>
    %238 = arith.truncf %237 : vector<2x8x4xf32> to vector<2x8x4xbf16>
    %239 = vector.extract_strided_slice %10 {offsets = [0, 0, 60], sizes = [2, 8, 4], strides = [1, 1, 1]} : vector<2x8x96xf32> to vector<2x8x4xf32>
    %240 = arith.truncf %239 : vector<2x8x4xf32> to vector<2x8x4xbf16>
    %241 = vector.extract_strided_slice %10 {offsets = [0, 0, 92], sizes = [2, 8, 4], strides = [1, 1, 1]} : vector<2x8x96xf32> to vector<2x8x4xf32>
    %242 = arith.truncf %241 : vector<2x8x4xf32> to vector<2x8x4xbf16>
    "tpu.trace_start"() <{level = 10 : i32, message = "bqd,bkd->bqk"}> : () -> ()
    %cst_52 = arith.constant dense<0.000000e+00> : vector<2x8x8xf32>
    %243 = tpu.matmul %238, %240, %cst_52 {dimension_numbers = #tpu.dot_dimension_numbers<[2], [2], [1], [1], [0, 0, 0, 1, 1, 1], [0], [0]>} : vector<2x8x4xbf16>, vector<2x8x4xbf16>, vector<2x8x8xf32> -> vector<2x8x8xf32>
    "tpu.trace_stop"() : () -> ()
    %cst_53 = arith.constant dense<0xFF800000> : vector<2x8xf32>
    %244 = vector.multi_reduction <maximumf>, %243, %cst_53 [2] : vector<2x8x8xf32> to vector<2x8xf32>
    %245 = vector.shape_cast %244 : vector<2x8xf32> to vector<2x8x1xf32>
    %246 = vector.broadcast %245 : vector<2x8x1xf32> to vector<2x8x8xf32>
    %247 = arith.subf %243, %246 : vector<2x8x8xf32>
    %248 = math.exp %247 : vector<2x8x8xf32>
    %cst_54 = arith.constant dense<0.000000e+00> : vector<2x8xf32>
    %249 = vector.multi_reduction <add>, %248, %cst_54 [2] : vector<2x8x8xf32> to vector<2x8xf32>
    %250 = vector.shape_cast %249 : vector<2x8xf32> to vector<2x8x1xf32>
    %251 = tpu.reciprocal %250 {approx = true} : vector<2x8x1xf32> -> vector<2x8x1xf32>
    %252 = vector.broadcast %251 : vector<2x8x1xf32> to vector<2x8x8xf32>
    %253 = arith.mulf %248, %252 : vector<2x8x8xf32>
    %cst_55 = arith.constant 0.000000e+00 : f32
    %254 = vector.broadcast %cst_55 : f32 to vector<2x8x8xf32>
    %255 = arith.maximumf %243, %254 : vector<2x8x8xf32>
    %256 = vector.broadcast %0 : f32 to vector<2x8x8xf32>
    %257 = arith.mulf %253, %256 : vector<2x8x8xf32>
    %258 = arith.mulf %255, %255 : vector<2x8x8xf32>
    %259 = vector.broadcast %1 : f32 to vector<2x8x8xf32>
    %260 = arith.mulf %258, %259 : vector<2x8x8xf32>
    %261 = arith.addf %257, %260 : vector<2x8x8xf32>
    %262 = arith.truncf %261 : vector<2x8x8xf32> to vector<2x8x8xbf16>
    "tpu.trace_start"() <{level = 10 : i32, message = "bqk,bkd->bqd"}> : () -> ()
    %cst_56 = arith.constant dense<0.000000e+00> : vector<2x8x4xf32>
    %263 = tpu.matmul %262, %242, %cst_56 {dimension_numbers = #tpu.dot_dimension_numbers<[2], [1], [1], [2], [0, 0, 0, 1, 1, 2], [0], [0]>} : vector<2x8x8xbf16>, vector<2x8x4xbf16>, vector<2x8x4xf32> -> vector<2x8x4xf32>
    "tpu.trace_stop"() : () -> ()
    %264 = vector.shape_cast %263 : vector<2x8x4xf32> to vector<16x4xf32>
    %265 = arith.truncf %264 : vector<16x4xf32> to vector<16x4xbf16>
    %266 = vector.extract_strided_slice %11 {offsets = [28, 0], sizes = [4, 32], strides = [1, 1]} : vector<32x32xbf16> to vector<4x32xbf16>
    %cst_57 = arith.constant dense<0.000000e+00> : vector<16x32xf32>
    %267 = tpu.matmul %265, %266, %cst_57 {dimension_numbers = #tpu.dot_dimension_numbers<[1], [0], [0], [1], [0, 0, 1, 1], [], []>} : vector<16x4xbf16>, vector<4x32xbf16>, vector<16x32xf32> -> vector<16x32xf32>
    %268 = arith.addf %236, %267 : vector<16x32xf32>
    %c0_58 = arith.constant 0 : index
    %c0_59 = arith.constant 0 : index
    %269 = vector.load %arg6[%c0_58, %c0_59] : memref<1x32xf32, #tpu.memory_space<vmem>>, vector<1x32xf32>
    %270 = vector.broadcast %269 : vector<1x32xf32> to vector<16x32xf32>
    %271 = arith.addf %268, %270 : vector<16x32xf32>
    %272 = arith.addf %3, %271 : vector<16x32xf32>
    %c0_60 = arith.constant 0 : index
    %c0_61 = arith.constant 0 : index
    %273 = vector.load %arg7[%c0_60, %c0_61] : memref<1x32xf32, #tpu.memory_space<vmem>>, vector<1x32xf32>
    %c0_62 = arith.constant 0 : index
    %c0_63 = arith.constant 0 : index
    %274 = vector.load %arg8[%c0_62, %c0_63] : memref<1x32xf32, #tpu.memory_space<vmem>>, vector<1x32xf32>
    %cst_64 = arith.constant dense<0.000000e+00> : vector<16xf32>
    %275 = vector.multi_reduction <add>, %272, %cst_64 [1] : vector<16x32xf32> to vector<16xf32>
    %276 = vector.shape_cast %275 : vector<16xf32> to vector<16x1xf32>
    %cst_65 = arith.constant 3.200000e+01 : f32
    %277 = vector.broadcast %cst_65 : f32 to vector<16x1xf32>
    %278 = arith.divf %276, %277 : vector<16x1xf32>
    %279 = vector.broadcast %278 : vector<16x1xf32> to vector<16x32xf32>
    %280 = arith.subf %272, %279 : vector<16x32xf32>
    %281 = arith.mulf %280, %280 : vector<16x32xf32>
    %cst_66 = arith.constant dense<0.000000e+00> : vector<16xf32>
    %282 = vector.multi_reduction <add>, %281, %cst_66 [1] : vector<16x32xf32> to vector<16xf32>
    %283 = vector.shape_cast %282 : vector<16xf32> to vector<16x1xf32>
    %cst_67 = arith.constant 3.200000e+01 : f32
    %284 = vector.broadcast %cst_67 : f32 to vector<16x1xf32>
    %285 = arith.divf %283, %284 : vector<16x1xf32>
    %286 = vector.broadcast %278 : vector<16x1xf32> to vector<16x32xf32>
    %287 = arith.subf %272, %286 : vector<16x32xf32>
    %cst_68 = arith.constant 9.99999974E-6 : f32
    %288 = vector.broadcast %cst_68 : f32 to vector<16x1xf32>
    %289 = arith.addf %285, %288 : vector<16x1xf32>
    %290 = math.rsqrt %289 : vector<16x1xf32>
    %291 = vector.broadcast %290 : vector<16x1xf32> to vector<16x32xf32>
    %292 = arith.mulf %287, %291 : vector<16x32xf32>
    %293 = vector.broadcast %273 : vector<1x32xf32> to vector<16x32xf32>
    %294 = arith.mulf %292, %293 : vector<16x32xf32>
    %295 = vector.broadcast %274 : vector<1x32xf32> to vector<16x32xf32>
    %296 = arith.addf %294, %295 : vector<16x32xf32>
    %297 = arith.truncf %296 : vector<16x32xf32> to vector<16x32xbf16>
    %c0_69 = arith.constant 0 : index
    %c0_70 = arith.constant 0 : index
    %298 = vector.load %arg9[%c0_69, %c0_70] : memref<32x256xbf16, #tpu.memory_space<vmem>>, vector<32x256xbf16>
    %cst_71 = arith.constant dense<0.000000e+00> : vector<16x256xf32>
    %299 = tpu.matmul %297, %298, %cst_71 {dimension_numbers = #tpu.dot_dimension_numbers<[1], [0], [0], [1], [0, 0, 1, 1], [], []>} : vector<16x32xbf16>, vector<32x256xbf16>, vector<16x256xf32> -> vector<16x256xf32>
    %c0_72 = arith.constant 0 : index
    %c0_73 = arith.constant 0 : index
    %300 = vector.load %arg10[%c0_72, %c0_73] : memref<1x256xf32, #tpu.memory_space<vmem>>, vector<1x256xf32>
    %301 = vector.broadcast %300 : vector<1x256xf32> to vector<16x256xf32>
    %302 = arith.addf %299, %301 : vector<16x256xf32>
    %cst_74 = arith.constant 0.000000e+00 : f32
    %303 = vector.broadcast %cst_74 : f32 to vector<16x256xf32>
    %304 = arith.maximumf %302, %303 : vector<16x256xf32>
    %305 = arith.truncf %304 : vector<16x256xf32> to vector<16x256xbf16>
    %306 = vector.extract_strided_slice %305 {offsets = [0, 0], sizes = [16, 128], strides = [1, 1]} : vector<16x256xbf16> to vector<16x128xbf16>
    %c0_75 = arith.constant 0 : index
    %c0_76 = arith.constant 0 : index
    %307 = vector.load %arg11[%c0_75, %c0_76] : memref<128x32xbf16, #tpu.memory_space<vmem>>, vector<128x32xbf16>
    %cst_77 = arith.constant dense<0.000000e+00> : vector<16x32xf32>
    %308 = tpu.matmul %306, %307, %cst_77 {dimension_numbers = #tpu.dot_dimension_numbers<[1], [0], [0], [1], [0, 0, 1, 1], [], []>} : vector<16x128xbf16>, vector<128x32xbf16>, vector<16x32xf32> -> vector<16x32xf32>
    %c0_78 = arith.constant 0 : index
    %c0_79 = arith.constant 0 : index
    %309 = vector.load %arg12[%c0_78, %c0_79] : memref<1x32xf32, #tpu.memory_space<vmem>>, vector<1x32xf32>
    %310 = vector.broadcast %309 : vector<1x32xf32> to vector<16x32xf32>
    %311 = arith.addf %308, %310 : vector<16x32xf32>
    %312 = vector.extract_strided_slice %305 {offsets = [0, 128], sizes = [16, 128], strides = [1, 1]} : vector<16x256xbf16> to vector<16x128xbf16>
    %c0_80 = arith.constant 0 : index
    %c0_81 = arith.constant 0 : index
    %313 = vector.load %arg13[%c0_80, %c0_81] : memref<128x32xbf16, #tpu.memory_space<vmem>>, vector<128x32xbf16>
    %cst_82 = arith.constant dense<0.000000e+00> : vector<16x32xf32>
    %314 = tpu.matmul %312, %313, %cst_82 {dimension_numbers = #tpu.dot_dimension_numbers<[1], [0], [0], [1], [0, 0, 1, 1], [], []>} : vector<16x128xbf16>, vector<128x32xbf16>, vector<16x32xf32> -> vector<16x32xf32>
    %c0_83 = arith.constant 0 : index
    %c0_84 = arith.constant 0 : index
    %315 = vector.load %arg14[%c0_83, %c0_84] : memref<1x32xf32, #tpu.memory_space<vmem>>, vector<1x32xf32>
    %316 = vector.broadcast %315 : vector<1x32xf32> to vector<16x32xf32>
    %317 = arith.addf %314, %316 : vector<16x32xf32>
    %318 = arith.truncf %311 : vector<16x32xf32> to vector<16x32xbf16>
    %c0_85 = arith.constant 0 : index
    %c0_86 = arith.constant 0 : index
    %319 = vector.load %arg15[%c0_85, %c0_86] : memref<32x32xbf16, #tpu.memory_space<vmem>>, vector<32x32xbf16>
    %cst_87 = arith.constant dense<0.000000e+00> : vector<16x32xf32>
    %320 = tpu.matmul %318, %319, %cst_87 {dimension_numbers = #tpu.dot_dimension_numbers<[1], [0], [0], [1], [0, 0, 1, 1], [], []>} : vector<16x32xbf16>, vector<32x32xbf16>, vector<16x32xf32> -> vector<16x32xf32>
    %c0_88 = arith.constant 0 : index
    %c0_89 = arith.constant 0 : index
    %321 = vector.load %arg16[%c0_88, %c0_89] : memref<1x32xf32, #tpu.memory_space<vmem>>, vector<1x32xf32>
    %322 = vector.broadcast %321 : vector<1x32xf32> to vector<16x32xf32>
    %323 = arith.addf %320, %322 : vector<16x32xf32>
    %324 = arith.truncf %317 : vector<16x32xf32> to vector<16x32xbf16>
    %c0_90 = arith.constant 0 : index
    %c0_91 = arith.constant 0 : index
    %325 = vector.load %arg17[%c0_90, %c0_91] : memref<32x32xbf16, #tpu.memory_space<vmem>>, vector<32x32xbf16>
    %cst_92 = arith.constant dense<0.000000e+00> : vector<16x32xf32>
    %326 = tpu.matmul %324, %325, %cst_92 {dimension_numbers = #tpu.dot_dimension_numbers<[1], [0], [0], [1], [0, 0, 1, 1], [], []>} : vector<16x32xbf16>, vector<32x32xbf16>, vector<16x32xf32> -> vector<16x32xf32>
    %c0_93 = arith.constant 0 : index
    %c0_94 = arith.constant 0 : index
    %327 = vector.load %arg18[%c0_93, %c0_94] : memref<1x32xf32, #tpu.memory_space<vmem>>, vector<1x32xf32>
    %328 = vector.broadcast %327 : vector<1x32xf32> to vector<16x32xf32>
    %329 = arith.addf %326, %328 : vector<16x32xf32>
    %cst_95 = arith.constant 0.000000e+00 : f32
    %330 = vector.broadcast %cst_95 : f32 to vector<16x32xf32>
    %331 = arith.subf %330, %323 : vector<16x32xf32>
    %332 = math.exp %331 : vector<16x32xf32>
    %cst_96 = arith.constant 1.000000e+00 : f32
    %333 = vector.broadcast %cst_96 : f32 to vector<16x32xf32>
    %334 = arith.addf %333, %332 : vector<16x32xf32>
    %335 = tpu.reciprocal %334 {approx = true} : vector<16x32xf32> -> vector<16x32xf32>
    %cst_97 = arith.constant 0.000000e+00 : f32
    %336 = vector.broadcast %cst_97 : f32 to vector<16x32xf32>
    %337 = arith.subf %336, %329 : vector<16x32xf32>
    %338 = math.exp %337 : vector<16x32xf32>
    %cst_98 = arith.constant 1.000000e+00 : f32
    %339 = vector.broadcast %cst_98 : f32 to vector<16x32xf32>
    %340 = arith.addf %339, %338 : vector<16x32xf32>
    %341 = tpu.reciprocal %340 {approx = true} : vector<16x32xf32> -> vector<16x32xf32>
    %342 = arith.mulf %335, %311 : vector<16x32xf32>
    %cst_99 = arith.constant 1.000000e+00 : f32
    %343 = vector.broadcast %cst_99 : f32 to vector<16x32xf32>
    %344 = arith.subf %343, %335 : vector<16x32xf32>
    %345 = arith.mulf %344, %317 : vector<16x32xf32>
    %346 = arith.addf %342, %345 : vector<16x32xf32>
    %347 = arith.mulf %341, %317 : vector<16x32xf32>
    %cst_100 = arith.constant 1.000000e+00 : f32
    %348 = vector.broadcast %cst_100 : f32 to vector<16x32xf32>
    %349 = arith.subf %348, %341 : vector<16x32xf32>
    %350 = arith.mulf %349, %311 : vector<16x32xf32>
    %351 = arith.addf %347, %350 : vector<16x32xf32>
    %352 = arith.truncf %346 : vector<16x32xf32> to vector<16x32xbf16>
    %c0_101 = arith.constant 0 : index
    %c0_102 = arith.constant 0 : index
    %353 = vector.load %arg19[%c0_101, %c0_102] : memref<32x128xbf16, #tpu.memory_space<vmem>>, vector<32x128xbf16>
    %cst_103 = arith.constant dense<0.000000e+00> : vector<16x128xf32>
    %354 = tpu.matmul %352, %353, %cst_103 {dimension_numbers = #tpu.dot_dimension_numbers<[1], [0], [0], [1], [0, 0, 1, 1], [], []>} : vector<16x32xbf16>, vector<32x128xbf16>, vector<16x128xf32> -> vector<16x128xf32>
    %c0_104 = arith.constant 0 : index
    %c0_105 = arith.constant 0 : index
    %355 = vector.load %arg20[%c0_104, %c0_105] : memref<1x128xf32, #tpu.memory_space<vmem>>, vector<1x128xf32>
    %356 = vector.broadcast %355 : vector<1x128xf32> to vector<16x128xf32>
    %357 = arith.addf %354, %356 : vector<16x128xf32>
    %cst_106 = arith.constant 0.000000e+00 : f32
    %358 = vector.broadcast %cst_106 : f32 to vector<16x128xf32>
    %359 = arith.maximumf %357, %358 : vector<16x128xf32>
    %360 = arith.truncf %351 : vector<16x32xf32> to vector<16x32xbf16>
    %c0_107 = arith.constant 0 : index
    %c0_108 = arith.constant 0 : index
    %361 = vector.load %arg21[%c0_107, %c0_108] : memref<32x128xbf16, #tpu.memory_space<vmem>>, vector<32x128xbf16>
    %cst_109 = arith.constant dense<0.000000e+00> : vector<16x128xf32>
    %362 = tpu.matmul %360, %361, %cst_109 {dimension_numbers = #tpu.dot_dimension_numbers<[1], [0], [0], [1], [0, 0, 1, 1], [], []>} : vector<16x32xbf16>, vector<32x128xbf16>, vector<16x128xf32> -> vector<16x128xf32>
    %c0_110 = arith.constant 0 : index
    %c0_111 = arith.constant 0 : index
    %363 = vector.load %arg22[%c0_110, %c0_111] : memref<1x128xf32, #tpu.memory_space<vmem>>, vector<1x128xf32>
    %364 = vector.broadcast %363 : vector<1x128xf32> to vector<16x128xf32>
    %365 = arith.addf %362, %364 : vector<16x128xf32>
    %cst_112 = arith.constant 0.000000e+00 : f32
    %366 = vector.broadcast %cst_112 : f32 to vector<16x128xf32>
    %367 = arith.maximumf %365, %366 : vector<16x128xf32>
    %368 = tpu.concatenate %359, %367 in 1 : vector<16x128xf32>, vector<16x128xf32> -> vector<16x256xf32>
    %369 = arith.truncf %368 : vector<16x256xf32> to vector<16x256xbf16>
    %c0_113 = arith.constant 0 : index
    %c0_114 = arith.constant 0 : index
    %370 = vector.load %arg23[%c0_113, %c0_114] : memref<256x32xbf16, #tpu.memory_space<vmem>>, vector<256x32xbf16>
    %cst_115 = arith.constant dense<0.000000e+00> : vector<16x32xf32>
    %371 = tpu.matmul %369, %370, %cst_115 {dimension_numbers = #tpu.dot_dimension_numbers<[1], [0], [0], [1], [0, 0, 1, 1], [], []>} : vector<16x256xbf16>, vector<256x32xbf16>, vector<16x32xf32> -> vector<16x32xf32>
    %c0_116 = arith.constant 0 : index
    %c0_117 = arith.constant 0 : index
    %372 = vector.load %arg24[%c0_116, %c0_117] : memref<1x32xf32, #tpu.memory_space<vmem>>, vector<1x32xf32>
    %373 = vector.broadcast %372 : vector<1x32xf32> to vector<16x32xf32>
    %374 = arith.addf %371, %373 : vector<16x32xf32>
    %375 = arith.addf %296, %374 : vector<16x32xf32>
    %c0_118 = arith.constant 0 : index
    %c0_119 = arith.constant 0 : index
    %376 = vector.load %arg25[%c0_118, %c0_119] : memref<1x32xf32, #tpu.memory_space<vmem>>, vector<1x32xf32>
    %c0_120 = arith.constant 0 : index
    %c0_121 = arith.constant 0 : index
    %377 = vector.load %arg26[%c0_120, %c0_121] : memref<1x32xf32, #tpu.memory_space<vmem>>, vector<1x32xf32>
    %cst_122 = arith.constant dense<0.000000e+00> : vector<16xf32>
    %378 = vector.multi_reduction <add>, %375, %cst_122 [1] : vector<16x32xf32> to vector<16xf32>
    %379 = vector.shape_cast %378 : vector<16xf32> to vector<16x1xf32>
    %cst_123 = arith.constant 3.200000e+01 : f32
    %380 = vector.broadcast %cst_123 : f32 to vector<16x1xf32>
    %381 = arith.divf %379, %380 : vector<16x1xf32>
    %382 = vector.broadcast %381 : vector<16x1xf32> to vector<16x32xf32>
    %383 = arith.subf %375, %382 : vector<16x32xf32>
    %384 = arith.mulf %383, %383 : vector<16x32xf32>
    %cst_124 = arith.constant dense<0.000000e+00> : vector<16xf32>
    %385 = vector.multi_reduction <add>, %384, %cst_124 [1] : vector<16x32xf32> to vector<16xf32>
    %386 = vector.shape_cast %385 : vector<16xf32> to vector<16x1xf32>
    %cst_125 = arith.constant 3.200000e+01 : f32
    %387 = vector.broadcast %cst_125 : f32 to vector<16x1xf32>
    %388 = arith.divf %386, %387 : vector<16x1xf32>
    %389 = vector.broadcast %381 : vector<16x1xf32> to vector<16x32xf32>
    %390 = arith.subf %375, %389 : vector<16x32xf32>
    %cst_126 = arith.constant 9.99999974E-6 : f32
    %391 = vector.broadcast %cst_126 : f32 to vector<16x1xf32>
    %392 = arith.addf %388, %391 : vector<16x1xf32>
    %393 = math.rsqrt %392 : vector<16x1xf32>
    %394 = vector.broadcast %393 : vector<16x1xf32> to vector<16x32xf32>
    %395 = arith.mulf %390, %394 : vector<16x32xf32>
    %396 = vector.broadcast %376 : vector<1x32xf32> to vector<16x32xf32>
    %397 = arith.mulf %395, %396 : vector<16x32xf32>
    %398 = vector.broadcast %377 : vector<1x32xf32> to vector<16x32xf32>
    %399 = arith.addf %397, %398 : vector<16x32xf32>
    %400 = vector.shape_cast %399 : vector<16x32xf32> to vector<2x8x32xf32>
    %c0_127 = arith.constant 0 : index
    %c0_128 = arith.constant 0 : index
    %c0_129 = arith.constant 0 : index
    %401 = vector.load %arg27[%c0_127, %c0_128, %c0_129] : memref<2x8x32xf32, #tpu.memory_space<vmem>>, vector<2x8x32xf32>
    tpu.vector_store %arg27[%c0_127, %c0_128, %c0_129], %400 {strides = array<i32>} : memref<2x8x32xf32, #tpu.memory_space<vmem>>, vector<2x8x32xf32>,
    return
  }
  func.func @transform_0(%arg0: i32) -> i32 {
    %c0_i32 = arith.constant 0 : i32
    %c0_i32_0 = arith.constant 0 : i32
    return %c0_i32 : i32
  }
  func.func @transform_1(%arg0: i32) -> (i32, i32, i32) {
    %c0_i32 = arith.constant 0 : i32
    %c0_i32_0 = arith.constant 0 : i32
    %c0_i32_1 = arith.constant 0 : i32
    return %arg0, %c0_i32, %c0_i32_0 : i32, i32, i32
  }
  func.func @transform_2(%arg0: i32) -> (i32, i32) {
    %c0_i32 = arith.constant 0 : i32
    %c0_i32_0 = arith.constant 0 : i32
    %c0_i32_1 = arith.constant 0 : i32
    return %c0_i32, %c0_i32_0 : i32, i32
  }
  func.func @transform_3(%arg0: i32) -> (i32, i32) {
    %c0_i32 = arith.constant 0 : i32
    %c0_i32_0 = arith.constant 0 : i32
    %c0_i32_1 = arith.constant 0 : i32
    return %c0_i32, %c0_i32_0 : i32, i32
  }
  func.func @transform_4(%arg0: i32) -> (i32, i32) {
    %c0_i32 = arith.constant 0 : i32
    %c0_i32_0 = arith.constant 0 : i32
    %c0_i32_1 = arith.constant 0 : i32
    return %c0_i32, %c0_i32_0 : i32, i32
  }
  func.func @transform_5(%arg0: i32) -> (i32, i32) {
    %c0_i32 = arith.constant 0 : i32
    %c0_i32_0 = arith.constant 0 : i32
    %c0_i32_1 = arith.constant 0 : i32
    return %c0_i32, %c0_i32_0 : i32, i32
  }
  func.func @transform_6(%arg0: i32) -> (i32, i32) {
    %c0_i32 = arith.constant 0 : i32
    %c0_i32_0 = arith.constant 0 : i32
    %c0_i32_1 = arith.constant 0 : i32
    return %c0_i32, %c0_i32_0 : i32, i32
  }
  func.func @transform_7(%arg0: i32) -> (i32, i32) {
    %c0_i32 = arith.constant 0 : i32
    %c0_i32_0 = arith.constant 0 : i32
    %c0_i32_1 = arith.constant 0 : i32
    return %c0_i32, %c0_i32_0 : i32, i32
  }
  func.func @transform_8(%arg0: i32) -> (i32, i32) {
    %c0_i32 = arith.constant 0 : i32
    %c0_i32_0 = arith.constant 0 : i32
    %c0_i32_1 = arith.constant 0 : i32
    return %c0_i32, %c0_i32_0 : i32, i32
  }
  func.func @transform_9(%arg0: i32) -> (i32, i32) {
    %c0_i32 = arith.constant 0 : i32
    %c0_i32_0 = arith.constant 0 : i32
    %c0_i32_1 = arith.constant 0 : i32
    return %c0_i32, %c0_i32_0 : i32, i32
  }
  func.func @transform_10(%arg0: i32) -> (i32, i32) {
    %c0_i32 = arith.constant 0 : i32
    %c0_i32_0 = arith.constant 0 : i32
    %c0_i32_1 = arith.constant 0 : i32
    return %c0_i32, %c0_i32_0 : i32, i32
  }
  func.func @transform_11(%arg0: i32) -> (i32, i32) {
    %c0_i32 = arith.constant 0 : i32
    %c0_i32_0 = arith.constant 0 : i32
    %c0_i32_1 = arith.constant 0 : i32
    return %c0_i32, %c0_i32_0 : i32, i32
  }
  func.func @transform_12(%arg0: i32) -> (i32, i32) {
    %c0_i32 = arith.constant 0 : i32
    %c0_i32_0 = arith.constant 0 : i32
    %c0_i32_1 = arith.constant 0 : i32
    return %c0_i32, %c0_i32_0 : i32, i32
  }
  func.func @transform_13(%arg0: i32) -> (i32, i32) {
    %c0_i32 = arith.constant 0 : i32
    %c0_i32_0 = arith.constant 0 : i32
    %c0_i32_1 = arith.constant 0 : i32
    return %c0_i32, %c0_i32_0 : i32, i32
  }
  func.func @transform_14(%arg0: i32) -> (i32, i32) {
    %c0_i32 = arith.constant 0 : i32
    %c0_i32_0 = arith.constant 0 : i32
    %c0_i32_1 = arith.constant 0 : i32
    return %c0_i32, %c0_i32_0 : i32, i32
  }
  func.func @transform_15(%arg0: i32) -> (i32, i32) {
    %c0_i32 = arith.constant 0 : i32
    %c0_i32_0 = arith.constant 0 : i32
    %c0_i32_1 = arith.constant 0 : i32
    return %c0_i32, %c0_i32_0 : i32, i32
  }
  func.func @transform_16(%arg0: i32) -> (i32, i32) {
    %c0_i32 = arith.constant 0 : i32
    %c0_i32_0 = arith.constant 0 : i32
    %c0_i32_1 = arith.constant 0 : i32
    return %c0_i32, %c0_i32_0 : i32, i32
  }
  func.func @transform_17(%arg0: i32) -> (i32, i32) {
    %c0_i32 = arith.constant 0 : i32
    %c0_i32_0 = arith.constant 0 : i32
    %c0_i32_1 = arith.constant 0 : i32
    return %c0_i32, %c0_i32_0 : i32, i32
  }
  func.func @transform_18(%arg0: i32) -> (i32, i32) {
    %c0_i32 = arith.constant 0 : i32
    %c0_i32_0 = arith.constant 0 : i32
    %c0_i32_1 = arith.constant 0 : i32
    return %c0_i32, %c0_i32_0 : i32, i32
  }
  func.func @transform_19(%arg0: i32) -> (i32, i32) {
    %c0_i32 = arith.constant 0 : i32
    %c0_i32_0 = arith.constant 0 : i32
    %c0_i32_1 = arith.constant 0 : i32
    return %c0_i32, %c0_i32_0 : i32, i32
  }
  func.func @transform_20(%arg0: i32) -> (i32, i32) {
    %c0_i32 = arith.constant 0 : i32
    %c0_i32_0 = arith.constant 0 : i32
    %c0_i32_1 = arith.constant 0 : i32
    return %c0_i32, %c0_i32_0 : i32, i32
  }
  func.func @transform_21(%arg0: i32) -> (i32, i32) {
    %c0_i32 = arith.constant 0 : i32
    %c0_i32_0 = arith.constant 0 : i32
    %c0_i32_1 = arith.constant 0 : i32
    return %c0_i32, %c0_i32_0 : i32, i32
  }
  func.func @transform_22(%arg0: i32) -> (i32, i32) {
    %c0_i32 = arith.constant 0 : i32
    %c0_i32_0 = arith.constant 0 : i32
    %c0_i32_1 = arith.constant 0 : i32
    return %c0_i32, %c0_i32_0 : i32, i32
  }
  func.func @transform_23(%arg0: i32) -> (i32, i32) {
    %c0_i32 = arith.constant 0 : i32
    %c0_i32_0 = arith.constant 0 : i32
    %c0_i32_1 = arith.constant 0 : i32
    return %c0_i32, %c0_i32_0 : i32, i32
  }
  func.func @transform_24(%arg0: i32) -> (i32, i32) {
    %c0_i32 = arith.constant 0 : i32
    %c0_i32_0 = arith.constant 0 : i32
    %c0_i32_1 = arith.constant 0 : i32
    return %c0_i32, %c0_i32_0 : i32, i32
  }
  func.func @transform_25(%arg0: i32) -> (i32, i32) {
    %c0_i32 = arith.constant 0 : i32
    %c0_i32_0 = arith.constant 0 : i32
    %c0_i32_1 = arith.constant 0 : i32
    return %c0_i32, %c0_i32_0 : i32, i32
  }
  func.func @transform_26(%arg0: i32) -> (i32, i32, i32) {
    %c0_i32 = arith.constant 0 : i32
    %c0_i32_0 = arith.constant 0 : i32
    %c0_i32_1 = arith.constant 0 : i32
    return %arg0, %c0_i32, %c0_i32_0 : i32, i32, i32
  }
}

</mosaic_0001>

<bundles_post_ra>
// kernel: tpu_custom_call.1
= control target key start
LH: loop header
LB: loop body
LE: loop exit
PB: predicated region body
PF: predicated region fallthrough
CT: control target
= control target key end

     0   :  { %s6074_s0 = inlined_call_operand.hbm [shape: f32[2], index: 0, kind: input, shape index: {}]   ;;  %s6075_s1 = inlined_call_operand.hbm [shape: f32[2,8,32], index: 1, kind: input, shape index: {}]   ;;  %s6076_s2 = inlined_call_operand.hbm [shape: bf16[32,96], index: 2, kind: input, shape index: {}]   ;;  %s6077_s3 = inlined_call_operand.hbm [shape: f32[1,96], index: 3, kind: input, shape index: {}]   ;;  %s6078_s4 = inlined_call_operand.hbm [shape: bf16[32,32], index: 4, kind: input, shape index: {}]   ;;  %s6079_s5 = inlined_call_operand.hbm [shape: f32[1,32], index: 5, kind: input, shape index: {}]   ;;  %s6080_s6 = inlined_call_operand.hbm [shape: f32[1,32], index: 6, kind: input, shape index: {}]   ;;  %s6081_s7 = inlined_call_operand.hbm [shape: f32[1,32], index: 7, kind: input, shape index: {}]   ;;  %s6082_s8 = inlined_call_operand.hbm [shape: bf16[32,256], index: 8, kind: input, shape index: {}]   ;;  %s6083_s9 = inlined_call_operand.hbm [shape: f32[1,256], index: 9, kind: input, shape index: {}]   ;;  %s6084_s10 = inlined_call_operand.hbm [shape: bf16[128,32], index: 10, kind: input, shape index: {}]   ;;  %s6085_s11 = inlined_call_operand.hbm [shape: f32[1,32], index: 11, kind: input, shape index: {}]   ;;  %s6086_s12 = inlined_call_operand.hbm [shape: bf16[128,32], index: 12, kind: input, shape index: {}]   ;;  %s6087_s13 = inlined_call_operand.hbm [shape: f32[1,32], index: 13, kind: input, shape index: {}]   ;;  %s6088_s14 = inlined_call_operand.hbm [shape: bf16[32,32], index: 14, kind: input, shape index: {}]   ;;  %s6089_s15 = inlined_call_operand.hbm [shape: f32[1,32], index: 15, kind: input, shape index: {}]   ;;  %s6090_s16 = inlined_call_operand.hbm [shape: bf16[32,32], index: 16, kind: input, shape index: {}]   ;;  %s6091_s17 = inlined_call_operand.hbm [shape: f32[1,32], index: 17, kind: input, shape index: {}]   ;;  %s6092_s18 = inlined_call_operand.hbm [shape: bf16[32,128], index: 18, kind: input, shape index: {}]   ;;  %s6093_s19 = inlined_call_operand.hbm [shape: f32[1,128], index: 19, kind: input, shape index: {}]   ;;  %s6094_s20 = inlined_call_operand.hbm [shape: bf16[32,128], index: 20, kind: input, shape index: {}]   ;;  %s6095_s21 = inlined_call_operand.hbm [shape: f32[1,128], index: 21, kind: input, shape index: {}]   ;;  %s6096_s22 = inlined_call_operand.hbm [shape: bf16[256,32], index: 22, kind: input, shape index: {}]   ;;  %s6097_s23 = inlined_call_operand.hbm [shape: f32[1,32], index: 23, kind: input, shape index: {}]   ;;  %s6098_s24 = inlined_call_operand.hbm [shape: f32[1,32], index: 24, kind: input, shape index: {}]   ;;  %s6099_s25 = inlined_call_operand.hbm [shape: f32[1,32], index: 25, kind: input, shape index: {}]   ;;  %s6100_s26 = inlined_call_operand.hbm [shape: f32[2,8,32], index: 26, kind: output, shape index: {}]  }
   0x1   :  { %6117 = sst [smem:[#allocation59_spill]] %s6074_s0 }
   0x2   :  { %6118 = sst [smem:[#allocation60_spill]] %s6075_s1 }
   0x3   :  { %6119 = sst [smem:[#allocation61_spill]] %s6076_s2 }
   0x4   :  { %6120 = sst [smem:[#allocation62_spill]] %s6077_s3 }
   0x5   :  { %6121 = sst [smem:[#allocation63_spill]] %s6078_s4 }
   0x6   :  { %6122 = sst [smem:[#allocation64_spill]] %s6079_s5 }
   0x7   :  { %6123 = sst [smem:[#allocation65_spill]] %s6080_s6 }
   0x8   :  { %6124 = sst [smem:[#allocation66_spill]] %s6081_s7 }
   0x9   :  { %6125 = sst [smem:[#allocation67_spill]] %s6082_s8 }
   0xa   :  { %6126 = sst [smem:[#allocation68_spill]] %s6083_s9 }
   0xb   :  { %6127 = sst [smem:[#allocation69_spill]] %s6084_s10 }
   0xc   :  { %6128 = sst [smem:[#allocation70_spill]] %s6097_s23 }
   0xd   :  { %6129 = sst [smem:[#allocation71_spill]] %s6099_s25 }
   0xe   :  { %6130 = sst [smem:[#allocation72_spill]] %s6100_s26 }
   0xf   :  { %31 = vsyncpa [#allocation5], 0 }
  0x10   :  { %32 = vsyncpa [#allocation3], 0 }
  0x11   :  { %33 = vsyncpa [#allocation8], 0 }
  0x12   :  { %34 = vsyncpa [#allocation11], 0 }
  0x13   :  { %35 = vsyncpa [#allocation14], 0 }
  0x14   :  { %36 = vsyncpa [#allocation17], 0 }
  0x15   :  { %37 = vsyncpa [#allocation20], 0 }
  0x16   :  { %38 = vsyncpa [#allocation23], 0 }
  0x17   :  { %39 = vsyncpa [#allocation26], 0 }
  0x18   :  { %40 = vsyncpa [#allocation29], 0 }
  0x19   :  { %41 = vsyncpa [#allocation32], 0 }
  0x1a   :  { %42 = vsyncpa [#allocation35], 0 }
  0x1b   :  { %43 = vsyncpa [#allocation38], 0 }
  0x1c   :  { %44 = vsyncpa [#allocation41], 0 }
  0x1d   :  { %45 = vsyncpa [#allocation4], 0  ;;  %s5053_s27 = smov [#allocation7]   ;;  %s6131_s8 = sld [smem:[#allocation61_spill]] }
  0x1e   :  { %s71_s3 = sshll.u32 %s5053_s27, 4  ;;  %s72_s3 = int_to_ptr.vmem [resolvable:$true] %s71_s3 }
  0x23   :  { %s4441_s4 = scalar_lea.hbm %s6131_s8, 256 }
  0x24   :  { %p4442_p0 = scmp.ne.s32.totalorder %s6131_s8, %s4441_s4  ;;  %p4445_p1 = scmp.lt.u32.totalorder %s4441_s4, %s6131_s8 }
  0x26   :  { %p4447_p2 = pnand %p4445_p1, %p4442_p0 }
  0x28   :  { %4450 = shalt.err (!%p4447_p2)
}
  0x29   :  { %s4451_s2 = scalar_lea.vmem %s72_s3, 256  ;;  %p4456_p4 = scmp.lt.s32.totalorder %s72_s3, %s72_s3 }
  0x2a   :  { %p4452_p3 = scmp.ne.s32.totalorder %s72_s3, %s4451_s2  ;;  %p4457_p5 = scmp.lt.s32.totalorder %s4451_s2, %s4451_s2 }
  0x2c   :  { %p4458_p6 = por %p4457_p5, %p4456_p4 }
  0x2e   :  { %p4459_p7 = pnand %p4458_p6, %p4452_p3 }
  0x30   :  { %4462 = shalt.err (!%p4459_p7)
}
  0x31   :  { %s5054_s5 = smov 64   ;;  %s5055_s10 = smov 4  }
  0x32   :  { %77 = dma.hbm_to_vmem [thread:$0]  %s6131_s8, 256, %s72_s3, [#allocation8], %s5054_s5, %s5054_s5, %s5055_s10  }
  0x33   :  { %s5056_s27 = smov [#allocation10]   ;;  %s5057_s28 = smov [#allocation13]  }
  0x34   :  { %s93_s7 = sshll.u32 %s5056_s27, 4  ;;  %s116_s4 = sshll.u32 %s5057_s28, 4  ;;  %s94_s7 = int_to_ptr.vmem [resolvable:$true] %s93_s7  ;;  %s117_s4 = int_to_ptr.vmem [resolvable:$true] %s116_s4 }
  0x35   :  { %s6132_s9 = sld [smem:[#allocation63_spill]] }
  0x3b   :  { %s4463_s30 = scalar_lea.hbm %s6132_s9, 256 }
  0x3c   :  { %p4464_p8 = scmp.ne.s32.totalorder %s6132_s9, %s4463_s30  ;;  %p4467_p9 = scmp.lt.u32.totalorder %s4463_s30, %s6132_s9 }
  0x3e   :  { %p4469_p10 = pnand %p4467_p9, %p4464_p8 }
  0x40   :  { %4472 = shalt.err (!%p4469_p10)
}
  0x41   :  { %s4473_s3 = scalar_lea.vmem %s94_s7, 256  ;;  %p4478_p12 = scmp.lt.s32.totalorder %s94_s7, %s94_s7 }
  0x42   :  { %p4474_p11 = scmp.ne.s32.totalorder %s94_s7, %s4473_s3  ;;  %p4479_p13 = scmp.lt.s32.totalorder %s4473_s3, %s4473_s3 }
  0x44   :  { %p4480_p0 = por %p4479_p13, %p4478_p12 }
  0x46   :  { %p4481_p1 = pnand %p4480_p0, %p4474_p11 }
  0x48   :  { %4484 = shalt.err (!%p4481_p1)
}
  0x49   :  { %99 = dma.hbm_to_vmem [thread:$0]  %s6132_s9, 256, %s94_s7, [#allocation11], %s5054_s5, %s5054_s5, %s5055_s10  }
  0x4a   :  { %s6133_s25 = sld [smem:[#allocation65_spill]] }
  0x50   :  { %s4485_s1 = scalar_lea.hbm %s6133_s25, 16 }
  0x51   :  { %p4486_p2 = scmp.ne.s32.totalorder %s6133_s25, %s4485_s1  ;;  %p4489_p3 = scmp.lt.u32.totalorder %s4485_s1, %s6133_s25 }
  0x53   :  { %p4491_p4 = pnand %p4489_p3, %p4486_p2 }
  0x55   :  { %4494 = shalt.err (!%p4491_p4)
}
  0x56   :  { %s4495_s30 = scalar_lea.vmem %s117_s4, 16  ;;  %s4499_s2 = scalar_lea.vmem %s117_s4, 32 }
  0x57   :  { %p4496_p5 = scmp.ne.s32.totalorder %s117_s4, %s4495_s30  ;;  %p4500_p6 = scmp.lt.s32.totalorder %s117_s4, %s117_s4 }
  0x58   :  { %p4501_p7 = scmp.lt.s32.totalorder %s4499_s2, %s4495_s30 }
  0x5a   :  { %p4502_p8 = por %p4501_p7, %p4500_p6 }
  0x5c   :  { %p4503_p9 = pnand %p4502_p8, %p4496_p5 }
  0x5e   :  { %4506 = shalt.err (!%p4503_p9)
}
  0x5f   :  { %119 = dma.hbm_to_vmem [thread:$0]  %s6133_s25, 16, %s117_s4, [#allocation14]  }
  0x60   :  { %s5058_s3 = smov [#allocation16]   ;;  %s5059_s6 = smov [#allocation19]  }
  0x61   :  { %s135_s8 = sshll.u32 %s5058_s3, 4  ;;  %s157_s26 = sshll.u32 %s5059_s6, 4  ;;  %s136_s8 = int_to_ptr.vmem [resolvable:$true] %s135_s8  ;;  %s158_s26 = int_to_ptr.vmem [resolvable:$true] %s157_s26 }
  0x62   :  { %s6134_s27 = sld [smem:[#allocation67_spill]] }
  0x68   :  { %s4507_s28 = scalar_lea.hbm %s6134_s27, 512 }
  0x69   :  { %p4508_p10 = scmp.ne.s32.totalorder %s6134_s27, %s4507_s28  ;;  %p4511_p11 = scmp.lt.u32.totalorder %s4507_s28, %s6134_s27 }
  0x6b   :  { %p4513_p12 = pnand %p4511_p11, %p4508_p10 }
  0x6d   :  { %4516 = shalt.err (!%p4513_p12)
}
  0x6e   :  { %s4517_s4 = scalar_lea.vmem %s136_s8, 512  ;;  %p4522_p0 = scmp.lt.s32.totalorder %s136_s8, %s136_s8 }
  0x6f   :  { %p4518_p13 = scmp.ne.s32.totalorder %s136_s8, %s4517_s4  ;;  %p4523_p1 = scmp.lt.s32.totalorder %s4517_s4, %s4517_s4 }
  0x71   :  { %p4524_p2 = por %p4523_p1, %p4522_p0 }
  0x73   :  { %p4525_p3 = pnand %p4524_p2, %p4518_p13 }
  0x75   :  { %4528 = shalt.err (!%p4525_p3)
}
  0x76   :  { %s6115_s25 = smov 128   ;;  %s5061_s7 = smov 8  }
  0x77   :  { %141 = dma.hbm_to_vmem [thread:$0]  %s6134_s27, 512, %s136_s8, [#allocation17], %s6115_s25, %s6115_s25, %s5061_s7  }
  0x78   :  { %s6135_s1 = sld [smem:[#allocation69_spill]] }
  0x7e   :  { %s4529_s28 = scalar_lea.hbm %s6135_s1, 1024 }
  0x7f   :  { %p4530_p4 = scmp.ne.s32.totalorder %s6135_s1, %s4529_s28  ;;  %p4533_p5 = scmp.lt.u32.totalorder %s4529_s28, %s6135_s1 }
  0x81   :  { %p4535_p6 = pnand %p4533_p5, %p4530_p4 }
  0x83   :  { %4538 = shalt.err (!%p4535_p6)
}
  0x84   :  { %s4539_s4 = scalar_lea.vmem %s158_s26, 1024  ;;  %p4544_p8 = scmp.lt.s32.totalorder %s158_s26, %s158_s26 }
  0x85   :  { %p4540_p7 = scmp.ne.s32.totalorder %s158_s26, %s4539_s4  ;;  %p4545_p9 = scmp.lt.s32.totalorder %s4539_s4, %s4539_s4 }
  0x87   :  { %p4546_p10 = por %p4545_p9, %p4544_p8 }
  0x89   :  { %p4547_p11 = pnand %p4546_p10, %p4540_p7 }
  0x8b   :  { %4550 = shalt.err (!%p4547_p11)
}
  0x8c   :  { %163 = dma.hbm_to_vmem [thread:$0]  %s6135_s1, 1024, %s158_s26, [#allocation20], %s5054_s5, %s5054_s5, %s5055_s10  }
  0x8d   :  { %s5062_s9 = smov [#allocation22]   ;;  %s5063_s6 = smov [#allocation25]  }
  0x8e   :  { %s179_s3 = sshll.u32 %s5062_s9, 4  ;;  %s201_s23 = sshll.u32 %s5063_s6, 4  ;;  %s180_s3 = int_to_ptr.vmem [resolvable:$true] %s179_s3  ;;  %s202_s23 = int_to_ptr.vmem [resolvable:$true] %s201_s23 }
  0x8f   :  { %s4551_s0 = scalar_lea.hbm %s6086_s12, 1024 }
  0x90   :  { %p4552_p12 = scmp.ne.s32.totalorder %s6086_s12, %s4551_s0  ;;  %p4555_p13 = scmp.lt.u32.totalorder %s4551_s0, %s6086_s12 }
  0x92   :  { %p4557_p0 = pnand %p4555_p13, %p4552_p12 }
  0x94   :  { %4560 = shalt.err (!%p4557_p0)
}
  0x95   :  { %s4561_s26 = scalar_lea.vmem %s180_s3, 1024  ;;  %p4566_p2 = scmp.lt.s32.totalorder %s180_s3, %s180_s3 }
  0x96   :  { %p4562_p1 = scmp.ne.s32.totalorder %s180_s3, %s4561_s26  ;;  %p4567_p3 = scmp.lt.s32.totalorder %s4561_s26, %s4561_s26 }
  0x98   :  { %p4568_p4 = por %p4567_p3, %p4566_p2 }
  0x9a   :  { %p4569_p5 = pnand %p4568_p4, %p4562_p1 }
  0x9c   :  { %4572 = shalt.err (!%p4569_p5)
}
  0x9d   :  { %185 = dma.hbm_to_vmem [thread:$0]  %s6086_s12, 1024, %s180_s3, [#allocation23], %s5054_s5, %s5054_s5, %s5055_s10  }
  0x9e   :  { %s4573_s9 = scalar_lea.hbm %s6088_s14, 256 }
  0x9f   :  { %p4574_p6 = scmp.ne.s32.totalorder %s6088_s14, %s4573_s9  ;;  %p4577_p7 = scmp.lt.u32.totalorder %s4573_s9, %s6088_s14 }
  0xa1   :  { %p4579_p8 = pnand %p4577_p7, %p4574_p6 }
  0xa3   :  { %4582 = shalt.err (!%p4579_p8)
}
  0xa4   :  { %s4583_s30 = scalar_lea.vmem %s202_s23, 256  ;;  %p4588_p10 = scmp.lt.s32.totalorder %s202_s23, %s202_s23 }
  0xa5   :  { %p4584_p9 = scmp.ne.s32.totalorder %s202_s23, %s4583_s30  ;;  %p4589_p11 = scmp.lt.s32.totalorder %s4583_s30, %s4583_s30 }
  0xa7   :  { %p4590_p12 = por %p4589_p11, %p4588_p10 }
  0xa9   :  { %p4591_p13 = pnand %p4590_p12, %p4584_p9 }
  0xab   :  { %4594 = shalt.err (!%p4591_p13)
}
  0xac   :  { %207 = dma.hbm_to_vmem [thread:$0]  %s6088_s14, 256, %s202_s23, [#allocation26], %s5054_s5, %s5054_s5, %s5055_s10  }
  0xad   :  { %s5064_s2 = smov [#allocation28]   ;;  %s5065_s26 = smov [#allocation31]  }
  0xae   :  { %s223_s4 = sshll.u32 %s5064_s2, 4  ;;  %s245_s1 = sshll.u32 %s5065_s26, 4  ;;  %s224_s4 = int_to_ptr.vmem [resolvable:$true] %s223_s4  ;;  %s246_s1 = int_to_ptr.vmem [resolvable:$true] %s245_s1 }
  0xaf   :  { %s4595_s25 = scalar_lea.hbm %s6090_s16, 256 }
  0xb0   :  { %p4596_p0 = scmp.ne.s32.totalorder %s6090_s16, %s4595_s25  ;;  %p4599_p1 = scmp.lt.u32.totalorder %s4595_s25, %s6090_s16 }
  0xb2   :  { %p4601_p2 = pnand %p4599_p1, %p4596_p0 }
  0xb4   :  { %4604 = shalt.err (!%p4601_p2)
}
  0xb5   :  { %s4605_s14 = scalar_lea.vmem %s224_s4, 256  ;;  %p4610_p4 = scmp.lt.s32.totalorder %s224_s4, %s224_s4 }
  0xb6   :  { %p4606_p3 = scmp.ne.s32.totalorder %s224_s4, %s4605_s14  ;;  %p4611_p5 = scmp.lt.s32.totalorder %s4605_s14, %s4605_s14 }
  0xb8   :  { %p4612_p6 = por %p4611_p5, %p4610_p4 }
  0xba   :  { %p4613_p7 = pnand %p4612_p6, %p4606_p3 }
  0xbc   :  { %4616 = shalt.err (!%p4613_p7)
}
  0xbd   :  { %229 = dma.hbm_to_vmem [thread:$0]  %s6090_s16, 256, %s224_s4, [#allocation29], %s5054_s5, %s5054_s5, %s5055_s10  }
  0xbe   :  { %s4617_s3 = scalar_lea.hbm %s6092_s18, 256 }
  0xbf   :  { %p4618_p8 = scmp.ne.s32.totalorder %s6092_s18, %s4617_s3  ;;  %p4621_p9 = scmp.lt.u32.totalorder %s4617_s3, %s6092_s18 }
  0xc1   :  { %p4623_p10 = pnand %p4621_p9, %p4618_p8 }
  0xc3   :  { %4626 = shalt.err (!%p4623_p10)
}
  0xc4   :  { %s4627_s25 = scalar_lea.vmem %s246_s1, 256  ;;  %p4632_p12 = scmp.lt.s32.totalorder %s246_s1, %s246_s1 }
  0xc5   :  { %p4628_p11 = scmp.ne.s32.totalorder %s246_s1, %s4627_s25  ;;  %p4633_p13 = scmp.lt.s32.totalorder %s4627_s25, %s4627_s25 }
  0xc7   :  { %p4634_p0 = por %p4633_p13, %p4632_p12 }
  0xc9   :  { %p4635_p1 = pnand %p4634_p0, %p4628_p11 }
  0xcb   :  { %4638 = shalt.err (!%p4635_p1)
}
  0xcc   :  { %251 = dma.hbm_to_vmem [thread:$0]  %s6092_s18, 256, %s246_s1, [#allocation32], %s5054_s5, %s5054_s5, %s5055_s10  }
  0xcd   :  { %s5066_s9 = smov [#allocation34]   ;;  %s5067_s28 = smov [#allocation37]  }
  0xce   :  { %s267_s6 = sshll.u32 %s5066_s9, 4  ;;  %s289_s29 = sshll.u32 %s5067_s28, 4  ;;  %s268_s6 = int_to_ptr.vmem [resolvable:$true] %s267_s6  ;;  %s290_s29 = int_to_ptr.vmem [resolvable:$true] %s289_s29 }
  0xcf   :  { %s4639_s0 = scalar_lea.hbm %s6094_s20, 256 }
  0xd0   :  { %p4640_p2 = scmp.ne.s32.totalorder %s6094_s20, %s4639_s0  ;;  %p4643_p3 = scmp.lt.u32.totalorder %s4639_s0, %s6094_s20 }
  0xd2   :  { %p4645_p4 = pnand %p4643_p3, %p4640_p2 }
  0xd4   :  { %4648 = shalt.err (!%p4645_p4)
}
  0xd5   :  { %s4649_s18 = scalar_lea.vmem %s268_s6, 256  ;;  %p4654_p6 = scmp.lt.s32.totalorder %s268_s6, %s268_s6 }
  0xd6   :  { %p4650_p5 = scmp.ne.s32.totalorder %s268_s6, %s4649_s18  ;;  %p4655_p7 = scmp.lt.s32.totalorder %s4649_s18, %s4649_s18 }
  0xd8   :  { %p4656_p8 = por %p4655_p7, %p4654_p6 }
  0xda   :  { %p4657_p9 = pnand %p4656_p8, %p4650_p5 }
  0xdc   :  { %4660 = shalt.err (!%p4657_p9)
}
  0xdd   :  { %273 = dma.hbm_to_vmem [thread:$0]  %s6094_s20, 256, %s268_s6, [#allocation35], %s5054_s5, %s5054_s5, %s5055_s10  }
  0xde   :  { %s4661_s25 = scalar_lea.hbm %s6096_s22, 2048 }
  0xdf   :  { %p4662_p10 = scmp.ne.s32.totalorder %s6096_s22, %s4661_s25  ;;  %p4665_p11 = scmp.lt.u32.totalorder %s4661_s25, %s6096_s22 }
  0xe1   :  { %p4667_p12 = pnand %p4665_p11, %p4662_p10 }
  0xe3   :  { %4670 = shalt.err (!%p4667_p12)
}
  0xe4   :  { %s4671_s14 = scalar_lea.vmem %s290_s29, 2048  ;;  %p4676_p0 = scmp.lt.s32.totalorder %s290_s29, %s290_s29 }
  0xe5   :  { %p4672_p13 = scmp.ne.s32.totalorder %s290_s29, %s4671_s14  ;;  %p4677_p1 = scmp.lt.s32.totalorder %s4671_s14, %s4671_s14 }
  0xe7   :  { %p4678_p2 = por %p4677_p1, %p4676_p0 }
  0xe9   :  { %p4679_p3 = pnand %p4678_p2, %p4672_p13 }
  0xeb   :  { %4682 = shalt.err (!%p4679_p3)
}
  0xec   :  { %295 = dma.hbm_to_vmem [thread:$0]  %s6096_s22, 2048, %s290_s29, [#allocation38], %s5054_s5, %s5054_s5, %s5055_s10  }
  0xed   :  { %s5068_s23 = smov [#allocation40]   ;;  %s4683_s3 = scalar_lea.hbm %s6098_s24, 16 }
  0xee   :  { %s312_s0 = sshll.u32 %s5068_s23, 4  ;;  %p4684_p4 = scmp.ne.s32.totalorder %s6098_s24, %s4683_s3  ;;  %s313_s0 = int_to_ptr.vmem [resolvable:$true] %s312_s0 }
  0xef   :  { %p4687_p5 = scmp.lt.u32.totalorder %s4683_s3, %s6098_s24 }
  0xf1   :  { %p4689_p6 = pnand %p4687_p5, %p4684_p4 }
  0xf3   :  { %4692 = shalt.err (!%p4689_p6)
}
  0xf4   :  { %s4693_s8 = scalar_lea.vmem %s313_s0, 16  ;;  %s4697_s22 = scalar_lea.vmem %s313_s0, 32 }
  0xf5   :  { %p4694_p7 = scmp.ne.s32.totalorder %s313_s0, %s4693_s8  ;;  %p4698_p8 = scmp.lt.s32.totalorder %s313_s0, %s313_s0 }
  0xf6   :  { %p4699_p9 = scmp.lt.s32.totalorder %s4697_s22, %s4693_s8 }
  0xf8   :  { %p4700_p10 = por %p4699_p9, %p4698_p8 }
  0xfa   :  { %p4701_p11 = pnand %p4700_p10, %p4694_p7 }
  0xfc   :  { %4704 = shalt.err (!%p4701_p11)
}
  0xfd   :  { %315 = dma.hbm_to_vmem [thread:$0]  %s6098_s24, 16, %s313_s0, [#allocation41]  }
  0xfe   :  { %s6136_s16 = sld [smem:[#allocation59_spill]] }
 0x104   :  { %s4705_s4 = scalar_lea.hbm %s6136_s16, 16 }
 0x105   :  { %p4706_p12 = scmp.ne.s32.totalorder %s6136_s16, %s4705_s4  ;;  %p4709_p13 = scmp.lt.u32.totalorder %s4705_s4, %s6136_s16 }
 0x107   :  { %p4711_p0 = pnand %p4709_p13, %p4706_p12 }
 0x109   :  { %4714 = shalt.err (!%p4711_p0)
}
 0x10a   :  { %s5069_s6 = smov [#allocation2]   ;;  %s5070_s24 = smov [#allocation6]  }
 0x10b   :  { %53 = dma.hbm_to_smem %s6136_s16, 16, %s5069_s6, [#allocation5]  }
 0x10c   :  { %s59_s0 = sshll.u32 %s5070_s24, 4  ;;  %s5071_s12 = smov [#allocation9]   ;;  %s60_s0 = int_to_ptr.vmem [resolvable:$true] %s59_s0 }
 0x10d   :  { %s84_s3 = sshll.u32 %s5071_s12, 4  ;;  %s6137_s1 = sld [smem:[#allocation60_spill]]  ;;  %s85_s3 = int_to_ptr.vmem [resolvable:$true] %s84_s3 }
 0x113   :  { %s4715_s26 = scalar_lea.hbm %s6137_s1, 256 }
 0x114   :  { %p4716_p1 = scmp.ne.s32.totalorder %s6137_s1, %s4715_s26  ;;  %p4719_p2 = scmp.lt.u32.totalorder %s4715_s26, %s6137_s1 }
 0x116   :  { %p4721_p3 = pnand %p4719_p2, %p4716_p1 }
 0x118   :  { %4724 = shalt.err (!%p4721_p3)
}
 0x119   :  { %s4725_s27 = scalar_lea.vmem %s60_s0, 256  ;;  %p4730_p5 = scmp.lt.s32.totalorder %s60_s0, %s60_s0 }
 0x11a   :  { %p4726_p4 = scmp.ne.s32.totalorder %s60_s0, %s4725_s27  ;;  %p4731_p6 = scmp.lt.s32.totalorder %s4725_s27, %s4725_s27 }
 0x11c   :  { %p4732_p7 = por %p4731_p6, %p4730_p5 }
 0x11e   :  { %p4733_p8 = pnand %p4732_p7, %p4726_p4 }
 0x120   :  { %4736 = shalt.err (!%p4733_p8)
}
 0x121   :  { %s6138_s25 = smov 128   ;;  %s6139_s14 = sld [smem:[#allocation62_spill]] }
 0x122   :  { %65 = dma.hbm_to_vmem [thread:$0]  %s6137_s1, 256, %s60_s0, [#allocation3], %s6138_s25, %s6138_s25, %s5061_s7  }
 0x127   :  { %s4737_s20 = scalar_lea.hbm %s6139_s14, 16 }
 0x128   :  { %p4738_p9 = scmp.ne.s32.totalorder %s6139_s14, %s4737_s20  ;;  %p4741_p10 = scmp.lt.u32.totalorder %s4737_s20, %s6139_s14 }
 0x12a   :  { %p4743_p11 = pnand %p4741_p10, %p4738_p9 }
 0x12c   :  { %4746 = shalt.err (!%p4743_p11)
}
 0x12d   :  { %s4747_s12 = scalar_lea.vmem %s85_s3, 16  ;;  %s4751_s2 = scalar_lea.vmem %s85_s3, 32 }
 0x12e   :  { %p4748_p12 = scmp.ne.s32.totalorder %s85_s3, %s4747_s12  ;;  %p4752_p13 = scmp.lt.s32.totalorder %s85_s3, %s85_s3 }
 0x12f   :  { %p4753_p0 = scmp.lt.s32.totalorder %s4751_s2, %s4747_s12 }
 0x131   :  { %p4754_p1 = por %p4753_p0, %p4752_p13 }
 0x133   :  { %p4755_p2 = pnand %p4754_p1, %p4748_p12 }
 0x135   :  { %4758 = shalt.err (!%p4755_p2)
}
 0x136   :  { %87 = dma.hbm_to_vmem [thread:$0]  %s6139_s14, 16, %s85_s3, [#allocation8]  }
 0x137   :  { %s5072_s1 = smov [#allocation12]   ;;  %s5073_s8 = smov [#allocation15]  }
 0x138   :  { %s106_s26 = sshll.u32 %s5072_s1, 4  ;;  %s126_s22 = sshll.u32 %s5073_s8, 4  ;;  %s107_s26 = int_to_ptr.vmem [resolvable:$true] %s106_s26  ;;  %s127_s22 = int_to_ptr.vmem [resolvable:$true] %s126_s22 }
 0x139   :  { %s6140_s27 = sld [smem:[#allocation64_spill]] }
 0x13f   :  { %s4759_s16 = scalar_lea.hbm %s6140_s27, 16 }
 0x140   :  { %p4760_p3 = scmp.ne.s32.totalorder %s6140_s27, %s4759_s16  ;;  %p4763_p4 = scmp.lt.u32.totalorder %s4759_s16, %s6140_s27 }
 0x142   :  { %p4765_p5 = pnand %p4763_p4, %p4760_p3 }
 0x144   :  { %4768 = shalt.err (!%p4765_p5)
}
 0x145   :  { %s4769_s3 = scalar_lea.vmem %s107_s26, 16  ;;  %s4773_s14 = scalar_lea.vmem %s107_s26, 32 }
 0x146   :  { %p4770_p6 = scmp.ne.s32.totalorder %s107_s26, %s4769_s3  ;;  %p4774_p7 = scmp.lt.s32.totalorder %s107_s26, %s107_s26 }
 0x147   :  { %p4775_p8 = scmp.lt.s32.totalorder %s4773_s14, %s4769_s3 }
 0x149   :  { %p4776_p9 = por %p4775_p8, %p4774_p7 }
 0x14b   :  { %p4777_p10 = pnand %p4776_p9, %p4770_p6 }
 0x14d   :  { %4780 = shalt.err (!%p4777_p10)
}
 0x14e   :  { %109 = dma.hbm_to_vmem [thread:$0]  %s6140_s27, 16, %s107_s26, [#allocation11]  }
 0x14f   :  { %s6141_s12 = sld [smem:[#allocation66_spill]] }
 0x155   :  { %s4781_s2 = scalar_lea.hbm %s6141_s12, 16 }
 0x156   :  { %p4782_p11 = scmp.ne.s32.totalorder %s6141_s12, %s4781_s2  ;;  %p4785_p12 = scmp.lt.u32.totalorder %s4781_s2, %s6141_s12 }
 0x158   :  { %p4787_p13 = pnand %p4785_p12, %p4782_p11 }
 0x15a   :  { %4790 = shalt.err (!%p4787_p13)
}
 0x15b   :  { %s4791_s10 = scalar_lea.vmem %s127_s22, 16  ;;  %s4795_s29 = scalar_lea.vmem %s127_s22, 32 }
 0x15c   :  { %p4792_p0 = scmp.ne.s32.totalorder %s127_s22, %s4791_s10  ;;  %p4796_p1 = scmp.lt.s32.totalorder %s127_s22, %s127_s22 }
 0x15d   :  { %p4797_p2 = scmp.lt.s32.totalorder %s4795_s29, %s4791_s10 }
 0x15f   :  { %p4798_p3 = por %p4797_p2, %p4796_p1 }
 0x161   :  { %p4799_p4 = pnand %p4798_p3, %p4792_p0 }
 0x163   :  { %4802 = shalt.err (!%p4799_p4)
}
 0x164   :  { %129 = dma.hbm_to_vmem [thread:$0]  %s6141_s12, 16, %s127_s22, [#allocation14]  }
 0x165   :  { %s5074_s16 = smov [#allocation18]   ;;  %s5075_s9 = smov [#allocation21]  }
 0x166   :  { %s148_s4 = sshll.u32 %s5074_s16, 4  ;;  %s170_s28 = sshll.u32 %s5075_s9, 4  ;;  %s149_s4 = int_to_ptr.vmem [resolvable:$true] %s148_s4  ;;  %s171_s28 = int_to_ptr.vmem [resolvable:$true] %s170_s28 }
 0x167   :  { %s6142_s14 = sld [smem:[#allocation68_spill]] }
 0x16d   :  { %s4803_s6 = scalar_lea.hbm %s6142_s14, 32 }
 0x16e   :  { %p4804_p5 = scmp.ne.s32.totalorder %s6142_s14, %s4803_s6  ;;  %p4807_p6 = scmp.lt.u32.totalorder %s4803_s6, %s6142_s14 }
 0x170   :  { %p4809_p7 = pnand %p4807_p6, %p4804_p5 }
 0x172   :  { %4812 = shalt.err (!%p4809_p7)
}
 0x173   :  { %s4813_s22 = scalar_lea.vmem %s149_s4, 32  ;;  %p4818_p9 = scmp.lt.s32.totalorder %s149_s4, %s149_s4 }
 0x174   :  { %p4814_p8 = scmp.ne.s32.totalorder %s149_s4, %s4813_s22  ;;  %p4819_p10 = scmp.lt.s32.totalorder %s4813_s22, %s4813_s22 }
 0x176   :  { %p4820_p11 = por %p4819_p10, %p4818_p9 }
 0x178   :  { %p4821_p12 = pnand %p4820_p11, %p4814_p8 }
 0x17a   :  { %4824 = shalt.err (!%p4821_p12)
}
 0x17b   :  { %151 = dma.hbm_to_vmem [thread:$0]  %s6142_s14, 32, %s149_s4, [#allocation17]  }
 0x17c   :  { %s4825_s8 = scalar_lea.hbm %s6085_s11, 16 }
 0x17d   :  { %p4826_p13 = scmp.ne.s32.totalorder %s6085_s11, %s4825_s8  ;;  %p4829_p0 = scmp.lt.u32.totalorder %s4825_s8, %s6085_s11 }
 0x17f   :  { %p4831_p1 = pnand %p4829_p0, %p4826_p13 }
 0x181   :  { %4834 = shalt.err (!%p4831_p1)
}
 0x182   :  { %s4835_s16 = scalar_lea.vmem %s171_s28, 16  ;;  %s4839_s9 = scalar_lea.vmem %s171_s28, 32 }
 0x183   :  { %p4836_p2 = scmp.ne.s32.totalorder %s171_s28, %s4835_s16  ;;  %p4840_p3 = scmp.lt.s32.totalorder %s171_s28, %s171_s28 }
 0x184   :  { %p4841_p4 = scmp.lt.s32.totalorder %s4839_s9, %s4835_s16 }
 0x186   :  { %p4842_p5 = por %p4841_p4, %p4840_p3 }
 0x188   :  { %p4843_p6 = pnand %p4842_p5, %p4836_p2 }
 0x18a   :  { %4846 = shalt.err (!%p4843_p6)
}
 0x18b   :  { %173 = dma.hbm_to_vmem [thread:$0]  %s6085_s11, 16, %s171_s28, [#allocation20]  }
 0x18c   :  { %s5076_s3 = smov [#allocation24]   ;;  %s5077_s6 = smov [#allocation27]  }
 0x18d   :  { %s192_s14 = sshll.u32 %s5076_s3, 4  ;;  %s214_s23 = sshll.u32 %s5077_s6, 4  ;;  %s193_s14 = int_to_ptr.vmem [resolvable:$true] %s192_s14  ;;  %s215_s23 = int_to_ptr.vmem [resolvable:$true] %s214_s23 }
 0x18e   :  { %s4847_s2 = scalar_lea.hbm %s6087_s13, 16 }
 0x18f   :  { %p4848_p7 = scmp.ne.s32.totalorder %s6087_s13, %s4847_s2  ;;  %p4851_p8 = scmp.lt.u32.totalorder %s4847_s2, %s6087_s13 }
 0x191   :  { %p4853_p9 = pnand %p4851_p8, %p4848_p7 }
 0x193   :  { %4856 = shalt.err (!%p4853_p9)
}
 0x194   :  { %s4857_s11 = scalar_lea.vmem %s193_s14, 16  ;;  %s4861_s28 = scalar_lea.vmem %s193_s14, 32 }
 0x195   :  { %p4858_p10 = scmp.ne.s32.totalorder %s193_s14, %s4857_s11  ;;  %p4862_p11 = scmp.lt.s32.totalorder %s193_s14, %s193_s14 }
 0x196   :  { %p4863_p12 = scmp.lt.s32.totalorder %s4861_s28, %s4857_s11 }
 0x198   :  { %p4864_p13 = por %p4863_p12, %p4862_p11 }
 0x19a   :  { %p4865_p0 = pnand %p4864_p13, %p4858_p10 }
 0x19c   :  { %4868 = shalt.err (!%p4865_p0)
}
 0x19d   :  { %195 = dma.hbm_to_vmem [thread:$0]  %s6087_s13, 16, %s193_s14, [#allocation23]  }
 0x19e   :  { %s4869_s26 = scalar_lea.hbm %s6089_s15, 16 }
 0x19f   :  { %p4870_p1 = scmp.ne.s32.totalorder %s6089_s15, %s4869_s26  ;;  %p4873_p2 = scmp.lt.u32.totalorder %s4869_s26, %s6089_s15 }
 0x1a1   :  { %p4875_p3 = pnand %p4873_p2, %p4870_p1 }
 0x1a3   :  { %4878 = shalt.err (!%p4875_p3)
}
 0x1a4   :  { %s4879_s20 = scalar_lea.vmem %s215_s23, 16  ;;  %s4883_s3 = scalar_lea.vmem %s215_s23, 32 }
 0x1a5   :  { %p4880_p4 = scmp.ne.s32.totalorder %s215_s23, %s4879_s20  ;;  %p4884_p5 = scmp.lt.s32.totalorder %s215_s23, %s215_s23 }
 0x1a6   :  { %p4885_p6 = scmp.lt.s32.totalorder %s4883_s3, %s4879_s20 }
 0x1a8   :  { %p4886_p7 = por %p4885_p6, %p4884_p5 }
 0x1aa   :  { %p4887_p8 = pnand %p4886_p7, %p4880_p4 }
 0x1ac   :  { %4890 = shalt.err (!%p4887_p8)
}
 0x1ad   :  { %217 = dma.hbm_to_vmem [thread:$0]  %s6089_s15, 16, %s215_s23, [#allocation26]  }
 0x1ae   :  { %s5078_s6 = smov [#allocation30]   ;;  %s5079_s24 = smov [#allocation33]  }
 0x1af   :  { %s236_s30 = sshll.u32 %s5078_s6, 4  ;;  %s258_s2 = sshll.u32 %s5079_s24, 4  ;;  %s237_s30 = int_to_ptr.vmem [resolvable:$true] %s236_s30  ;;  %s259_s2 = int_to_ptr.vmem [resolvable:$true] %s258_s2 }
 0x1b0   :  { %s4891_s0 = scalar_lea.hbm %s6091_s17, 16 }
 0x1b1   :  { %p4892_p9 = scmp.ne.s32.totalorder %s6091_s17, %s4891_s0  ;;  %p4895_p10 = scmp.lt.u32.totalorder %s4891_s0, %s6091_s17 }
 0x1b3   :  { %p4897_p11 = pnand %p4895_p10, %p4892_p9 }
 0x1b5   :  { %4900 = shalt.err (!%p4897_p11)
}
 0x1b6   :  { %s4901_s15 = scalar_lea.vmem %s237_s30, 16  ;;  %s4905_s23 = scalar_lea.vmem %s237_s30, 32 }
 0x1b7   :  { %p4902_p12 = scmp.ne.s32.totalorder %s237_s30, %s4901_s15  ;;  %p4906_p13 = scmp.lt.s32.totalorder %s237_s30, %s237_s30 }
 0x1b8   :  { %p4907_p0 = scmp.lt.s32.totalorder %s4905_s23, %s4901_s15 }
 0x1ba   :  { %p4908_p1 = por %p4907_p0, %p4906_p13 }
 0x1bc   :  { %p4909_p2 = pnand %p4908_p1, %p4902_p12 }
 0x1be   :  { %4912 = shalt.err (!%p4909_p2)
}
 0x1bf   :  { %239 = dma.hbm_to_vmem [thread:$0]  %s6091_s17, 16, %s237_s30, [#allocation29]  }
 0x1c0   :  { %s4913_s27 = scalar_lea.hbm %s6093_s19, 16 }
 0x1c1   :  { %p4914_p3 = scmp.ne.s32.totalorder %s6093_s19, %s4913_s27  ;;  %p4917_p4 = scmp.lt.u32.totalorder %s4913_s27, %s6093_s19 }
 0x1c3   :  { %p4919_p5 = pnand %p4917_p4, %p4914_p3 }
 0x1c5   :  { %4922 = shalt.err (!%p4919_p5)
}
 0x1c6   :  { %s4923_s3 = scalar_lea.vmem %s259_s2, 16  ;;  %s4927_s13 = scalar_lea.vmem %s259_s2, 32 }
 0x1c7   :  { %p4924_p6 = scmp.ne.s32.totalorder %s259_s2, %s4923_s3  ;;  %p4928_p7 = scmp.lt.s32.totalorder %s259_s2, %s259_s2 }
 0x1c8   :  { %p4929_p8 = scmp.lt.s32.totalorder %s4927_s13, %s4923_s3 }
 0x1ca   :  { %p4930_p9 = por %p4929_p8, %p4928_p7 }
 0x1cc   :  { %p4931_p10 = pnand %p4930_p9, %p4924_p6 }
 0x1ce   :  { %4934 = shalt.err (!%p4931_p10)
}
 0x1cf   :  { %261 = dma.hbm_to_vmem [thread:$0]  %s6093_s19, 16, %s259_s2, [#allocation32]  }
 0x1d0   :  { %s5080_s6 = smov [#allocation36]   ;;  %s5081_s24 = smov [#allocation39]  }
 0x1d1   :  { %s280_s30 = sshll.u32 %s5080_s6, 4  ;;  %s302_s22 = sshll.u32 %s5081_s24, 4  ;;  %s281_s30 = int_to_ptr.vmem [resolvable:$true] %s280_s30  ;;  %s303_s22 = int_to_ptr.vmem [resolvable:$true] %s302_s22 }
 0x1d2   :  { %s4935_s18 = scalar_lea.hbm %s6095_s21, 16 }
 0x1d3   :  { %p4936_p11 = scmp.ne.s32.totalorder %s6095_s21, %s4935_s18  ;;  %p4939_p12 = scmp.lt.u32.totalorder %s4935_s18, %s6095_s21 }
 0x1d5   :  { %p4941_p13 = pnand %p4939_p12, %p4936_p11 }
 0x1d7   :  { %4944 = shalt.err (!%p4941_p13)
}
 0x1d8   :  { %s4945_s19 = scalar_lea.vmem %s281_s30, 16  ;;  %s4949_s2 = scalar_lea.vmem %s281_s30, 32 }
 0x1d9   :  { %p4946_p0 = scmp.ne.s32.totalorder %s281_s30, %s4945_s19  ;;  %p4950_p1 = scmp.lt.s32.totalorder %s281_s30, %s281_s30 }
 0x1da   :  { %p4951_p2 = scmp.lt.s32.totalorder %s4949_s2, %s4945_s19 }
 0x1dc   :  { %p4952_p3 = por %p4951_p2, %p4950_p1 }
 0x1de   :  { %p4953_p4 = pnand %p4952_p3, %p4946_p0 }
 0x1e0   :  { %4956 = shalt.err (!%p4953_p4)
}
 0x1e1   :  { %283 = dma.hbm_to_vmem [thread:$0]  %s6095_s21, 16, %s281_s30, [#allocation35]  }
 0x1e2   :  { %s6143_s26 = sld [smem:[#allocation70_spill]] }
 0x1e8   :  { %s4957_s27 = scalar_lea.hbm %s6143_s26, 16 }
 0x1e9   :  { %p4958_p5 = scmp.ne.s32.totalorder %s6143_s26, %s4957_s27  ;;  %p4961_p6 = scmp.lt.u32.totalorder %s4957_s27, %s6143_s26 }
 0x1eb   :  { %p4963_p7 = pnand %p4961_p6, %p4958_p5 }
 0x1ed   :  { %4966 = shalt.err (!%p4963_p7)
}
 0x1ee   :  { %s4967_s3 = scalar_lea.vmem %s303_s22, 16  ;;  %s4971_s13 = scalar_lea.vmem %s303_s22, 32 }
 0x1ef   :  { %p4968_p8 = scmp.ne.s32.totalorder %s303_s22, %s4967_s3  ;;  %p4972_p9 = scmp.lt.s32.totalorder %s303_s22, %s303_s22 }
 0x1f0   :  { %p4973_p10 = scmp.lt.s32.totalorder %s4971_s13, %s4967_s3 }
 0x1f2   :  { %p4974_p11 = por %p4973_p10, %p4972_p9 }
 0x1f4   :  { %p4975_p12 = pnand %p4974_p11, %p4968_p8 }
 0x1f6   :  { %4978 = shalt.err (!%p4975_p12)
}
 0x1f7   :  { %305 = dma.hbm_to_vmem [thread:$0]  %s6143_s26, 16, %s303_s22, [#allocation38]  }
 0x1f8   :  { %s5082_s14 = smov [#allocation42]   ;;  %s6144_s12 = sld [smem:[#allocation71_spill]] }
 0x1f9   :  { %s322_s6 = sshll.u32 %s5082_s14, 4  ;;  %s323_s6 = int_to_ptr.vmem [resolvable:$true] %s322_s6 }
 0x1fe   :  { %s4979_s0 = scalar_lea.hbm %s6144_s12, 16 }
 0x1ff   :  { %p4980_p13 = scmp.ne.s32.totalorder %s6144_s12, %s4979_s0  ;;  %p4983_p0 = scmp.lt.u32.totalorder %s4979_s0, %s6144_s12 }
 0x201   :  { %p4985_p1 = pnand %p4983_p0, %p4980_p13 }
 0x203   :  { %4988 = shalt.err (!%p4985_p1)
}
 0x204   :  { %s4989_s15 = scalar_lea.vmem %s323_s6, 16  ;;  %s4993_s22 = scalar_lea.vmem %s323_s6, 32 }
 0x205   :  { %p4990_p2 = scmp.ne.s32.totalorder %s323_s6, %s4989_s15  ;;  %p4994_p3 = scmp.lt.s32.totalorder %s323_s6, %s323_s6 }
 0x206   :  { %p4995_p4 = scmp.lt.s32.totalorder %s4993_s22, %s4989_s15 }
 0x208   :  { %p4996_p5 = por %p4995_p4, %p4994_p3 }
 0x20a   :  { %p4997_p6 = pnand %p4996_p5, %p4990_p2 }
 0x20c   :  { %5000 = shalt.err (!%p4997_p6)
}
 0x20d   :  { %325 = dma.hbm_to_vmem [thread:$0]  %s6144_s12, 16, %s323_s6, [#allocation41]  }
 0x20e   :  { %5023 = dma.done.wait [#allocation5], 16  }
 0x20f   :  { %5024 = vsyncadd [#allocation5], 4294967280 }
 0x210   :  { %5025 = dma.done.wait [#allocation3], 256  }
 0x211   :  { %5026 = vsyncadd [#allocation3], 4294967040 }
 0x212   :  { %5027 = dma.done.wait [#allocation8], 272  }
 0x213   :  { %5028 = vsyncadd [#allocation8], 4294967024 }
 0x214   :  { %5029 = dma.done.wait [#allocation11], 272  }
 0x215   :  { %5030 = vsyncadd [#allocation11], 4294967024 }
 0x216   :  { %5031 = dma.done.wait [#allocation14], 32  }
 0x217   :  { %5032 = vsyncadd [#allocation14], 4294967264 }
 0x218   :  { %5033 = dma.done.wait [#allocation17], 544  }
 0x219   :  { %5034 = vsyncadd [#allocation17], 4294966752 }
 0x21a   :  { %5035 = dma.done.wait [#allocation20], 1040  }
 0x21b   :  { %5036 = vsyncadd [#allocation20], 4294966256 }
 0x21c   :  { %5037 = dma.done.wait [#allocation23], 1040  }
 0x21d   :  { %5038 = vsyncadd [#allocation23], 4294966256 }
 0x21e   :  { %5039 = dma.done.wait [#allocation26], 272  }
 0x21f   :  { %5040 = vsyncadd [#allocation26], 4294967024 }
 0x220   :  { %5041 = dma.done.wait [#allocation29], 272  }
 0x221   :  { %5042 = vsyncadd [#allocation29], 4294967024 }
 0x222   :  { %5043 = dma.done.wait [#allocation32], 272  }
 0x223   :  { %5044 = vsyncadd [#allocation32], 4294967024 }
 0x224   :  { %5045 = dma.done.wait [#allocation35], 272  }
 0x225   :  { %5046 = vsyncadd [#allocation35], 4294967024 }
 0x226   :  { %5047 = dma.done.wait [#allocation38], 2064  }
 0x227   :  { %5048 = vsyncadd [#allocation38], 4294965232 }
 0x228   :  { %5049 = dma.done.wait [#allocation41], 32  }
 0x229   :  { %5050 = vsyncadd [#allocation41], 4294967264 }
 0x22a   :  { %404 = sfence }
 0x22b   :  { %v4299_v0 = vld [vmem:[#allocation7] sm:$0xff]   ;;  %v5083_v1 = vmov 0.0   ;;  %v4300_v2 = vld [vmem:[#allocation7 + $0x8] sm:$0xff]   ;;  %vm5084_vm0 = vmmov 0   ;;  %v408_v3 = vld [vmem:[#allocation6] sm:$0xff]  ;;  %vm434_vm1 = vcmask 261120  }
 0x22c   :  { %3923 = vmatprep.subr.bf16.mxu1 %v5083_v1  ;;  %3949 = vmatprep.subr.bf16.mxu0 %v5083_v1  ;;  %v409_v4 = vld [vmem:[#allocation6 + $0x8] sm:$0xff]  ;;  %v3679_v6 = vld [vmem:[#allocation9] ss:$0 sm:$0xff]  ;;  %s5085_s23 = smov 96   ;;  %vm488_vm2 = vcmask 31744   ;;  %vm584_vm3 = vcmask 64512  }
 0x22d   :  { %3924 = vmatpush3.bf16.msra.mxu1 %v4299_v0  ;;  %3927 = vmatprep.mubr.msk.bf16.mxu1 %vm5084_vm0, %v5083_v1  ;;  %v410_v5 = vpack.c.bf16 %v409_v4, %v408_v3  ;;  %s5086_s8 = smov 92   ;;  %vm626_vm4 = vcmask 1043456   ;;  %s3678_s10 = sld [smem:[#allocation2 + $0x1]]  ;;  %vm957_vm5 = vcmask 1041408  }
 0x22e   :  { %3925 = vmatprep.subr.bf16.mxu1 %v5083_v1  ;;  %3951 = vmatprep.mubr.msk.bf16.mxu0 %vm5084_vm0, %v5083_v1  ;;  %s406_s29 = sld [smem:[#allocation2]]  ;;  %s5088_s26 = smov 60  }
 0x22f   :  { %s5089_s27 = smov 120   ;;  %s5090_s16 = smov 88  }
 0x230   :  { %s5091_s9 = smov 56   ;;  %s5092_s4 = smov 84  }
 0x231   :  { %3926 = vmatpush3.bf16.msra.mxu1 %v4300_v2  ;;  %s5093_s20 = smov 116   ;;  %s5094_s3 = smov 52  }
 0x232   :  { %3931 = vmatprep.subr.bf16.mxu1 %v5083_v1  ;;  %s5095_s13 = smov 80   ;;  %s5096_s21 = smov 112  }
 0x233   :  { %v5634_v49 = vstv %s3678_s10  ;;  %s5097_s17 = smov 48   ;;  %s5098_s14 = smov 76  }
 0x234   :  { %3928 = vmatmul.mubr.msk.bf16.vlgmr.msra.gmra.mrb[0].mxu1 %vm434_vm1, %v410_v5  ;;  %v5636_v50 = vstv %s406_s29  ;;  %s5099_s6 = smov 108   ;;  %s5100_s30 = smov 44  }
 0x235   :  { %3933 = vmatprep.mubr.msk.bf16.mxu1 %vm5084_vm0, %v5083_v1  ;;  %s5101_s24 = smov 72   ;;  %s5102_s12 = smov 104  }
 0x236   :  { %s5103_s0 = smov 40   ;;  %s5104_s18 = smov 68  }
 0x237   :  { %s5105_s11 = smov 100   ;;  %s5106_s28 = smov 36  }
 0x238   :  { %s5108_s1 = smov [#allocation43]  }
 0x239   :  { %s3653_s15 = sshll.u32 %s5108_s1, 4  ;;  %s3654_s15 = int_to_ptr.vmem [resolvable:$true] %s3653_s15 }
 0x23a   :  { %s5001_s22 = scalar_lea.vmem %s3654_s15, 256  ;;  %p5006_p8 = scmp.lt.s32.totalorder %s3654_s15, %s3654_s15 }
 0x23b   :  { %p5002_p7 = scmp.ne.s32.totalorder %s3654_s15, %s5001_s22  ;;  %p5007_p9 = scmp.lt.s32.totalorder %s5001_s22, %s5001_s22 }
 0x23d   :  { %p5008_p10 = por %p5007_p9, %p5006_p8 }
 0x23f   :  { %p5009_p11 = pnand %p5008_p10, %p5002_p7 }
 0x307   :  { %v472_v7 = vpop.f32.mrb[0].mxu1 }
 0x308   :  { %v473_v8 = vadd.f32 %v3679_v6, %v472_v7  ;;  %v3929_v9 = vpop.f32.mrb[1].mxu1 }
 0x309   :  { %v475_v10 = vpop.f32.mrb[2].mxu1 }
 0x30a   :  { %v5600_v11 = vpack.c.bf16 %v473_v8, %v473_v8  ;;  %v476_v12 = vadd.f32 %v3679_v6, %v475_v10  ;;  %v3930_v13 = vpop.f32.mrb[3].mxu1 }
 0x30c   :  { %486 = vrot.lane.b32.xlu0 %v5600_v11, %s5085_s23  ;;  %v5603_v14 = vpack.c.bf16 %v476_v12, %v476_v12 }
 0x310   :  { %536 = vrot.lane.b32.xlu0 %v5603_v14, %s5085_s23 }
 0x37e   :  { %v487_v15 = vpop.permute.xlu0 %486 }
 0x37f   :  { %v493_v16 = vsel %vm488_vm2, %v487_v15, 0 }
 0x380   :  { %3932 = vmatpush3.bf16.xpose.msra.mxu1 %v493_v16 }
 0x381   :  { %3937 = vmatprep.subr.bf16.mxu1 %v5083_v1 }
 0x382   :  { %v537_v17 = vpop.permute.xlu0 %536 }
 0x383   :  { %v542_v18 = vsel %vm488_vm2, %v537_v17, 0 }
 0x387   :  { %3934 = vmatmul.mubr.msk.bf16.vlgmr.msra.gmra.mrb[4].mxu1 %vm488_vm2, %v5600_v11 }
 0x388   :  { %3938 = vmatpush3.bf16.xpose.msra.mxu1 %v542_v18  ;;  %3939 = vmatprep.mubr.msk.bf16.mxu1 %vm5084_vm0, %v5083_v1 }
 0x389   :  { %3943 = vmatprep.subr.bf16.mxu1 %v5083_v1 }
 0x38f   :  { %3940 = vmatmul.mubr.msk.bf16.vlgmr.msra.gmra.mrb[8].mxu1 %vm488_vm2, %v5603_v14 }
 0x390   :  { %3945 = vmatprep.mubr.msk.bf16.mxu1 %vm5084_vm0, %v5083_v1 }
 0x45a   :  { %v529_v19 = vpop.f32.mrb[4].mxu1 }
 0x45b   :  { %v3935_v20 = vpop.f32.mrb[5].mxu1  ;;  %v585_v21 = vsel %vm584_vm3, %v529_v19, -inf  ;;  %v607_v45 = vmax.f32 %v529_v19, 0.0 }
 0x45c   :  { %586 = vmax.xlane.f32.xlu1 %v585_v21  ;;  %v532_v22 = vpop.f32.mrb[6].mxu1 }
 0x45d   :  { %v3936_v23 = vpop.f32.mrb[7].mxu1  ;;  %v612_v47 = vmul.f32 %v607_v45, %v607_v45 }
 0x45f   :  { %v615_v52 = vmul.f32 %v5634_v49, %v612_v47 }
 0x462   :  { %v578_v24 = vpop.f32.mrb[8].mxu1 }
 0x463   :  { %v3941_v25 = vpop.f32.mrb[9].mxu1  ;;  %v588_v26 = vsel %vm584_vm3, %v578_v24, -inf  ;;  %v608_v53 = vmax.f32 %v578_v24, 0.0 }
 0x464   :  { %589 = vmax.xlane.f32.xlu1 %v588_v26  ;;  %v581_v27 = vpop.f32.mrb[10].mxu1 }
 0x465   :  { %v3942_v28 = vpop.f32.mrb[11].mxu1  ;;  %v613_v56 = vmul.f32 %v608_v53, %v608_v53 }
 0x467   :  { %v616_v61 = vmul.f32 %v5634_v49, %v613_v56 }
 0x475   :  { %621 = vrot.lane.b32.xlu1 %v5600_v11, %s5054_s5 }
 0x479   :  { %670 = vrot.lane.b32.xlu1 %v5603_v14, %s5054_s5  ;;  %s5087_s5 = smov 124  }
 0x47d   :  { %721 = vrot.lane.b32.xlu1 %v5600_v11, %s5086_s8 }
 0x4e9   :  { %v587_v29 = vpop.xlane.xlu1 %586 }
 0x4ea   :  { %v591_v30 = vsub.f32 %v529_v19, %v587_v29 }
 0x4ec   :  { %v593_v31 = vmul.f32 1.442695, %v591_v30 }
 0x4ee   :  { %4351 = vpow2.f32 %v593_v31 }
 0x4f1   :  { %v590_v32 = vpop.xlane.xlu1 %589 }
 0x4f2   :  { %v592_v33 = vsub.f32 %v578_v24, %v590_v32 }
 0x4f4   :  { %v595_v34 = vmul.f32 1.442695, %v592_v33 }
 0x4f5   :  { %v622_v35 = vpop.permute.xlu1 %621 }
 0x4f6   :  { %4353 = vpow2.f32 %v595_v34  ;;  %v628_v36 = vsel %vm626_vm4, %v622_v35, 0 }
 0x4f7   :  { %3944 = vmatpush3.bf16.msra.mxu1 %v628_v36 }
 0x4f8   :  { %v4352_v37 = vpop.eup %4351  ;;  %3955 = vmatprep.subr.bf16.mxu1 %v5083_v1 }
 0x4f9   :  { %v671_v38 = vpop.permute.xlu1 %670  ;;  %v597_v39 = vsel %vm584_vm3, %v4352_v37, 0.0 }
 0x4fa   :  { %598 = vadd.xlane.f32.xlu0 %v597_v39  ;;  %v676_v40 = vsel %vm626_vm4, %v671_v38, 0 }
 0x4fb   :  { %3950 = vmatpush3.bf16.msra.mxu0 %v676_v40 }
 0x4fc   :  { %3961 = vmatprep.subr.bf16.mxu0 %v5083_v1 }
 0x4fd   :  { %v722_v44 = vpop.permute.xlu1 %721 }
 0x4fe   :  { %v727_v59 = vsel %vm488_vm2, %v722_v44, 0 }
 0x500   :  { %v4354_v41 = vpop.eup %4353 }
 0x501   :  { %v600_v42 = vsel %vm584_vm3, %v4354_v41, 0.0 }
 0x502   :  { %601 = vadd.xlane.f32.xlu1 %v600_v42 }
 0x510   :  { %719 = vrot.lane.b32.xlu0 %v5600_v11, %s5087_s5 }
 0x513   :  { %771 = vrot.lane.b32.xlu1 %v5603_v14, %s5086_s8 }
 0x517   :  { %769 = vrot.lane.b32.xlu1 %v5603_v14, %s5087_s5 }
 0x587   :  { %v599_v43 = vpop.xlane.xlu0 %598 }
 0x588   :  { %4355 = vrcp.f32 %v599_v43 }
 0x58b   :  { %v720_v3 = vpop.permute.xlu0 %719 }
 0x58f   :  { %v602_v46 = vpop.xlane.xlu1 %601 }
 0x590   :  { %4357 = vrcp.f32 %v602_v46 }
 0x592   :  { %v4356_v48 = vpop.eup %4355 }
 0x593   :  { %v605_v51 = vmul.f32 %v4356_v48, %v4352_v37  ;;  %v772_v0 = vpop.permute.xlu1 %771 }
 0x594   :  { %v777_v4 = vsel %vm488_vm2, %v772_v0, 0 }
 0x595   :  { %v610_v54 = vmul.f32 %v5636_v50, %v605_v51 }
 0x597   :  { %v617_v55 = vadd.f32 %v615_v52, %v610_v54  ;;  %v770_v5 = vpop.permute.xlu1 %769 }
 0x599   :  { %v619_v57 = vpack.c.bf16 %v617_v55, %v617_v55 }
 0x59a   :  { %v4358_v58 = vpop.eup %4357 }
 0x59b   :  { %v606_v60 = vmul.f32 %v4358_v58, %v4354_v41  ;;  %3946 = vmatmul.mubr.msk.bf16.vlgmr.msra.gmra.mrb[12].mxu1 %vm584_vm3, %v619_v57 }
 0x59c   :  { %3956 = vmatpush3.bf16.xpose.msra.mxu1 %v727_v59  ;;  %3957 = vmatprep.mubr.msk.bf16.mxu1 %vm5084_vm0, %v5083_v1  ;;  %v479_v59 = vld [vmem:[#allocation10] sm:$0xf] }
 0x59d   :  { %v611_v62 = vmul.f32 %v5636_v50, %v606_v60  ;;  %3967 = vmatprep.subr.bf16.mxu1 %v5083_v1 }
 0x59f   :  { %v618_v63 = vadd.f32 %v616_v61, %v611_v62  ;;  %v1006_v62 = vsel %vm957_vm5, %v479_v59, 0 }
 0x5a1   :  { %v620_v2 = vpack.c.bf16 %v618_v63, %v618_v63 }
 0x5a3   :  { %3952 = vmatmul.mubr.msk.bf16.vlgmr.msra.gmra.mrb[0].mxu0 %vm584_vm3, %v620_v2  ;;  %3958 = vmatmul.mubr.msk.bf16.vlgmr.msra.gmra.mrb[16].mxu1 %vm488_vm2, %v720_v3 }
 0x5a4   :  { %3962 = vmatpush3.bf16.xpose.msra.mxu0 %v777_v4  ;;  %3963 = vmatprep.mubr.msk.bf16.mxu0 %vm5084_vm0, %v5083_v1  ;;  %v3691_v4 = vcombine.low %v479_v59, %v479_v59 }
 0x5a5   :  { %3973 = vmatprep.subr.bf16.mxu0 %v5083_v1  ;;  %3969 = vmatprep.mubr.msk.bf16.mxu1 %vm5084_vm0, %v5083_v1 }
 0x5ab   :  { %3964 = vmatmul.mubr.msk.bf16.vlgmr.msra.gmra.mrb[4].mxu0 %vm488_vm2, %v770_v5  ;;  %v953_v5 = vrot.slane %v3691_v4, 2 }
 0x5ac   :  { %3975 = vmatprep.mubr.msk.bf16.mxu0 %vm5084_vm0, %v5083_v1 }
 0x66e   :  { %v5658_v6 = vpop.f32.mrb[12].mxu1 }
 0x66f   :  { %v3947_v7 = vpop.f32.mrb[13].mxu1 }
 0x670   :  { %v667_v8 = vpop.f32.mrb[14].mxu1 }
 0x671   :  { %v3948_v9 = vpop.f32.mrb[15].mxu1 }
 0x676   :  { %v5660_v10 = vpop.f32.mrb[0].mxu0  ;;  %v763_v12 = vpop.f32.mrb[16].mxu1 }
 0x677   :  { %v718_v13 = vpack.c.bf16 %v5660_v10, %v5658_v6  ;;  %v3953_v15 = vpop.f32.mrb[1].mxu0  ;;  %v3959_v16 = vpop.f32.mrb[17].mxu1  ;;  %v819_v17 = vsel %vm584_vm3, %v763_v12, -inf  ;;  %v841_v40 = vmax.f32 %v763_v12, 0.0  ;;  %v959_v6 = vsel %vm957_vm5, %v953_v5, 0 }
 0x678   :  { %v715_v18 = vpop.f32.mrb[2].mxu0  ;;  %820 = vmax.xlane.f32.xlu1 %v819_v17  ;;  %v766_v19 = vpop.f32.mrb[18].mxu1 }
 0x679   :  { %v3954_v20 = vpop.f32.mrb[3].mxu0  ;;  %v3960_v21 = vpop.f32.mrb[19].mxu1  ;;  %v845_v42 = vmul.f32 %v841_v40, %v841_v40 }
 0x67b   :  { %v847_v47 = vmul.f32 %v845_v42, %v5634_v49 }
 0x67e   :  { %v813_v22 = vpop.f32.mrb[4].mxu0 }
 0x67f   :  { %v3965_v23 = vpop.f32.mrb[5].mxu0  ;;  %v822_v24 = vsel %vm584_vm3, %v813_v22, -inf  ;;  %v842_v48 = vmax.f32 %v813_v22, 0.0 }
 0x680   :  { %823 = vmax.xlane.f32.xlu0 %v822_v24  ;;  %v816_v25 = vpop.f32.mrb[6].mxu0 }
 0x681   :  { %v3966_v26 = vpop.f32.mrb[7].mxu0  ;;  %v846_v53 = vmul.f32 %v842_v48, %v842_v48 }
 0x683   :  { %v848_v57 = vmul.f32 %v846_v53, %v5634_v49 }
 0x696   :  { %901 = vrot.lane.b32.xlu0 %v5603_v14, %s5088_s26 }
 0x69a   :  { %1049 = vrot.lane.b32.xlu0 %v5600_v11, %s5089_s27 }
 0x705   :  { %v821_v27 = vpop.xlane.xlu1 %820 }
 0x706   :  { %v825_v28 = vsub.f32 %v763_v12, %v821_v27 }
 0x708   :  { %v827_v29 = vmul.f32 1.442695, %v825_v28 }
 0x70a   :  { %4359 = vpow2.f32 %v827_v29 }
 0x70d   :  { %v824_v30 = vpop.xlane.xlu0 %823 }
 0x70e   :  { %v826_v31 = vsub.f32 %v813_v22, %v824_v30 }
 0x710   :  { %v829_v32 = vmul.f32 1.442695, %v826_v31 }
 0x711   :  { %v902_v33 = vpop.permute.xlu0 %901 }
 0x712   :  { %4361 = vpow2.f32 %v829_v32  ;;  %v907_v34 = vsel %vm626_vm4, %v902_v33, 0 }
 0x713   :  { %3974 = vmatpush3.bf16.msra.mxu0 %v907_v34 }
 0x714   :  { %v4360_v35 = vpop.eup %4359  ;;  %3985 = vmatprep.subr.bf16.mxu0 %v5083_v1 }
 0x715   :  { %v831_v36 = vsel %vm584_vm3, %v4360_v35, 0.0  ;;  %v1050_v21 = vpop.permute.xlu0 %1049 }
 0x716   :  { %832 = vadd.xlane.f32.xlu1 %v831_v36 }
 0x71c   :  { %v4362_v37 = vpop.eup %4361 }
 0x71d   :  { %v834_v38 = vsel %vm584_vm3, %v4362_v37, 0.0 }
 0x71e   :  { %835 = vadd.xlane.f32.xlu1 %v834_v38 }
 0x72f   :  { %853 = vrot.lane.b32.xlu1 %v5600_v11, %s5088_s26 }
 0x733   :  { %1051 = vrot.lane.b32.xlu1 %v5600_v11, %s5090_s16 }
 0x737   :  { %1101 = vrot.lane.b32.xlu1 %v5603_v14, %s5090_s16 }
 0x73b   :  { %1099 = vrot.lane.b32.xlu1 %v5603_v14, %s5089_s27 }
 0x7a3   :  { %v833_v39 = vpop.xlane.xlu1 %832 }
 0x7a4   :  { %4363 = vrcp.f32 %v833_v39 }
 0x7ab   :  { %v836_v41 = vpop.xlane.xlu1 %835 }
 0x7ac   :  { %4365 = vrcp.f32 %v836_v41 }
 0x7ae   :  { %v4364_v43 = vpop.eup %4363 }
 0x7af   :  { %v839_v44 = vmul.f32 %v4364_v43, %v4360_v35  ;;  %v854_v45 = vpop.permute.xlu1 %853 }
 0x7b0   :  { %v859_v46 = vsel %vm626_vm4, %v854_v45, 0 }
 0x7b1   :  { %v843_v51 = vmul.f32 %v839_v44, %v5636_v50  ;;  %3968 = vmatpush3.bf16.msra.mxu1 %v859_v46 }
 0x7b2   :  { %3979 = vmatprep.subr.bf16.mxu1 %v5083_v1 }
 0x7b3   :  { %v849_v52 = vadd.f32 %v847_v47, %v843_v51  ;;  %v1052_v63 = vpop.permute.xlu1 %1051 }
 0x7b4   :  { %v1057_v17 = vsel %vm488_vm2, %v1052_v63, 0 }
 0x7b5   :  { %v851_v54 = vpack.c.bf16 %v849_v52, %v849_v52 }
 0x7b6   :  { %v4366_v55 = vpop.eup %4365 }
 0x7b7   :  { %v840_v56 = vmul.f32 %v4366_v55, %v4362_v37  ;;  %3970 = vmatmul.mubr.msk.bf16.vlgmr.msra.gmra.mrb[20].mxu1 %vm584_vm3, %v851_v54  ;;  %v1102_v0 = vpop.permute.xlu1 %1101 }
 0x7b8   :  { %3981 = vmatprep.mubr.msk.bf16.mxu1 %vm5084_vm0, %v5083_v1  ;;  %v1107_v2 = vsel %vm488_vm2, %v1102_v0, 0  ;;  %3980 = vmatpush3.bf16.msra.mxu1 %v959_v6 }
 0x7b9   :  { %v844_v58 = vmul.f32 %v840_v56, %v5636_v50  ;;  %3991 = vmatprep.subr.bf16.mxu1 %v5083_v1 }
 0x7bb   :  { %v850_v60 = vadd.f32 %v848_v57, %v844_v58  ;;  %v1100_v3 = vpop.permute.xlu1 %1099 }
 0x7bd   :  { %v852_v61 = vpack.c.bf16 %v850_v60, %v850_v60 }
 0x7bf   :  { %3976 = vmatmul.mubr.msk.bf16.vlgmr.msra.gmra.mrb[8].mxu0 %vm584_vm3, %v852_v61 }
 0x7c0   :  { %3986 = vmatpush3.bf16.msra.mxu0 %v1006_v62  ;;  %3987 = vmatprep.mubr.msk.bf16.mxu0 %vm5084_vm0, %v5083_v1 }
 0x7c1   :  { %3997 = vmatprep.subr.bf16.mxu0 %v5083_v1 }
 0x7c7   :  { %3988 = vmatmul.mubr.msk.bf16.vlgmr.msra.gmra.mrb[12].mxu0 %vm488_vm2, %v718_v13 }
 0x7c8   :  { %3999 = vmatprep.mubr.msk.bf16.mxu0 %vm5084_vm0, %v5083_v1 }
 0x7c9   :  { %3998 = vmatpush3.bf16.xpose.msra.mxu0 %v1107_v2 }
 0x7ca   :  { %4009 = vmatprep.subr.bf16.mxu0 %v5083_v1 }
 0x7d0   :  { %4000 = vmatmul.mubr.msk.bf16.vlgmr.msra.gmra.mrb[16].mxu0 %vm488_vm2, %v1100_v3 }
 0x7d1   :  { %4011 = vmatprep.mubr.msk.bf16.mxu0 %vm5084_vm0, %v5083_v1 }
 0x88a   :  { %v895_v7 = vpop.f32.mrb[20].mxu1 }
 0x88b   :  { %v3971_v8 = vpop.f32.mrb[21].mxu1 }
 0x88c   :  { %v898_v9 = vpop.f32.mrb[22].mxu1 }
 0x88d   :  { %v3972_v10 = vpop.f32.mrb[23].mxu1 }
 0x892   :  { %v943_v12 = vpop.f32.mrb[8].mxu0 }
 0x893   :  { %v949_v13 = vpack.c.bf16 %v943_v12, %v895_v7  ;;  %v3977_v15 = vpop.f32.mrb[9].mxu0 }
 0x894   :  { %v946_v16 = vpop.f32.mrb[10].mxu0 }
 0x895   :  { %v3978_v18 = vpop.f32.mrb[11].mxu0  ;;  %3982 = vmatmul.mubr.msk.bf16.vlgmr.msra.gmra.mrb[24].mxu1 %vm488_vm2, %v949_v13  ;;  %v5748_v16 = vld [vmem:[#allocation10 + $0x4] sm:$0xf] }
 0x896   :  { %3992 = vmatpush3.bf16.xpose.msra.mxu1 %v1057_v17  ;;  %3993 = vmatprep.mubr.msk.bf16.mxu1 %vm5084_vm0, %v5083_v1  ;;  %v1284_v17 = vsel %vm957_vm5, %v5748_v16, 0 }
 0x897   :  { %4003 = vmatprep.subr.bf16.mxu1 %v5083_v1 }
 0x89a   :  { %v1042_v19 = vpop.f32.mrb[12].mxu0 }
 0x89b   :  { %v3989_v20 = vpop.f32.mrb[13].mxu0 }
 0x89c   :  { %v1045_v22 = vpop.f32.mrb[14].mxu0 }
 0x89d   :  { %v3990_v23 = vpop.f32.mrb[15].mxu0  ;;  %3994 = vmatmul.mubr.msk.bf16.vlgmr.msra.gmra.mrb[28].mxu1 %vm488_vm2, %v1050_v21 }
 0x89e   :  { %4005 = vmatprep.mubr.msk.bf16.mxu1 %vm5084_vm0, %v5083_v1 }
 0x8a3   :  { %v1143_v24 = vpop.f32.mrb[16].mxu0 }
 0x8a4   :  { %v4001_v25 = vpop.f32.mrb[17].mxu0  ;;  %v1152_v26 = vsel %vm584_vm3, %v1143_v24, -inf  ;;  %v1172_v56 = vmax.f32 %v1143_v24, 0.0 }
 0x8a5   :  { %1153 = vmax.xlane.f32.xlu1 %v1152_v26  ;;  %v1146_v27 = vpop.f32.mrb[18].mxu0 }
 0x8a6   :  { %v4002_v28 = vpop.f32.mrb[19].mxu0  ;;  %v1176_v58 = vmul.f32 %v1172_v56, %v1172_v56 }
 0x8a8   :  { %v1178_v61 = vmul.f32 %v1176_v58, %v5634_v49 }
 0x8b6   :  { %1183 = vrot.lane.b32.xlu1 %v5600_v11, %s5091_s9 }
 0x8ba   :  { %1331 = vrot.lane.b32.xlu1 %v5600_v11, %s5092_s4 }
 0x8be   :  { %1381 = vrot.lane.b32.xlu1 %v5603_v14, %s5092_s4 }
 0x8c2   :  { %1379 = vrot.lane.b32.xlu1 %v5603_v14, %s5093_s20 }
 0x932   :  { %v1154_v29 = vpop.xlane.xlu1 %1153 }
 0x933   :  { %v1156_v32 = vsub.f32 %v1143_v24, %v1154_v29 }
 0x935   :  { %v1159_v33 = vmul.f32 1.442695, %v1156_v32 }
 0x936   :  { %v1184_v30 = vpop.permute.xlu1 %1183 }
 0x937   :  { %v1189_v31 = vsel %vm626_vm4, %v1184_v30, 0  ;;  %4367 = vpow2.f32 %v1159_v33 }
 0x938   :  { %4004 = vmatpush3.bf16.msra.mxu1 %v1189_v31 }
 0x939   :  { %4015 = vmatprep.subr.bf16.mxu1 %v5083_v1 }
 0x93a   :  { %v1332_v6 = vpop.permute.xlu1 %1331 }
 0x93b   :  { %v1337_v8 = vsel %vm488_vm2, %v1332_v6, 0  ;;  %v3703_v6 = vcombine.low %v5748_v16, %v5748_v16 }
 0x941   :  { %v4368_v43 = vpop.eup %4367 }
 0x942   :  { %v1164_v46 = vsel %vm584_vm3, %v4368_v43, 0.0 }
 0x968   :  { %v995_v34 = vpop.f32.mrb[24].mxu1 }
 0x969   :  { %v5720_v35 = vadd.f32 %v1042_v19, %v995_v34  ;;  %v3983_v36 = vpop.f32.mrb[25].mxu1 }
 0x96a   :  { %v998_v37 = vpop.f32.mrb[26].mxu1 }
 0x96b   :  { %v5722_v38 = vadd.f32 %v1045_v22, %v998_v37  ;;  %v3984_v39 = vpop.f32.mrb[27].mxu1  ;;  %v1382_v22 = vpop.permute.xlu1 %1381 }
 0x96c   :  { %v1387_v28 = vsel %vm488_vm2, %v1382_v22, 0 }
 0x96f   :  { %v1380_v34 = vpop.permute.xlu1 %1379 }
 0x970   :  { %v1093_v40 = vpop.f32.mrb[28].mxu1 }
 0x971   :  { %v3995_v41 = vpop.f32.mrb[29].mxu1  ;;  %v1149_v42 = vsel %vm584_vm3, %v1093_v40, -inf  ;;  %v1171_v2 = vmax.f32 %v1093_v40, 0.0 }
 0x972   :  { %1150 = vmax.xlane.f32.xlu0 %v1149_v42  ;;  %v1096_v44 = vpop.f32.mrb[30].mxu1 }
 0x973   :  { %v3996_v45 = vpop.f32.mrb[31].mxu1  ;;  %v1175_v4 = vmul.f32 %v1171_v2, %v1171_v2 }
 0x975   :  { %v1177_v9 = vmul.f32 %v1175_v4, %v5634_v49 }
 0x976   :  { %1165 = vadd.xlane.f32.xlu0 %v1164_v46 }
 0x9ff   :  { %v1151_v47 = vpop.xlane.xlu0 %1150 }
 0xa00   :  { %v1155_v48 = vsub.f32 %v1093_v40, %v1151_v47 }
 0xa02   :  { %v1157_v51 = vmul.f32 1.442695, %v1155_v48 }
 0xa03   :  { %v1166_v54 = vpop.xlane.xlu0 %1165 }
 0xa04   :  { %4369 = vpow2.f32 %v1157_v51 }
 0xa05   :  { %4371 = vrcp.f32 %v1166_v54 }
 0xa0e   :  { %v4370_v52 = vpop.eup %4369 }
 0xa0f   :  { %v1161_v53 = vsel %vm584_vm3, %v4370_v52, 0.0  ;;  %v4372_v55 = vpop.eup %4371 }
 0xa10   :  { %1162 = vadd.xlane.f32.xlu0 %v1161_v53  ;;  %v1170_v57 = vmul.f32 %v4372_v55, %v4368_v43 }
 0xa12   :  { %v1174_v59 = vmul.f32 %v1170_v57, %v5636_v50 }
 0xa14   :  { %v1180_v62 = vadd.f32 %v1178_v61, %v1174_v59 }
 0xa16   :  { %v1182_v3 = vpack.c.bf16 %v1180_v62, %v1180_v62 }
 0xa26   :  { %1231 = vrot.lane.b32.xlu0 %v5603_v14, %s5091_s9 }
 0xa2a   :  { %1329 = vrot.lane.b32.xlu0 %v5600_v11, %s5093_s20 }
 0xa9d   :  { %v1163_v60 = vpop.xlane.xlu0 %1162 }
 0xa9e   :  { %4373 = vrcp.f32 %v1163_v60 }
 0xaa1   :  { %v1232_v63 = vpop.permute.xlu0 %1231 }
 0xaa2   :  { %v1237_v0 = vsel %vm626_vm4, %v1232_v63, 0 }
 0xaa3   :  { %4010 = vmatpush3.bf16.msra.mxu0 %v1237_v0 }
 0xaa4   :  { %4021 = vmatprep.subr.bf16.mxu0 %v5083_v1 }
 0xaa5   :  { %v1330_v15 = vpop.permute.xlu0 %1329 }
 0xaa6   :  { %4012 = vmatmul.mubr.msk.bf16.vlgmr.msra.gmra.mrb[20].mxu0 %vm584_vm3, %v1182_v3 }
 0xaa7   :  { %4023 = vmatprep.mubr.msk.bf16.mxu0 %vm5084_vm0, %v5083_v1 }
 0xaa8   :  { %v4374_v5 = vpop.eup %4373 }
 0xaa9   :  { %v1169_v7 = vmul.f32 %v4374_v5, %v4370_v52 }
 0xaab   :  { %v1173_v10 = vmul.f32 %v1169_v7, %v5636_v50  ;;  %v1563_v7 = vrot.slane %v3703_v6, 2 }
 0xaac   :  { %4022 = vmatpush3.bf16.xpose.msra.mxu0 %v1337_v8 }
 0xaad   :  { %v1179_v12 = vadd.f32 %v1177_v9, %v1173_v10  ;;  %4033 = vmatprep.subr.bf16.mxu0 %v5083_v1  ;;  %v1568_v8 = vsel %vm957_vm5, %v1563_v7, 0 }
 0xaaf   :  { %v1181_v13 = vpack.c.bf16 %v1179_v12, %v1179_v12 }
 0xab1   :  { %4006 = vmatmul.mubr.msk.bf16.vlgmr.msra.gmra.mrb[32].mxu1 %vm584_vm3, %v1181_v13 }
 0xab2   :  { %4017 = vmatprep.mubr.msk.bf16.mxu1 %vm5084_vm0, %v5083_v1  ;;  %4016 = vmatpush3.bf16.msra.mxu1 %v1284_v17 }
 0xab3   :  { %4024 = vmatmul.mubr.msk.bf16.vlgmr.msra.gmra.mrb[24].mxu0 %vm488_vm2, %v1330_v15  ;;  %4027 = vmatprep.subr.bf16.mxu1 %v5083_v1 }
 0xab4   :  { %4035 = vmatprep.mubr.msk.bf16.mxu0 %vm5084_vm0, %v5083_v1 }
 0xb79   :  { %v1273_v18 = vpop.f32.mrb[20].mxu0 }
 0xb7a   :  { %v4013_v19 = vpop.f32.mrb[21].mxu0 }
 0xb7b   :  { %v1276_v20 = vpop.f32.mrb[22].mxu0 }
 0xb7c   :  { %v4014_v21 = vpop.f32.mrb[23].mxu0 }
 0xb84   :  { %v1225_v23 = vpop.f32.mrb[32].mxu1 }
 0xb85   :  { %v1279_v24 = vpack.c.bf16 %v1273_v18, %v1225_v23  ;;  %v4007_v25 = vpop.f32.mrb[33].mxu1 }
 0xb86   :  { %v1228_v26 = vpop.f32.mrb[34].mxu1  ;;  %v1373_v27 = vpop.f32.mrb[24].mxu0 }
 0xb87   :  { %v4008_v29 = vpop.f32.mrb[35].mxu1  ;;  %4018 = vmatmul.mubr.msk.bf16.vlgmr.msra.gmra.mrb[36].mxu1 %vm488_vm2, %v1279_v24  ;;  %v4025_v30 = vpop.f32.mrb[25].mxu0  ;;  %v1429_v31 = vsel %vm584_vm3, %v1373_v27, -inf  ;;  %v1451_v55 = vmax.f32 %v1373_v27, 0.0 }
 0xb88   :  { %4028 = vmatpush3.bf16.xpose.msra.mxu1 %v1387_v28  ;;  %1430 = vmax.xlane.f32.xlu0 %v1429_v31  ;;  %v1376_v32 = vpop.f32.mrb[26].mxu0 }
 0xb89   :  { %v4026_v33 = vpop.f32.mrb[27].mxu0  ;;  %4029 = vmatprep.mubr.msk.bf16.mxu1 %vm5084_vm0, %v5083_v1  ;;  %4039 = vmatprep.subr.bf16.mxu1 %v5083_v1  ;;  %v1455_v57 = vmul.f32 %v1451_v55, %v1451_v55 }
 0xb8b   :  { %v1457_v60 = vmul.f32 %v1455_v57, %v5634_v49 }
 0xb8f   :  { %4030 = vmatmul.mubr.msk.bf16.vlgmr.msra.gmra.mrb[40].mxu1 %vm488_vm2, %v1380_v34 }
 0xb90   :  { %4041 = vmatprep.mubr.msk.bf16.mxu1 %vm5084_vm0, %v5083_v1 }
 0xc15   :  { %v1431_v36 = vpop.xlane.xlu0 %1430 }
 0xc16   :  { %v1435_v37 = vsub.f32 %v1373_v27, %v1431_v36 }
 0xc18   :  { %v1437_v39 = vmul.f32 1.442695, %v1435_v37 }
 0xc1a   :  { %4375 = vpow2.f32 %v1437_v39 }
 0xc24   :  { %v4376_v40 = vpop.eup %4375 }
 0xc25   :  { %v1441_v41 = vsel %vm584_vm3, %v4376_v40, 0.0 }
 0xc26   :  { %1442 = vadd.xlane.f32.xlu0 %v1441_v41 }
 0xc5a   :  { %v1320_v42 = vpop.f32.mrb[36].mxu1 }
 0xc5b   :  { %v5764_v43 = vadd.f32 %v1320_v42, %v5720_v35  ;;  %v4019_v44 = vpop.f32.mrb[37].mxu1 }
 0xc5c   :  { %v1323_v45 = vpop.f32.mrb[38].mxu1 }
 0xc5d   :  { %v5767_v46 = vadd.f32 %v1323_v45, %v5722_v38  ;;  %v4020_v47 = vpop.f32.mrb[39].mxu1 }
 0xc62   :  { %v1423_v48 = vpop.f32.mrb[40].mxu1 }
 0xc63   :  { %v4031_v51 = vpop.f32.mrb[41].mxu1  ;;  %v1432_v52 = vsel %vm584_vm3, %v1423_v48, -inf  ;;  %v1452_v13 = vmax.f32 %v1423_v48, 0.0 }
 0xc64   :  { %1433 = vmax.xlane.f32.xlu1 %v1432_v52  ;;  %v1426_v53 = vpop.f32.mrb[42].mxu1 }
 0xc65   :  { %v4032_v54 = vpop.f32.mrb[43].mxu1  ;;  %v1456_v15 = vmul.f32 %v1452_v13, %v1452_v13 }
 0xc67   :  { %v1458_v16 = vmul.f32 %v1456_v15, %v5634_v49  ;;  %v5831_v15 = vld [vmem:[#allocation10 + $0x8] sm:$0xf] }
 0xc75   :  { %1463 = vrot.lane.b32.xlu1 %v5600_v11, %s5094_s3 }
 0xc79   :  { %1615 = vrot.lane.b32.xlu1 %v5600_v11, %s5095_s13 }
 0xc7d   :  { %1665 = vrot.lane.b32.xlu1 %v5603_v14, %s5095_s13 }
 0xc81   :  { %1663 = vrot.lane.b32.xlu1 %v5603_v14, %s5096_s21 }
 0xcb3   :  { %v1443_v35 = vpop.xlane.xlu0 %1442 }
 0xcb4   :  { %4377 = vrcp.f32 %v1443_v35 }
 0xcbe   :  { %v4378_v38 = vpop.eup %4377 }
 0xcbf   :  { %v1449_v56 = vmul.f32 %v4378_v38, %v4376_v40 }
 0xcc1   :  { %v1453_v58 = vmul.f32 %v1449_v56, %v5636_v50 }
 0xcc3   :  { %v1459_v63 = vadd.f32 %v1457_v60, %v1453_v58 }
 0xcc5   :  { %v1461_v3 = vpack.c.bf16 %v1459_v63, %v1459_v63 }
 0xcf1   :  { %v1434_v59 = vpop.xlane.xlu1 %1433 }
 0xcf2   :  { %v1436_v61 = vsub.f32 %v1423_v48, %v1434_v59 }
 0xcf4   :  { %v1439_v62 = vmul.f32 1.442695, %v1436_v61 }
 0xcf5   :  { %v1464_v0 = vpop.permute.xlu1 %1463 }
 0xcf6   :  { %4379 = vpow2.f32 %v1439_v62  ;;  %v1469_v2 = vsel %vm626_vm4, %v1464_v0, 0 }
 0xcf7   :  { %4034 = vmatpush3.bf16.msra.mxu0 %v1469_v2 }
 0xcf8   :  { %4045 = vmatprep.subr.bf16.mxu0 %v5083_v1 }
 0xcf9   :  { %v1616_v21 = vpop.permute.xlu1 %1615 }
 0xcfa   :  { %4036 = vmatmul.mubr.msk.bf16.vlgmr.msra.gmra.mrb[28].mxu0 %vm584_vm3, %v1461_v3  ;;  %v1621_v23 = vsel %vm488_vm2, %v1616_v21, 0 }
 0xcfb   :  { %4047 = vmatprep.mubr.msk.bf16.mxu0 %vm5084_vm0, %v5083_v1  ;;  %4046 = vmatpush3.bf16.msra.mxu0 %v1568_v8 }
 0xcfc   :  { %4057 = vmatprep.subr.bf16.mxu0 %v5083_v1 }
 0xcfd   :  { %v1666_v29 = vpop.permute.xlu1 %1665 }
 0xcfe   :  { %v1671_v34 = vsel %vm488_vm2, %v1666_v29, 0 }
 0xd00   :  { %v4380_v4 = vpop.eup %4379 }
 0xd01   :  { %v1444_v5 = vsel %vm584_vm3, %v4380_v4, 0.0  ;;  %v1664_v41 = vpop.permute.xlu1 %1663 }
 0xd02   :  { %1445 = vadd.xlane.f32.xlu0 %v1444_v5 }
 0xd18   :  { %1511 = vrot.lane.b32.xlu0 %v5603_v14, %s5094_s3 }
 0xd1c   :  { %1613 = vrot.lane.b32.xlu0 %v5600_v11, %s5096_s21 }
 0xd8f   :  { %v1446_v9 = vpop.xlane.xlu0 %1445 }
 0xd90   :  { %4381 = vrcp.f32 %v1446_v9 }
 0xd93   :  { %v1512_v10 = vpop.permute.xlu0 %1511 }
 0xd94   :  { %v1517_v12 = vsel %vm626_vm4, %v1512_v10, 0 }
 0xd95   :  { %4040 = vmatpush3.bf16.msra.mxu1 %v1517_v12 }
 0xd96   :  { %4051 = vmatprep.subr.bf16.mxu1 %v5083_v1 }
 0xd97   :  { %v1614_v24 = vpop.permute.xlu0 %1613 }
 0xd9a   :  { %v4382_v17 = vpop.eup %4381 }
 0xd9b   :  { %v1450_v18 = vmul.f32 %v4382_v17, %v4380_v4  ;;  %v1848_v17 = vsel %vm957_vm5, %v5831_v15, 0 }
 0xd9d   :  { %v1454_v19 = vmul.f32 %v1450_v18, %v5636_v50 }
 0xd9f   :  { %v1460_v20 = vadd.f32 %v1458_v16, %v1454_v19 }
 0xda1   :  { %v1462_v22 = vpack.c.bf16 %v1460_v20, %v1460_v20 }
 0xda3   :  { %4042 = vmatmul.mubr.msk.bf16.vlgmr.msra.gmra.mrb[44].mxu1 %vm584_vm3, %v1462_v22 }
 0xda4   :  { %4052 = vmatpush3.bf16.xpose.msra.mxu1 %v1621_v23  ;;  %4053 = vmatprep.mubr.msk.bf16.mxu1 %vm5084_vm0, %v5083_v1 }
 0xda5   :  { %4063 = vmatprep.subr.bf16.mxu1 %v5083_v1 }
 0xdab   :  { %4054 = vmatmul.mubr.msk.bf16.vlgmr.msra.gmra.mrb[48].mxu1 %vm488_vm2, %v1614_v24 }
 0xdac   :  { %4065 = vmatprep.mubr.msk.bf16.mxu1 %vm5084_vm0, %v5083_v1 }
 0xdcd   :  { %v1505_v25 = vpop.f32.mrb[28].mxu0 }
 0xdce   :  { %v4037_v26 = vpop.f32.mrb[29].mxu0 }
 0xdcf   :  { %v1508_v27 = vpop.f32.mrb[30].mxu0 }
 0xdd0   :  { %v4038_v28 = vpop.f32.mrb[31].mxu0 }
 0xe76   :  { %v1553_v30 = vpop.f32.mrb[44].mxu1 }
 0xe77   :  { %v1559_v31 = vpack.c.bf16 %v1553_v30, %v1505_v25  ;;  %v4043_v32 = vpop.f32.mrb[45].mxu1 }
 0xe78   :  { %v1556_v33 = vpop.f32.mrb[46].mxu1 }
 0xe79   :  { %v4044_v36 = vpop.f32.mrb[47].mxu1  ;;  %4048 = vmatmul.mubr.msk.bf16.vlgmr.msra.gmra.mrb[32].mxu0 %vm488_vm2, %v1559_v31 }
 0xe7a   :  { %4058 = vmatpush3.bf16.xpose.msra.mxu0 %v1671_v34  ;;  %4059 = vmatprep.mubr.msk.bf16.mxu0 %vm5084_vm0, %v5083_v1 }
 0xe7b   :  { %4069 = vmatprep.subr.bf16.mxu0 %v5083_v1 }
 0xe7e   :  { %v1657_v37 = vpop.f32.mrb[48].mxu1 }
 0xe7f   :  { %v4055_v39 = vpop.f32.mrb[49].mxu1  ;;  %v1713_v40 = vsel %vm584_vm3, %v1657_v37, -inf  ;;  %v1735_v62 = vmax.f32 %v1657_v37, 0.0 }
 0xe80   :  { %1714 = vmax.xlane.f32.xlu0 %v1713_v40  ;;  %v1660_v42 = vpop.f32.mrb[50].mxu1 }
 0xe81   :  { %v4056_v44 = vpop.f32.mrb[51].mxu1  ;;  %4060 = vmatmul.mubr.msk.bf16.vlgmr.msra.gmra.mrb[36].mxu0 %vm488_vm2, %v1664_v41  ;;  %v1739_v0 = vmul.f32 %v1735_v62, %v1735_v62 }
 0xe82   :  { %4071 = vmatprep.mubr.msk.bf16.mxu0 %vm5084_vm0, %v5083_v1 }
 0xe83   :  { %v1741_v4 = vmul.f32 %v1739_v0, %v5634_v49 }
 0xf0d   :  { %v1715_v45 = vpop.xlane.xlu0 %1714 }
 0xf0e   :  { %v1719_v47 = vsub.f32 %v1657_v37, %v1715_v45 }
 0xf10   :  { %v1721_v48 = vmul.f32 1.442695, %v1719_v47 }
 0xf12   :  { %4383 = vpow2.f32 %v1721_v48 }
 0xf1c   :  { %v4384_v51 = vpop.eup %4383 }
 0xf1d   :  { %v1725_v52 = vsel %vm584_vm3, %v4384_v51, 0.0 }
 0xf1e   :  { %1726 = vadd.xlane.f32.xlu0 %v1725_v52 }
 0xf4c   :  { %v1604_v53 = vpop.f32.mrb[32].mxu0 }
 0xf4d   :  { %v5811_v54 = vadd.f32 %v1604_v53, %v5764_v43  ;;  %v4049_v35 = vpop.f32.mrb[33].mxu0 }
 0xf4e   :  { %v1607_v38 = vpop.f32.mrb[34].mxu0 }
 0xf4f   :  { %v5814_v55 = vadd.f32 %v1607_v38, %v5767_v46  ;;  %v4050_v56 = vpop.f32.mrb[35].mxu0 }
 0xf54   :  { %v1707_v57 = vpop.f32.mrb[36].mxu0 }
 0xf55   :  { %v4061_v58 = vpop.f32.mrb[37].mxu0  ;;  %v1716_v59 = vsel %vm584_vm3, %v1707_v57, -inf  ;;  %v1736_v20 = vmax.f32 %v1707_v57, 0.0 }
 0xf56   :  { %1717 = vmax.xlane.f32.xlu1 %v1716_v59  ;;  %v1710_v60 = vpop.f32.mrb[38].mxu0 }
 0xf57   :  { %v4062_v61 = vpop.f32.mrb[39].mxu0  ;;  %v1740_v21 = vmul.f32 %v1736_v20, %v1736_v20 }
 0xf59   :  { %v1742_v24 = vmul.f32 %v1740_v21, %v5634_v49 }
 0xf67   :  { %1747 = vrot.lane.b32.xlu1 %v5600_v11, %s5097_s17 }
 0xf6b   :  { %1895 = vrot.lane.b32.xlu1 %v5600_v11, %s5098_s14 }
 0xf6f   :  { %1945 = vrot.lane.b32.xlu1 %v5603_v14, %s5098_s14 }
 0xf73   :  { %1943 = vrot.lane.b32.xlu1 %v5603_v14, %s5099_s6 }
 0xfab   :  { %v1727_v43 = vpop.xlane.xlu0 %1726 }
 0xfac   :  { %4385 = vrcp.f32 %v1727_v43 }
 0xfb6   :  { %v4386_v46 = vpop.eup %4385 }
 0xfb7   :  { %v1733_v63 = vmul.f32 %v4386_v46, %v4384_v51 }
 0xfb9   :  { %v1737_v2 = vmul.f32 %v1733_v63, %v5636_v50 }
 0xfbb   :  { %v1743_v7 = vadd.f32 %v1741_v4, %v1737_v2 }
 0xfbd   :  { %v1745_v10 = vpack.c.bf16 %v1743_v7, %v1743_v7 }
 0xfe3   :  { %v1718_v3 = vpop.xlane.xlu1 %1717 }
 0xfe4   :  { %v1720_v5 = vsub.f32 %v1707_v57, %v1718_v3 }
 0xfe6   :  { %v1723_v6 = vmul.f32 1.442695, %v1720_v5 }
 0xfe7   :  { %v1748_v8 = vpop.permute.xlu1 %1747 }
 0xfe8   :  { %4387 = vpow2.f32 %v1723_v6  ;;  %v1753_v9 = vsel %vm626_vm4, %v1748_v8, 0 }
 0xfe9   :  { %4064 = vmatpush3.bf16.msra.mxu1 %v1753_v9 }
 0xfea   :  { %4075 = vmatprep.subr.bf16.mxu1 %v5083_v1 }
 0xfeb   :  { %v1896_v27 = vpop.permute.xlu1 %1895 }
 0xfec   :  { %4066 = vmatmul.mubr.msk.bf16.vlgmr.msra.gmra.mrb[52].mxu1 %vm584_vm3, %v1745_v10  ;;  %v1901_v29 = vsel %vm488_vm2, %v1896_v27, 0 }
 0xfed   :  { %4077 = vmatprep.mubr.msk.bf16.mxu1 %vm5084_vm0, %v5083_v1  ;;  %4076 = vmatpush3.bf16.msra.mxu1 %v1848_v17 }
 0xfee   :  { %4087 = vmatprep.subr.bf16.mxu1 %v5083_v1 }
 0xfef   :  { %v1946_v36 = vpop.permute.xlu1 %1945 }
 0xff0   :  { %v1951_v42 = vsel %vm488_vm2, %v1946_v36, 0 }
 0xff2   :  { %v4388_v12 = vpop.eup %4387 }
 0xff3   :  { %v1728_v13 = vsel %vm584_vm3, %v4388_v12, 0.0  ;;  %v1944_v51 = vpop.permute.xlu1 %1943 }
 0xff4   :  { %1729 = vadd.xlane.f32.xlu0 %v1728_v13 }
0x100a   :  { %1795 = vrot.lane.b32.xlu0 %v5603_v14, %s5097_s17 }
0x100e   :  { %1893 = vrot.lane.b32.xlu0 %v5600_v11, %s5099_s6 }
0x1081   :  { %v1730_v18 = vpop.xlane.xlu0 %1729 }
0x1082   :  { %4389 = vrcp.f32 %v1730_v18 }
0x1085   :  { %v1796_v16 = vpop.permute.xlu0 %1795 }
0x1086   :  { %v1801_v19 = vsel %vm626_vm4, %v1796_v16, 0 }
0x1087   :  { %4070 = vmatpush3.bf16.msra.mxu0 %v1801_v19 }
0x1088   :  { %4081 = vmatprep.subr.bf16.mxu0 %v5083_v1 }
0x1089   :  { %v1894_v30 = vpop.permute.xlu0 %1893 }
0x108c   :  { %v4390_v22 = vpop.eup %4389 }
0x108d   :  { %v1734_v23 = vmul.f32 %v4390_v22, %v4388_v12  ;;  %v3714_v22 = vcombine.low %v5831_v15, %v5831_v15 }
0x108f   :  { %v1738_v25 = vmul.f32 %v1734_v23, %v5636_v50  ;;  %v2127_v23 = vrot.slane %v3714_v22, 2 }
0x1091   :  { %v1744_v26 = vadd.f32 %v1742_v24, %v1738_v25  ;;  %v2132_v24 = vsel %vm957_vm5, %v2127_v23, 0 }
0x1093   :  { %v1746_v28 = vpack.c.bf16 %v1744_v26, %v1744_v26 }
0x1095   :  { %4072 = vmatmul.mubr.msk.bf16.vlgmr.msra.gmra.mrb[40].mxu0 %vm584_vm3, %v1746_v28 }
0x1096   :  { %4082 = vmatpush3.bf16.xpose.msra.mxu0 %v1901_v29  ;;  %4083 = vmatprep.mubr.msk.bf16.mxu0 %vm5084_vm0, %v5083_v1 }
0x1097   :  { %4093 = vmatprep.subr.bf16.mxu0 %v5083_v1 }
0x109d   :  { %4084 = vmatmul.mubr.msk.bf16.vlgmr.msra.gmra.mrb[44].mxu0 %vm488_vm2, %v1894_v30 }
0x109e   :  { %4095 = vmatprep.mubr.msk.bf16.mxu0 %vm5084_vm0, %v5083_v1 }
0x10bf   :  { %v1789_v31 = vpop.f32.mrb[52].mxu1 }
0x10c0   :  { %v4067_v32 = vpop.f32.mrb[53].mxu1 }
0x10c1   :  { %v1792_v33 = vpop.f32.mrb[54].mxu1 }
0x10c2   :  { %v4068_v34 = vpop.f32.mrb[55].mxu1 }
0x1168   :  { %v1837_v37 = vpop.f32.mrb[40].mxu0 }
0x1169   :  { %v1843_v39 = vpack.c.bf16 %v1837_v37, %v1789_v31  ;;  %v4073_v40 = vpop.f32.mrb[41].mxu0 }
0x116a   :  { %v1840_v41 = vpop.f32.mrb[42].mxu0 }
0x116b   :  { %v4074_v44 = vpop.f32.mrb[43].mxu0  ;;  %4078 = vmatmul.mubr.msk.bf16.vlgmr.msra.gmra.mrb[56].mxu1 %vm488_vm2, %v1843_v39 }
0x116c   :  { %4088 = vmatpush3.bf16.xpose.msra.mxu1 %v1951_v42  ;;  %4089 = vmatprep.mubr.msk.bf16.mxu1 %vm5084_vm0, %v5083_v1 }
0x116d   :  { %4099 = vmatprep.subr.bf16.mxu1 %v5083_v1 }
0x1170   :  { %v1937_v45 = vpop.f32.mrb[44].mxu0 }
0x1171   :  { %v4085_v47 = vpop.f32.mrb[45].mxu0  ;;  %v1993_v48 = vsel %vm584_vm3, %v1937_v45, -inf  ;;  %v2015_v5 = vmax.f32 %v1937_v45, 0.0 }
0x1172   :  { %1994 = vmax.xlane.f32.xlu0 %v1993_v48  ;;  %v1940_v52 = vpop.f32.mrb[46].mxu0 }
0x1173   :  { %v4086_v53 = vpop.f32.mrb[47].mxu0  ;;  %4090 = vmatmul.mubr.msk.bf16.vlgmr.msra.gmra.mrb[60].mxu1 %vm488_vm2, %v1944_v51  ;;  %v2019_v7 = vmul.f32 %v2015_v5, %v2015_v5 }
0x1174   :  { %4101 = vmatprep.mubr.msk.bf16.mxu1 %vm5084_vm0, %v5083_v1 }
0x1175   :  { %v2021_v10 = vmul.f32 %v2019_v7, %v5634_v49 }
0x11ff   :  { %v1995_v35 = vpop.xlane.xlu0 %1994 }
0x1200   :  { %v1999_v38 = vsub.f32 %v1937_v45, %v1995_v35 }
0x1202   :  { %v2001_v56 = vmul.f32 1.442695, %v1999_v38 }
0x1204   :  { %4391 = vpow2.f32 %v2001_v56 }
0x120e   :  { %v4392_v57 = vpop.eup %4391 }
0x120f   :  { %v2005_v58 = vsel %vm584_vm3, %v4392_v57, 0.0 }
0x1210   :  { %2006 = vadd.xlane.f32.xlu0 %v2005_v58 }
0x123e   :  { %v1884_v59 = vpop.f32.mrb[56].mxu1 }
0x123f   :  { %v5859_v60 = vadd.f32 %v1884_v59, %v5811_v54  ;;  %v4079_v61 = vpop.f32.mrb[57].mxu1 }
0x1240   :  { %v1887_v43 = vpop.f32.mrb[58].mxu1 }
0x1241   :  { %v5862_v46 = vadd.f32 %v1887_v43, %v5814_v55  ;;  %v4080_v62 = vpop.f32.mrb[59].mxu1 }
0x1246   :  { %v1987_v63 = vpop.f32.mrb[60].mxu1 }
0x1247   :  { %v4091_v0 = vpop.f32.mrb[61].mxu1  ;;  %v1996_v2 = vsel %vm584_vm3, %v1987_v63, -inf  ;;  %v2016_v28 = vmax.f32 %v1987_v63, 0.0 }
0x1248   :  { %1997 = vmax.xlane.f32.xlu1 %v1996_v2  ;;  %v1990_v3 = vpop.f32.mrb[62].mxu1 }
0x1249   :  { %v4092_v4 = vpop.f32.mrb[63].mxu1  ;;  %v2020_v29 = vmul.f32 %v2016_v28, %v2016_v28 }
0x124b   :  { %v2022_v15 = vmul.f32 %v2020_v29, %v5634_v49  ;;  %v5926_v29 = vld [vmem:[#allocation10 + $0xc] sm:$0xf] }
0x1259   :  { %2027 = vrot.lane.b32.xlu1 %v5600_v11, %s5100_s30 }
0x125d   :  { %2179 = vrot.lane.b32.xlu1 %v5600_v11, %s5101_s24 }
0x1261   :  { %2229 = vrot.lane.b32.xlu1 %v5603_v14, %s5101_s24 }
0x1265   :  { %2227 = vrot.lane.b32.xlu1 %v5603_v14, %s5102_s12 }
0x129d   :  { %v2007_v54 = vpop.xlane.xlu0 %2006 }
0x129e   :  { %4393 = vrcp.f32 %v2007_v54 }
0x12a8   :  { %v4394_v55 = vpop.eup %4393 }
0x12a9   :  { %v2013_v6 = vmul.f32 %v4394_v55, %v4392_v57 }
0x12ab   :  { %v2017_v8 = vmul.f32 %v2013_v6, %v5636_v50 }
0x12ad   :  { %v2023_v17 = vadd.f32 %v2021_v10, %v2017_v8 }
0x12af   :  { %v2025_v19 = vpack.c.bf16 %v2023_v17, %v2023_v17 }
0x12d5   :  { %v1998_v9 = vpop.xlane.xlu1 %1997 }
0x12d6   :  { %v2000_v12 = vsub.f32 %v1987_v63, %v1998_v9 }
0x12d8   :  { %v2003_v13 = vmul.f32 1.442695, %v2000_v12 }
0x12d9   :  { %v2028_v18 = vpop.permute.xlu1 %2027 }
0x12da   :  { %4395 = vpow2.f32 %v2003_v13  ;;  %v2033_v16 = vsel %vm626_vm4, %v2028_v18, 0 }
0x12db   :  { %4094 = vmatpush3.bf16.msra.mxu0 %v2033_v16 }
0x12dc   :  { %4105 = vmatprep.subr.bf16.mxu0 %v5083_v1 }
0x12dd   :  { %v2180_v34 = vpop.permute.xlu1 %2179 }
0x12de   :  { %4096 = vmatmul.mubr.msk.bf16.vlgmr.msra.gmra.mrb[48].mxu0 %vm584_vm3, %v2025_v19  ;;  %v2185_v37 = vsel %vm488_vm2, %v2180_v34, 0 }
0x12df   :  { %4107 = vmatprep.mubr.msk.bf16.mxu0 %vm5084_vm0, %v5083_v1  ;;  %4106 = vmatpush3.bf16.msra.mxu0 %v2132_v24 }
0x12e0   :  { %4117 = vmatprep.subr.bf16.mxu0 %v5083_v1 }
0x12e1   :  { %v2230_v45 = vpop.permute.xlu1 %2229 }
0x12e2   :  { %v2235_v53 = vsel %vm488_vm2, %v2230_v45, 0 }
0x12e4   :  { %v4396_v20 = vpop.eup %4395 }
0x12e5   :  { %v2008_v21 = vsel %vm584_vm3, %v4396_v20, 0.0  ;;  %v2228_v58 = vpop.permute.xlu1 %2227 }
0x12e6   :  { %2009 = vadd.xlane.f32.xlu0 %v2008_v21 }
0x12fc   :  { %2075 = vrot.lane.b32.xlu0 %v5603_v14, %s5100_s30 }
0x1300   :  { %2177 = vrot.lane.b32.xlu0 %v5600_v11, %s5102_s12 }
0x1373   :  { %v2010_v25 = vpop.xlane.xlu0 %2009 }
0x1374   :  { %4397 = vrcp.f32 %v2010_v25 }
0x1377   :  { %v2076_v26 = vpop.permute.xlu0 %2075 }
0x1378   :  { %v2081_v27 = vsel %vm626_vm4, %v2076_v26, 0 }
0x1379   :  { %4100 = vmatpush3.bf16.msra.mxu1 %v2081_v27 }
0x137a   :  { %4111 = vmatprep.subr.bf16.mxu1 %v5083_v1 }
0x137b   :  { %v2178_v39 = vpop.permute.xlu0 %2177 }
0x137e   :  { %v4398_v30 = vpop.eup %4397 }
0x137f   :  { %v2014_v31 = vmul.f32 %v4398_v30, %v4396_v20  ;;  %v2412_v30 = vsel %vm957_vm5, %v5926_v29, 0 }
0x1381   :  { %v2018_v32 = vmul.f32 %v2014_v31, %v5636_v50 }
0x1383   :  { %v2024_v33 = vadd.f32 %v2022_v15, %v2018_v32 }
0x1385   :  { %v2026_v36 = vpack.c.bf16 %v2024_v33, %v2024_v33 }
0x1387   :  { %4102 = vmatmul.mubr.msk.bf16.vlgmr.msra.gmra.mrb[64].mxu1 %vm584_vm3, %v2026_v36 }
0x1388   :  { %4112 = vmatpush3.bf16.xpose.msra.mxu1 %v2185_v37  ;;  %4113 = vmatprep.mubr.msk.bf16.mxu1 %vm5084_vm0, %v5083_v1 }
0x1389   :  { %4123 = vmatprep.subr.bf16.mxu1 %v5083_v1 }
0x138f   :  { %4114 = vmatmul.mubr.msk.bf16.vlgmr.msra.gmra.mrb[68].mxu1 %vm488_vm2, %v2178_v39 }
0x1390   :  { %4125 = vmatprep.mubr.msk.bf16.mxu1 %vm5084_vm0, %v5083_v1 }
0x13b1   :  { %v2069_v40 = vpop.f32.mrb[48].mxu0 }
0x13b2   :  { %v4097_v41 = vpop.f32.mrb[49].mxu0 }
0x13b3   :  { %v2072_v42 = vpop.f32.mrb[50].mxu0 }
0x13b4   :  { %v4098_v44 = vpop.f32.mrb[51].mxu0 }
0x145a   :  { %v2117_v47 = vpop.f32.mrb[64].mxu1 }
0x145b   :  { %v2123_v48 = vpack.c.bf16 %v2117_v47, %v2069_v40  ;;  %v4103_v51 = vpop.f32.mrb[65].mxu1 }
0x145c   :  { %v2120_v52 = vpop.f32.mrb[66].mxu1 }
0x145d   :  { %v4104_v35 = vpop.f32.mrb[67].mxu1  ;;  %4108 = vmatmul.mubr.msk.bf16.vlgmr.msra.gmra.mrb[52].mxu0 %vm488_vm2, %v2123_v48 }
0x145e   :  { %4118 = vmatpush3.bf16.xpose.msra.mxu0 %v2235_v53  ;;  %4119 = vmatprep.mubr.msk.bf16.mxu0 %vm5084_vm0, %v5083_v1 }
0x145f   :  { %4129 = vmatprep.subr.bf16.mxu0 %v5083_v1 }
0x1462   :  { %v2221_v38 = vpop.f32.mrb[68].mxu1 }
0x1463   :  { %v4115_v56 = vpop.f32.mrb[69].mxu1  ;;  %v2277_v57 = vsel %vm584_vm3, %v2221_v38, -inf  ;;  %v2299_v13 = vmax.f32 %v2221_v38, 0.0 }
0x1464   :  { %2278 = vmax.xlane.f32.xlu0 %v2277_v57  ;;  %v2224_v59 = vpop.f32.mrb[70].mxu1 }
0x1465   :  { %v4116_v61 = vpop.f32.mrb[71].mxu1  ;;  %4120 = vmatmul.mubr.msk.bf16.vlgmr.msra.gmra.mrb[56].mxu0 %vm488_vm2, %v2228_v58  ;;  %v2303_v18 = vmul.f32 %v2299_v13, %v2299_v13 }
0x1466   :  { %4131 = vmatprep.mubr.msk.bf16.mxu0 %vm5084_vm0, %v5083_v1 }
0x1467   :  { %v2305_v20 = vmul.f32 %v2303_v18, %v5634_v49 }
0x14f1   :  { %v2279_v43 = vpop.xlane.xlu0 %2278 }
0x14f2   :  { %v2283_v62 = vsub.f32 %v2221_v38, %v2279_v43 }
0x14f4   :  { %v2285_v63 = vmul.f32 1.442695, %v2283_v62 }
0x14f6   :  { %4399 = vpow2.f32 %v2285_v63 }
0x1500   :  { %v4400_v0 = vpop.eup %4399 }
0x1501   :  { %v2289_v2 = vsel %vm584_vm3, %v4400_v0, 0.0 }
0x1502   :  { %2290 = vadd.xlane.f32.xlu0 %v2289_v2 }
0x1530   :  { %v2168_v3 = vpop.f32.mrb[52].mxu0 }
0x1531   :  { %v5906_v4 = vadd.f32 %v2168_v3, %v5859_v60  ;;  %v4109_v54 = vpop.f32.mrb[53].mxu0 }
0x1532   :  { %v2171_v55 = vpop.f32.mrb[54].mxu0 }
0x1533   :  { %v5909_v5 = vadd.f32 %v2171_v55, %v5862_v46  ;;  %v4110_v6 = vpop.f32.mrb[55].mxu0 }
0x1538   :  { %v2271_v7 = vpop.f32.mrb[56].mxu0 }
0x1539   :  { %v4121_v8 = vpop.f32.mrb[57].mxu0  ;;  %v2280_v9 = vsel %vm584_vm3, %v2271_v7, -inf  ;;  %v2300_v33 = vmax.f32 %v2271_v7, 0.0 }
0x153a   :  { %2281 = vmax.xlane.f32.xlu1 %v2280_v9  ;;  %v2274_v10 = vpop.f32.mrb[58].mxu0 }
0x153b   :  { %v4122_v12 = vpop.f32.mrb[59].mxu0  ;;  %v2304_v34 = vmul.f32 %v2300_v33, %v2300_v33 }
0x153d   :  { %v2306_v39 = vmul.f32 %v2304_v34, %v5634_v49  ;;  %v3725_v34 = vcombine.low %v5926_v29, %v5926_v29 }
0x154b   :  { %2311 = vrot.lane.b32.xlu1 %v5600_v11, %s5103_s0 }
0x154f   :  { %2459 = vrot.lane.b32.xlu1 %v5600_v11, %s5104_s18 }
0x1553   :  { %2509 = vrot.lane.b32.xlu1 %v5603_v14, %s5104_s18 }
0x1557   :  { %2507 = vrot.lane.b32.xlu1 %v5603_v14, %s5105_s11 }
0x158f   :  { %v2291_v60 = vpop.xlane.xlu0 %2290 }
0x1590   :  { %4401 = vrcp.f32 %v2291_v60 }
0x159a   :  { %v4402_v46 = vpop.eup %4401 }
0x159b   :  { %v2297_v17 = vmul.f32 %v4402_v46, %v4400_v0 }
0x159d   :  { %v2301_v16 = vmul.f32 %v2297_v17, %v5636_v50 }
0x159f   :  { %v2307_v23 = vadd.f32 %v2305_v20, %v2301_v16 }
0x15a1   :  { %v2309_v26 = vpack.c.bf16 %v2307_v23, %v2307_v23 }
0x15c7   :  { %v2282_v19 = vpop.xlane.xlu1 %2281 }
0x15c8   :  { %v2284_v21 = vsub.f32 %v2271_v7, %v2282_v19 }
0x15ca   :  { %v2287_v22 = vmul.f32 1.442695, %v2284_v21 }
0x15cb   :  { %v2312_v24 = vpop.permute.xlu1 %2311 }
0x15cc   :  { %4403 = vpow2.f32 %v2287_v22  ;;  %v2317_v25 = vsel %vm626_vm4, %v2312_v24, 0 }
0x15cd   :  { %4124 = vmatpush3.bf16.msra.mxu1 %v2317_v25 }
0x15ce   :  { %4135 = vmatprep.subr.bf16.mxu1 %v5083_v1 }
0x15cf   :  { %v2460_v42 = vpop.permute.xlu1 %2459 }
0x15d0   :  { %4126 = vmatmul.mubr.msk.bf16.vlgmr.msra.gmra.mrb[72].mxu1 %vm584_vm3, %v2309_v26  ;;  %v2465_v45 = vsel %vm488_vm2, %v2460_v42, 0 }
0x15d1   :  { %4137 = vmatprep.mubr.msk.bf16.mxu1 %vm5084_vm0, %v5083_v1  ;;  %4136 = vmatpush3.bf16.msra.mxu1 %v2412_v30 }
0x15d2   :  { %4147 = vmatprep.subr.bf16.mxu1 %v5083_v1 }
0x15d3   :  { %v2510_v35 = vpop.permute.xlu1 %2509 }
0x15d4   :  { %v2515_v59 = vsel %vm488_vm2, %v2510_v35, 0 }
0x15d6   :  { %v4404_v27 = vpop.eup %4403 }
0x15d7   :  { %v2292_v28 = vsel %vm584_vm3, %v4404_v27, 0.0  ;;  %v2508_v0 = vpop.permute.xlu1 %2507 }
0x15d8   :  { %2293 = vadd.xlane.f32.xlu0 %v2292_v28 }
0x15ee   :  { %2359 = vrot.lane.b32.xlu0 %v5603_v14, %s5103_s0 }
0x15f2   :  { %2457 = vrot.lane.b32.xlu0 %v5600_v11, %s5105_s11 }
0x1665   :  { %v2294_v31 = vpop.xlane.xlu0 %2293 }
0x1666   :  { %4405 = vrcp.f32 %v2294_v31 }
0x1669   :  { %v2360_v15 = vpop.permute.xlu0 %2359 }
0x166a   :  { %v2365_v32 = vsel %vm626_vm4, %v2360_v15, 0 }
0x166b   :  { %4130 = vmatpush3.bf16.msra.mxu0 %v2365_v32 }
0x166c   :  { %4141 = vmatprep.subr.bf16.mxu0 %v5083_v1 }
0x166d   :  { %v2458_v47 = vpop.permute.xlu0 %2457 }
0x1670   :  { %v4406_v36 = vpop.eup %4405 }
0x1671   :  { %v2298_v37 = vmul.f32 %v4406_v36, %v4404_v27  ;;  %v2691_v36 = vrot.slane %v3725_v34, 2 }
0x1673   :  { %v2302_v40 = vmul.f32 %v2298_v37, %v5636_v50  ;;  %v2696_v37 = vsel %vm957_vm5, %v2691_v36, 0 }
0x1675   :  { %v2308_v41 = vadd.f32 %v2306_v39, %v2302_v40 }
0x1677   :  { %v2310_v44 = vpack.c.bf16 %v2308_v41, %v2308_v41 }
0x1679   :  { %4132 = vmatmul.mubr.msk.bf16.vlgmr.msra.gmra.mrb[60].mxu0 %vm584_vm3, %v2310_v44 }
0x167a   :  { %4142 = vmatpush3.bf16.xpose.msra.mxu0 %v2465_v45  ;;  %4143 = vmatprep.mubr.msk.bf16.mxu0 %vm5084_vm0, %v5083_v1 }
0x167b   :  { %4153 = vmatprep.subr.bf16.mxu0 %v5083_v1 }
0x1681   :  { %4144 = vmatmul.mubr.msk.bf16.vlgmr.msra.gmra.mrb[64].mxu0 %vm488_vm2, %v2458_v47 }
0x1682   :  { %4155 = vmatprep.mubr.msk.bf16.mxu0 %vm5084_vm0, %v5083_v1 }
0x16a3   :  { %v2353_v48 = vpop.f32.mrb[72].mxu1 }
0x16a4   :  { %v4127_v51 = vpop.f32.mrb[73].mxu1 }
0x16a5   :  { %v2356_v52 = vpop.f32.mrb[74].mxu1 }
0x16a6   :  { %v4128_v53 = vpop.f32.mrb[75].mxu1 }
0x174c   :  { %v2401_v38 = vpop.f32.mrb[60].mxu0 }
0x174d   :  { %v2407_v56 = vpack.c.bf16 %v2401_v38, %v2353_v48  ;;  %v4133_v57 = vpop.f32.mrb[61].mxu0 }
0x174e   :  { %v2404_v58 = vpop.f32.mrb[62].mxu0 }
0x174f   :  { %v4134_v61 = vpop.f32.mrb[63].mxu0  ;;  %4138 = vmatmul.mubr.msk.bf16.vlgmr.msra.gmra.mrb[76].mxu1 %vm488_vm2, %v2407_v56 }
0x1750   :  { %4148 = vmatpush3.bf16.xpose.msra.mxu1 %v2515_v59  ;;  %4149 = vmatprep.mubr.msk.bf16.mxu1 %vm5084_vm0, %v5083_v1 }
0x1751   :  { %4159 = vmatprep.subr.bf16.mxu1 %v5083_v1 }
0x1754   :  { %v2501_v43 = vpop.f32.mrb[64].mxu0 }
0x1755   :  { %v4145_v62 = vpop.f32.mrb[65].mxu0  ;;  %v2557_v63 = vsel %vm584_vm3, %v2501_v43, -inf  ;;  %v2579_v22 = vmax.f32 %v2501_v43, 0.0 }
0x1756   :  { %2558 = vmax.xlane.f32.xlu0 %v2557_v63  ;;  %v2504_v2 = vpop.f32.mrb[66].mxu0 }
0x1757   :  { %v4146_v3 = vpop.f32.mrb[67].mxu0  ;;  %4150 = vmatmul.mubr.msk.bf16.vlgmr.msra.gmra.mrb[80].mxu1 %vm488_vm2, %v2508_v0  ;;  %v2583_v24 = vmul.f32 %v2579_v22, %v2579_v22  ;;  %v4305_v22 = vld [vmem:[#allocation16] ss:$8 sps:$4 sm:$0xff]  }
0x1758   :  { %4161 = vmatprep.mubr.msk.bf16.mxu1 %vm5084_vm0, %v5083_v1 }
0x1759   :  { %v2585_v26 = vmul.f32 %v2583_v24, %v5634_v49  ;;  %v4310_v24 = vld [vmem:[#allocation16 + $0x14] ss:$8 sps:$4 sm:$0xff]  }
0x17e3   :  { %v2559_v54 = vpop.xlane.xlu0 %2558 }
0x17e4   :  { %v2563_v55 = vsub.f32 %v2501_v43, %v2559_v54 }
0x17e6   :  { %v2565_v6 = vmul.f32 1.442695, %v2563_v55  ;;  %v4439_v55 = vld [vmem:[#allocation6] sm:$0xff] }
0x17e8   :  { %4407 = vpow2.f32 %v2565_v6 }
0x17f2   :  { %v4408_v7 = vpop.eup %4407 }
0x17f3   :  { %v2569_v8 = vsel %vm584_vm3, %v4408_v7, 0.0 }
0x17f4   :  { %2570 = vadd.xlane.f32.xlu0 %v2569_v8  ;;  %v4440_v8 = vld [vmem:[#allocation6 + $0x8] sm:$0xff] }
0x1822   :  { %v2448_v9 = vpop.f32.mrb[76].mxu1 }
0x1823   :  { %v5954_v10 = vadd.f32 %v2448_v9, %v5906_v4  ;;  %v4139_v12 = vpop.f32.mrb[77].mxu1 }
0x1824   :  { %v2451_v60 = vpop.f32.mrb[78].mxu1 }
0x1825   :  { %v5957_v46 = vadd.f32 %v2451_v60, %v5909_v5  ;;  %v4140_v13 = vpop.f32.mrb[79].mxu1 }
0x182a   :  { %v2551_v17 = vpop.f32.mrb[80].mxu1 }
0x182b   :  { %v4151_v18 = vpop.f32.mrb[81].mxu1  ;;  %v2560_v16 = vsel %vm584_vm3, %v2551_v17, -inf  ;;  %v2580_v42 = vmax.f32 %v2551_v17, 0.0 }
0x182c   :  { %2561 = vmax.xlane.f32.xlu1 %v2560_v16  ;;  %v2554_v19 = vpop.f32.mrb[82].mxu1 }
0x182d   :  { %v4152_v20 = vpop.f32.mrb[83].mxu1  ;;  %v2584_v44 = vmul.f32 %v2580_v42, %v2580_v42 }
0x183d   :  { %2591 = vrot.lane.b32.xlu1 %v5600_v11, %s5106_s28 }
0x1881   :  { %v2571_v21 = vpop.xlane.xlu0 %2570 }
0x1882   :  { %4409 = vrcp.f32 %v2571_v21 }
0x188c   :  { %v4410_v4 = vpop.eup %4409 }
0x188d   :  { %v2577_v23 = vmul.f32 %v4410_v4, %v4408_v7  ;;  %v4307_v4 = vld [vmem:[#allocation16 + $0x4] ss:$8 sps:$4 sm:$0xff]  }
0x188f   :  { %v2581_v5 = vmul.f32 %v2577_v23, %v5636_v50  ;;  %v4308_v23 = vld [vmem:[#allocation16 + $0x10] ss:$8 sps:$4 sm:$0xff]  }
0x1891   :  { %v2587_v30 = vadd.f32 %v2585_v26, %v2581_v5  ;;  %v5107_v5 = vmov 0   ;;  %v4313_v26 = vld [vmem:[#allocation19 + $0x8] sm:$0xff]  }
0x1893   :  { %v2589_v11 = vpack.c.bf16 %v2587_v30, %v2587_v30  ;;  %v4319_v30 = vld [vmem:[#allocation19 + $0x20] sm:$0xff]  }
0x18b9   :  { %v2562_v25 = vpop.xlane.xlu1 %2561 }
0x18ba   :  { %v2564_v27 = vsub.f32 %v2551_v17, %v2562_v25  ;;  %v4311_v25 = vld [vmem:[#allocation19] sm:$0xff]  }
0x18bc   :  { %v2567_v28 = vmul.f32 1.442695, %v2564_v27  ;;  %v4315_v27 = vld [vmem:[#allocation19 + $0x10] sm:$0xff]  }
0x18bd   :  { %v2592_v31 = vpop.permute.xlu1 %2591 }
0x18be   :  { %4411 = vpow2.f32 %v2567_v28  ;;  %v2597_v15 = vsel %vm626_vm4, %v2592_v31, 0  ;;  %v4317_v28 = vld [vmem:[#allocation19 + $0x18] sm:$0xff]   ;;  %v4321_v31 = vld [vmem:[#allocation19 + $0x28] sm:$0xff]  }
0x18bf   :  { %4154 = vmatpush3.bf16.msra.mxu0 %v2597_v15 }
0x18c0   :  { %4165 = vmatprep.subr.bf16.mxu0 %v5083_v1 }
0x18c2   :  { %4156 = vmatmul.mubr.msk.bf16.vlgmr.msra.gmra.mrb[68].mxu0 %vm584_vm3, %v2589_v11 }
0x18c3   :  { %4167 = vmatprep.mubr.msk.bf16.mxu0 %vm5084_vm0, %v5083_v1  ;;  %4166 = vmatpush3.bf16.msra.mxu0 %v2696_v37 }
0x18c4   :  { %4171 = vmatprep.subr.bf16.mxu0 %v5083_v1 }
0x18c8   :  { %v4412_v32 = vpop.eup %4411 }
0x18c9   :  { %v2572_v33 = vsel %vm584_vm3, %v4412_v32, 0.0 }
0x18ca   :  { %2573 = vadd.xlane.f32.xlu0 %v2572_v33 }
0x18e0   :  { %2639 = vrot.lane.b32.xlu0 %v5603_v14, %s5106_s28  ;;  %v2586_v14 = vmul.f32 %v2584_v44, %v5634_v49 }
0x1957   :  { %v2574_v39 = vpop.xlane.xlu0 %2573 }
0x1958   :  { %4413 = vrcp.f32 %v2574_v39  ;;  %v3728_v39 = vld [vmem:[#allocation13] ss:$0 sm:$0xff] }
0x195b   :  { %v2640_v40 = vpop.permute.xlu0 %2639 }
0x195c   :  { %v2645_v41 = vsel %vm626_vm4, %v2640_v40, 0 }
0x195d   :  { %4160 = vmatpush3.bf16.msra.mxu1 %v2645_v41 }
0x195e   :  { %2837 = vmatprep.subr.bf16.mxu1 %v4307_v4  ;;  %v3735_v4 = vld [vmem:[#allocation21] ss:$0 sm:$0xff] }
0x1962   :  { %v4414_v45 = vpop.eup %4413 }
0x1963   :  { %v2578_v47 = vmul.f32 %v4414_v45, %v4412_v32  ;;  %v3729_v45 = vld [vmem:[#allocation15] ss:$0 sm:$0xff] }
0x1965   :  { %v2582_v29 = vmul.f32 %v2578_v47, %v5636_v50  ;;  %v3727_v50 = vld [vmem:[#allocation12] ss:$0 sm:$0xff] }
0x1967   :  { %v2588_v48 = vadd.f32 %v2586_v14, %v2582_v29 }
0x1969   :  { %v2590_v51 = vpack.c.bf16 %v2588_v48, %v2588_v48  ;;  %v4312_v48 = vld [vmem:[#allocation22] sm:$0xff]  }
0x196b   :  { %4162 = vmatmul.mubr.msk.bf16.vlgmr.msra.gmra.mrb[84].mxu1 %vm584_vm3, %v2590_v51 }
0x196c   :  { %2838 = vmatpush1.bf16.msra.mxu1 %v4305_v22  ;;  %2869 = vmatprep.mubr.bf16.mxu1 %v5107_v5 }
0x196d   :  { %2839 = vmatprep.subr.bf16.mxu1 %v4310_v24  ;;  %v3744_v24 = vld [vmem:[#allocation24] ss:$0 sm:$0xff] }
0x1970   :  { %2840 = vmatpush1.bf16.msra.mxu1 %v4308_v23 }
0x1971   :  { %4191 = vmatprep.subr.bf16.mxu1 %v5083_v1 }
0x1995   :  { %v2633_v52 = vpop.f32.mrb[68].mxu0 }
0x1996   :  { %v4157_v53 = vpop.f32.mrb[69].mxu0 }
0x1997   :  { %v2636_v35 = vpop.f32.mrb[70].mxu0  ;;  %v4316_v53 = vld [vmem:[#allocation22 + $0x10] sm:$0xff]  }
0x1998   :  { %v4158_v38 = vpop.f32.mrb[71].mxu0  ;;  %v4318_v35 = vld [vmem:[#allocation22 + $0x18] sm:$0xff]  }
0x1999   :  { %v4320_v38 = vld [vmem:[#allocation22 + $0x20] sm:$0xff]  }
0x1a3e   :  { %v2681_v56 = vpop.f32.mrb[84].mxu1 }
0x1a3f   :  { %v2687_v57 = vpack.c.bf16 %v2681_v56, %v2633_v52  ;;  %v4163_v58 = vpop.f32.mrb[85].mxu1  ;;  %v4314_v52 = vld [vmem:[#allocation22 + $0x8] sm:$0xff]  }
0x1a40   :  { %v2684_v59 = vpop.f32.mrb[86].mxu1  ;;  %v4322_v56 = vld [vmem:[#allocation22 + $0x28] sm:$0xff]   ;;  %v4324_v58 = vld [vmem:[#allocation22 + $0x30] sm:$0xff]  }
0x1a41   :  { %v4164_v61 = vpop.f32.mrb[87].mxu1  ;;  %4168 = vmatmul.mubr.msk.bf16.vlgmr.msra.gmra.mrb[72].mxu0 %vm488_vm2, %v2687_v57  ;;  %v4323_v57 = vld [vmem:[#allocation19 + $0x30] sm:$0xff]   ;;  %v4325_v59 = vld [vmem:[#allocation19 + $0x38] sm:$0xff]  }
0x1a42   :  { %4187 = vmatprep.mubr.msk.bf16.mxu0 %vm5084_vm0, %v5083_v1  ;;  %4172 = vmatpush3.bf16.msra.mxu0 %v4311_v25  ;;  %v4326_v61 = vld [vmem:[#allocation22 + $0x38] sm:$0xff]  }
0x1a43   :  { %4173 = vmatprep.subr.bf16.mxu0 %v5083_v1 }
0x1a46   :  { %4174 = vmatpush3.bf16.msra.mxu0 %v4313_v26 }
0x1a47   :  { %4175 = vmatprep.subr.bf16.mxu0 %v5083_v1 }
0x1a4a   :  { %4176 = vmatpush3.bf16.msra.mxu0 %v4315_v27 }
0x1a4b   :  { %4177 = vmatprep.subr.bf16.mxu0 %v5083_v1 }
0x1a4e   :  { %4178 = vmatpush3.bf16.msra.mxu0 %v4317_v28 }
0x1a4f   :  { %4179 = vmatprep.subr.bf16.mxu0 %v5083_v1 }
0x1a52   :  { %4180 = vmatpush3.bf16.msra.mxu0 %v4319_v30 }
0x1a53   :  { %4181 = vmatprep.subr.bf16.mxu0 %v5083_v1 }
0x1a56   :  { %4182 = vmatpush3.bf16.msra.mxu0 %v4321_v31 }
0x1a57   :  { %4183 = vmatprep.subr.bf16.mxu0 %v5083_v1 }
0x1a5a   :  { %4184 = vmatpush3.bf16.msra.mxu0 %v4323_v57 }
0x1a5b   :  { %4185 = vmatprep.subr.bf16.mxu0 %v5083_v1 }
0x1a5e   :  { %4186 = vmatpush3.bf16.msra.mxu0 %v4325_v59 }
0x1a5f   :  { %4211 = vmatprep.subr.bf16.mxu0 %v5083_v1 }
0x1b14   :  { %v2732_v49 = vpop.f32.mrb[72].mxu0 }
0x1b15   :  { %v2739_v43 = vadd.f32 %v2732_v49, %v5954_v10  ;;  %v4169_v62 = vpop.f32.mrb[73].mxu0  ;;  %v2804_v49 = vlaneseq }
0x1b16   :  { %v2735_v63 = vpop.f32.mrb[74].mxu0  ;;  %v2802_v62 = vld [vmem:[#allocation18] sm:$0x3] }
0x1b17   :  { %v2748_v0 = vadd.f32 %v3727_v50, %v2739_v43  ;;  %v2740_v2 = vadd.f32 %v2735_v63, %v5957_v46  ;;  %v4170_v3 = vpop.f32.mrb[75].mxu0 }
0x1b19   :  { %v2749_v54 = vadd.f32 %v3727_v50, %v2740_v2  ;;  %v2750_v6 = vadd.f32 %v4439_v55, %v2748_v0  ;;  %v2805_v50 = vshrl.u32 %v2804_v49, 7 }
0x1b1b   :  { %v2754_v7 = vsel %vm434_vm1, %v2750_v6, 0.0  ;;  %v2751_v9 = vadd.f32 %v4440_v8, %v2749_v54  ;;  %v2806_v43 = vsub.s32 0, %v2805_v50  ;;  %v2810_v63 = vsub.s32 1, %v2805_v50 }
0x1b1c   :  { %2755 = vadd.xlane.f32.xlu1 %v2754_v7 }
0x1b1d   :  { %v2757_v12 = vsel %vm434_vm1, %v2751_v9, 0.0  ;;  %v2807_v0 = vrot.slane %v2802_v62, %v2806_v43  ;;  %v2811_v2 = vrot.slane %v2802_v62, %v2810_v63 }
0x1b1e   :  { %2758 = vadd.xlane.f32.xlu0 %v2757_v12 }
0x1ba9   :  { %v2756_v60 = vpop.xlane.xlu1 %2755 }
0x1baa   :  { %v2761_v13 = vmul.f32 0.03125, %v2756_v60 }
0x1bab   :  { %v2759_v10 = vpop.xlane.xlu0 %2758 }
0x1bac   :  { %v2763_v17 = vsub.f32 %v2750_v6, %v2761_v13  ;;  %v2762_v18 = vmul.f32 0.03125, %v2759_v10 }
0x1bae   :  { %v2764_v16 = vsub.f32 %v2751_v9, %v2762_v18  ;;  %v2765_v19 = vmul.f32 %v2763_v17, %v2763_v17 }
0x1bb0   :  { %v2767_v46 = vsel %vm434_vm1, %v2765_v19, 0.0  ;;  %v2766_v20 = vmul.f32 %v2764_v16, %v2764_v16  ;;  %v4327_v19 = vld [vmem:[#allocation25] sm:$0xff]  }
0x1bb1   :  { %2768 = vadd.xlane.f32.xlu1 %v2767_v46  ;;  %v4328_v46 = vld [vmem:[#allocation28] sm:$0xff]  }
0x1bb2   :  { %v2770_v21 = vsel %vm434_vm1, %v2766_v20, 0.0  ;;  %v4329_v20 = vld [vmem:[#allocation25 + $0x8] sm:$0xff]  }
0x1bb3   :  { %2771 = vadd.xlane.f32.xlu0 %v2770_v21  ;;  %v4330_v21 = vld [vmem:[#allocation28 + $0x8] sm:$0xff]  }
0x1c3e   :  { %v2769_v15 = vpop.xlane.xlu1 %2768 }
0x1c3f   :  { %v2773_v11 = vmul.f32 0.03125, %v2769_v15 }
0x1c40   :  { %v2772_v32 = vpop.xlane.xlu0 %2771 }
0x1c41   :  { %v2775_v33 = vadd.f32 1e-05, %v2773_v11  ;;  %v2774_v34 = vmul.f32 0.03125, %v2772_v32 }
0x1c43   :  { %4415 = vrsqrt.f32 %v2775_v33  ;;  %v2776_v36 = vadd.f32 1e-05, %v2774_v34 }
0x1c45   :  { %4417 = vrsqrt.f32 %v2776_v36  ;;  %v4331_v36 = vld [vmem:[#allocation31] sm:$0xff]  }
0x1c4d   :  { %v4416_v37 = vpop.eup %4415 }
0x1c4e   :  { %v2779_v40 = vmul.f32 %v4416_v37, %v2763_v17  ;;  %v4332_v37 = vld [vmem:[#allocation34] sm:$0xff]  }
0x1c4f   :  { %v4418_v41 = vpop.eup %4417 }
0x1c50   :  { %v2787_v42 = vmul.f32 %v3728_v39, %v2779_v40  ;;  %v2780_v44 = vmul.f32 %v4418_v41, %v2764_v16  ;;  %v4334_v40 = vld [vmem:[#allocation34 + $0x8] sm:$0xff]   ;;  %v4335_v41 = vld [vmem:[#allocation37 + $0x40] sm:$0xff]  }
0x1c52   :  { %v2788_v47 = vmul.f32 %v3728_v39, %v2780_v44  ;;  %v5994_v14 = vadd.f32 %v3729_v45, %v2787_v42  ;;  %v4333_v39 = vld [vmem:[#allocation31 + $0x8] sm:$0xff]   ;;  %v3757_v44 = vld [vmem:[#allocation30] ss:$0 sm:$0xff] }
0x1c53   :  { %v3753_v42 = vld [vmem:[#allocation27] ss:$0 sm:$0xff] }
0x1c54   :  { %v5996_v29 = vadd.f32 %v3729_v45, %v2788_v47 }
0x1c56   :  { %v2797_v51 = vpack.c.bf16 %v5996_v29, %v5994_v14 }
0x1c58   :  { %3734 = vmatmul.mubr.msk.bf16.vlgmr.msra.gmra.mrb[88].mxu1 %vm434_vm1, %v2797_v51 }
0x1c59   :  { %4192 = vmatpush3.bf16.msra.mxu1 %v4312_v48  ;;  %4207 = vmatprep.mubr.msk.bf16.mxu1 %vm5084_vm0, %v5083_v1 }
0x1c5a   :  { %4193 = vmatprep.subr.bf16.mxu1 %v5083_v1 }
0x1c5d   :  { %4194 = vmatpush3.bf16.msra.mxu1 %v4314_v52 }
0x1c5e   :  { %4195 = vmatprep.subr.bf16.mxu1 %v5083_v1 }
0x1c61   :  { %4196 = vmatpush3.bf16.msra.mxu1 %v4316_v53 }
0x1c62   :  { %4197 = vmatprep.subr.bf16.mxu1 %v5083_v1 }
0x1c65   :  { %4198 = vmatpush3.bf16.msra.mxu1 %v4318_v35 }
0x1c66   :  { %4199 = vmatprep.subr.bf16.mxu1 %v5083_v1 }
0x1c69   :  { %4200 = vmatpush3.bf16.msra.mxu1 %v4320_v38 }
0x1c6a   :  { %4201 = vmatprep.subr.bf16.mxu1 %v5083_v1 }
0x1c6d   :  { %4202 = vmatpush3.bf16.msra.mxu1 %v4322_v56 }
0x1c6e   :  { %4203 = vmatprep.subr.bf16.mxu1 %v5083_v1 }
0x1c71   :  { %4204 = vmatpush3.bf16.msra.mxu1 %v4324_v58 }
0x1c72   :  { %4205 = vmatprep.subr.bf16.mxu1 %v5083_v1 }
0x1c75   :  { %4206 = vmatpush3.bf16.msra.mxu1 %v4326_v61 }
0x1c76   :  { %4219 = vmatprep.subr.bf16.mxu1 %v5083_v1 }
0x1d2b   :  { %v2871_v3 = vpop.f32.mrb[88].mxu1 }
0x1d2c   :  { %v2872_v54 = vadd.f32 %v2871_v3, %v2807_v0  ;;  %v2873_v55 = vpop.f32.mrb[89].mxu1 }
0x1d2d   :  { %v2874_v6 = vadd.f32 %v2873_v55, %v2811_v2  ;;  %v2875_v7 = vpop.f32.mrb[90].mxu1 }
0x1d2e   :  { %v2876_v8 = vadd.f32 %v2875_v7, %v2807_v0  ;;  %v2877_v9 = vpop.f32.mrb[91].mxu1  ;;  %v2880_v60 = vmax.f32 %v2872_v54, 0.0 }
0x1d2f   :  { %v2878_v12 = vadd.f32 %v2877_v9, %v2811_v2  ;;  %v2881_v10 = vmax.f32 %v2874_v6, 0.0 }
0x1d30   :  { %v2882_v13 = vmax.f32 %v2876_v8, 0.0 }
0x1d31   :  { %v2883_v17 = vmax.f32 %v2878_v12, 0.0 }
0x1d32   :  { %v2884_v18 = vpack.c.bf16 %v2882_v13, %v2880_v60 }
0x1d33   :  { %v2885_v16 = vpack.c.bf16 %v2883_v17, %v2881_v10 }
0x1d34   :  { %4188 = vmatmul.mubr.bf16.vlgmr.msra.gmra.mrb[76].mxu0 %v2884_v18 }
0x1d35   :  { %4208 = vmatmul.mubr.bf16.vlgmr.msra.gmra.mrb[92].mxu1 %v2885_v16  ;;  %4215 = vmatprep.mubr.msk.bf16.mxu0 %vm5084_vm0, %v5083_v1 }
0x1d36   :  { %4223 = vmatprep.mubr.msk.bf16.mxu1 %vm5084_vm0, %v5083_v1  ;;  %4212 = vmatpush3.bf16.msra.mxu0 %v4327_v19 }
0x1d37   :  { %4220 = vmatpush3.bf16.msra.mxu1 %v4328_v46  ;;  %4213 = vmatprep.subr.bf16.mxu0 %v5083_v1 }
0x1d38   :  { %4221 = vmatprep.subr.bf16.mxu1 %v5083_v1 }
0x1d3a   :  { %4214 = vmatpush3.bf16.msra.mxu0 %v4329_v20 }
0x1d3b   :  { %4222 = vmatpush3.bf16.msra.mxu1 %v4330_v21  ;;  %4227 = vmatprep.subr.bf16.mxu0 %v5083_v1 }
0x1d3c   :  { %4235 = vmatprep.subr.bf16.mxu1 %v5083_v1 }
0x1e07   :  { %v2991_v22 = vpop.f32.mrb[76].mxu0 }
0x1e08   :  { %v4189_v23 = vpop.f32.mrb[77].mxu0  ;;  %v3103_v5 = vpop.f32.mrb[92].mxu1  ;;  %v6021_v27 = vadd.f32 %v3735_v4, %v2991_v22 }
0x1e09   :  { %v2994_v25 = vpop.f32.mrb[78].mxu0  ;;  %v4209_v26 = vpop.f32.mrb[93].mxu1  ;;  %v6025_v15 = vadd.f32 %v3744_v24, %v3103_v5 }
0x1e0a   :  { %v6023_v28 = vadd.f32 %v3735_v4, %v2994_v25  ;;  %v4190_v30 = vpop.f32.mrb[79].mxu0  ;;  %v3106_v31 = vpop.f32.mrb[94].mxu1 }
0x1e0b   :  { %v6027_v11 = vadd.f32 %v3744_v24, %v3106_v31  ;;  %v4210_v32 = vpop.f32.mrb[95].mxu1 }
0x1e0c   :  { %v3110_v33 = vpack.c.bf16 %v6023_v28, %v6021_v27  ;;  %v4336_v32 = vld [vmem:[#allocation37] sm:$0xff]  }
0x1e0d   :  { %v3178_v34 = vpack.c.bf16 %v6027_v11, %v6025_v15 }
0x1e0e   :  { %4216 = vmatmul.mubr.msk.bf16.vlgmr.msra.gmra.mrb[80].mxu0 %vm434_vm1, %v3110_v33 }
0x1e0f   :  { %4224 = vmatmul.mubr.msk.bf16.vlgmr.msra.gmra.mrb[96].mxu1 %vm434_vm1, %v3178_v34  ;;  %4231 = vmatprep.mubr.msk.bf16.mxu0 %vm5084_vm0, %v5083_v1  ;;  %v4337_v34 = vld [vmem:[#allocation37 + $0x48] sm:$0xff]  }
0x1e10   :  { %4239 = vmatprep.mubr.msk.bf16.mxu1 %vm5084_vm0, %v5083_v1  ;;  %4228 = vmatpush3.bf16.msra.mxu0 %v4331_v36 }
0x1e11   :  { %4236 = vmatpush3.bf16.msra.mxu1 %v4332_v37  ;;  %4229 = vmatprep.subr.bf16.mxu0 %v5083_v1  ;;  %v4342_v37 = vld [vmem:[#allocation37 + $0x18] sm:$0xff]  }
0x1e12   :  { %4237 = vmatprep.subr.bf16.mxu1 %v5083_v1 }
0x1e14   :  { %4230 = vmatpush3.bf16.msra.mxu0 %v4333_v39  ;;  %v4343_v39 = vld [vmem:[#allocation37 + $0x60] sm:$0xff]  }
0x1e15   :  { %4238 = vmatpush3.bf16.msra.mxu1 %v4334_v40  ;;  %3901 = vmatprep.subr.bf16.mxu0 %v4335_v41  ;;  %v4344_v40 = vld [vmem:[#allocation37 + $0x20] sm:$0xff]   ;;  %v4345_v41 = vld [vmem:[#allocation37 + $0x68] sm:$0xff]  }
0x1ee1   :  { %v3171_v45 = vpop.f32.mrb[80].mxu0 }
0x1ee2   :  { %v3172_v47 = vadd.f32 %v3753_v42, %v3171_v45  ;;  %v4217_v48 = vpop.f32.mrb[81].mxu0  ;;  %v3239_v51 = vpop.f32.mrb[96].mxu1  ;;  %v4348_v45 = vld [vmem:[#allocation37 + $0x30] sm:$0xff]  }
0x1ee3   :  { %v3240_v52 = vadd.f32 %v3757_v44, %v3239_v51  ;;  %v3174_v53 = vpop.f32.mrb[82].mxu0  ;;  %v4225_v35 = vpop.f32.mrb[97].mxu1  ;;  %v4350_v48 = vld [vmem:[#allocation37 + $0x38] sm:$0xff]   ;;  %v3761_v51 = vld [vmem:[#allocation33] ss:$0 sm:$0xff] }
0x1ee4   :  { %v3246_v38 = vsub.f32 0.0, %v3172_v47  ;;  %v3175_v56 = vadd.f32 %v3753_v42, %v3174_v53  ;;  %v4218_v57 = vpop.f32.mrb[83].mxu0  ;;  %v3242_v58 = vpop.f32.mrb[98].mxu1  ;;  %v4346_v42 = vld [vmem:[#allocation37 + $0x28] sm:$0xff]   ;;  %v4349_v47 = vld [vmem:[#allocation37 + $0x78] sm:$0xff]  }
0x1ee5   :  { %v3256_v59 = vsub.f32 0.0, %v3240_v52  ;;  %v3243_v61 = vadd.f32 %v3757_v44, %v3242_v58  ;;  %v4226_v1 = vpop.f32.mrb[99].mxu1  ;;  %v4347_v44 = vld [vmem:[#allocation37 + $0x70] sm:$0xff]   ;;  %v3765_v52 = vld [vmem:[#allocation36] ss:$0 sm:$0xff] }
0x1ee6   :  { %v3248_v49 = vmul.f32 1.442695, %v3246_v38  ;;  %v3247_v50 = vsub.f32 0.0, %v3175_v56 }
0x1ee7   :  { %v3258_v43 = vmul.f32 1.442695, %v3256_v59  ;;  %v3257_v62 = vsub.f32 0.0, %v3243_v61 }
0x1ee8   :  { %4419 = vpow2.f32 %v3248_v49  ;;  %v3250_v63 = vmul.f32 1.442695, %v3247_v50 }
0x1ee9   :  { %4421 = vpow2.f32 %v3258_v43  ;;  %v3260_v0 = vmul.f32 1.442695, %v3257_v62 }
0x1eea   :  { %4423 = vpow2.f32 %v3250_v63 }
0x1eeb   :  { %4425 = vpow2.f32 %v3260_v0 }
0x1ef2   :  { %v4420_v2 = vpop.eup %4419 }
0x1ef3   :  { %v4422_v3 = vpop.eup %4421  ;;  %v3252_v54 = vadd.f32 1.0, %v4420_v2 }
0x1ef4   :  { %v4424_v55 = vpop.eup %4423  ;;  %v3262_v6 = vadd.f32 1.0, %v4422_v3 }
0x1ef5   :  { %v4426_v7 = vpop.eup %4425  ;;  %4427 = vrcp.f32 %v3252_v54  ;;  %v3253_v8 = vadd.f32 1.0, %v4424_v55 }
0x1ef6   :  { %4429 = vrcp.f32 %v3262_v6  ;;  %v3263_v9 = vadd.f32 1.0, %v4426_v7  ;;  %v3769_v6 = vld [vmem:[#allocation39] ss:$0 sm:$0xff] }
0x1ef7   :  { %4431 = vrcp.f32 %v3253_v8 }
0x1ef8   :  { %4433 = vrcp.f32 %v3263_v9 }
0x1eff   :  { %v4428_v12 = vpop.eup %4427 }
0x1f00   :  { %v4430_v60 = vpop.eup %4429  ;;  %v3268_v13 = vsub.f32 1.0, %v4428_v12  ;;  %v3266_v21 = vmul.f32 %v4428_v12, %v6021_v27 }
0x1f01   :  { %v4432_v10 = vpop.eup %4431  ;;  %v3276_v17 = vsub.f32 1.0, %v4430_v60  ;;  %v3274_v23 = vmul.f32 %v4430_v60, %v6025_v15 }
0x1f02   :  { %v4434_v18 = vpop.eup %4433  ;;  %v3269_v16 = vsub.f32 1.0, %v4432_v10  ;;  %v3270_v19 = vmul.f32 %v3268_v13, %v6025_v15  ;;  %v3267_v4 = vmul.f32 %v4432_v10, %v6023_v28  ;;  %v4339_v15 = vld [vmem:[#allocation37 + $0x50] sm:$0xff]  }
0x1f03   :  { %v3277_v46 = vsub.f32 1.0, %v4434_v18  ;;  %v3278_v20 = vmul.f32 %v3276_v17, %v6021_v27  ;;  %v3275_v24 = vmul.f32 %v4434_v18, %v6027_v11  ;;  %v4338_v27 = vld [vmem:[#allocation37 + $0x8] sm:$0xff]  }
0x1f04   :  { %v3271_v22 = vmul.f32 %v3269_v16, %v6027_v11  ;;  %v3272_v25 = vadd.f32 %v3270_v19, %v3266_v21  ;;  %v4340_v11 = vld [vmem:[#allocation37 + $0x10] sm:$0xff]  }
0x1f05   :  { %v3279_v5 = vmul.f32 %v3277_v46, %v6023_v28  ;;  %v3280_v30 = vadd.f32 %v3278_v20, %v3274_v23  ;;  %v4341_v28 = vld [vmem:[#allocation37 + $0x58] sm:$0xff]  }
0x1f06   :  { %v3273_v26 = vadd.f32 %v3271_v22, %v3267_v4 }
0x1f07   :  { %v3281_v31 = vadd.f32 %v3279_v5, %v3275_v24 }
0x1f08   :  { %v3282_v33 = vpack.c.bf16 %v3273_v26, %v3272_v25 }
0x1f09   :  { %v3352_v36 = vpack.c.bf16 %v3281_v31, %v3280_v30 }
0x1f0a   :  { %4232 = vmatmul.mubr.msk.bf16.vlgmr.msra.gmra.mrb[84].mxu0 %vm434_vm1, %v3282_v33 }
0x1f0b   :  { %4240 = vmatmul.mubr.msk.bf16.vlgmr.msra.gmra.mrb[100].mxu1 %vm434_vm1, %v3352_v36  ;;  %3902 = vmatpush3.bf16.msra.mxu0 %v4336_v32  ;;  %v3786_v36 = vld [vmem:[#allocation40] ss:$0 sm:$0xff] }
0x1f0c   :  { %3903 = vmatprep.subr.bf16.mxu0 %v4337_v34 }
0x1f0f   :  { %3904 = vmatpush3.bf16.msra.mxu0 %v4338_v27 }
0x1f10   :  { %3905 = vmatprep.subr.bf16.mxu0 %v4339_v15 }
0x1f13   :  { %3906 = vmatpush3.bf16.msra.mxu0 %v4340_v11  ;;  %v3787_v11 = vld [vmem:[#allocation42] ss:$0 sm:$0xff] }
0x1f14   :  { %3907 = vmatprep.subr.bf16.mxu0 %v4341_v28 }
0x1f17   :  { %3908 = vmatpush3.bf16.msra.mxu0 %v4342_v37 }
0x1f18   :  { %3909 = vmatprep.subr.bf16.mxu0 %v4343_v39 }
0x1f1b   :  { %3910 = vmatpush3.bf16.msra.mxu0 %v4344_v40 }
0x1f1c   :  { %3911 = vmatprep.subr.bf16.mxu0 %v4345_v41 }
0x1f1f   :  { %3912 = vmatpush3.bf16.msra.mxu0 %v4346_v42 }
0x1f20   :  { %3913 = vmatprep.subr.bf16.mxu0 %v4347_v44 }
0x1f23   :  { %3914 = vmatpush3.bf16.msra.mxu0 %v4348_v45 }
0x1f24   :  { %3915 = vmatprep.subr.bf16.mxu0 %v4349_v47 }
0x1f27   :  { %3916 = vmatpush3.bf16.msra.mxu0 %v4350_v48 }
0x1fdd   :  { %v3343_v53 = vpop.f32.mrb[84].mxu0 }
0x1fde   :  { %v3344_v35 = vadd.f32 %v3761_v51, %v3343_v53  ;;  %v4233_v38 = vpop.f32.mrb[85].mxu0  ;;  %v3413_v56 = vpop.f32.mrb[100].mxu1 }
0x1fdf   :  { %v3414_v57 = vadd.f32 %v3765_v52, %v3413_v56  ;;  %v3346_v58 = vpop.f32.mrb[86].mxu0  ;;  %v4241_v59 = vpop.f32.mrb[101].mxu1 }
0x1fe0   :  { %v3347_v61 = vadd.f32 %v3761_v51, %v3346_v58  ;;  %v4234_v1 = vpop.f32.mrb[87].mxu0  ;;  %v3416_v49 = vpop.f32.mrb[102].mxu1  ;;  %v3350_v62 = vmax.f32 %v3344_v35, 0.0 }
0x1fe1   :  { %v3417_v50 = vadd.f32 %v3765_v52, %v3416_v49  ;;  %v4242_v43 = vpop.f32.mrb[103].mxu1  ;;  %v3420_v0 = vmax.f32 %v3414_v57, 0.0 }
0x1fe2   :  { %v3351_v63 = vmax.f32 %v3347_v61, 0.0 }
0x1fe3   :  { %v3421_v2 = vmax.f32 %v3417_v50, 0.0 }
0x1fe4   :  { %v3422_v3 = vpack.c.bf16 %v3351_v63, %v3350_v62 }
0x1fe5   :  { %v3423_v54 = vpack.c.bf16 %v3421_v2, %v3420_v0 }
0x1fe7   :  { %3591 = vmatprep.mubr.bf16.mxu0 %v3423_v54 }
0x1fe8   :  { %3592 = vmatmul.mubr.bf16.vlgmr.msra.gmra.mrb[88].mxu0 %v3422_v3 }
0x20bb   :  { %v3917_v55 = vpop.f32.mrb[88].mxu0 }
0x20bc   :  { %v3918_v7 = vpop.f32.mrb[89].mxu0 }
0x20bd   :  { %v3919_v8 = vadd.f32 %v3918_v7, %v3917_v55  ;;  %v3920_v9 = vpop.f32.mrb[90].mxu0 }
0x20be   :  { %v3921_v12 = vpop.f32.mrb[91].mxu0 }
0x20bf   :  { %v3594_v60 = vadd.f32 %v3919_v8, %v3769_v6  ;;  %v3922_v13 = vadd.f32 %v3921_v12, %v3920_v9 }
0x20c1   :  { %v3597_v10 = vadd.f32 %v3922_v13, %v3769_v6  ;;  %v3600_v17 = vadd.f32 %v3594_v60, %v5994_v14 }
0x20c3   :  { %v3604_v18 = vsel %vm434_vm1, %v3600_v17, 0.0  ;;  %v3601_v16 = vadd.f32 %v3597_v10, %v5996_v29 }
0x20c4   :  { %3605 = vadd.xlane.f32.xlu1 %v3604_v18 }
0x20c5   :  { %v3607_v19 = vsel %vm434_vm1, %v3601_v16, 0.0 }
0x20c6   :  { %3608 = vadd.xlane.f32.xlu0 %v3607_v19 }
0x2151   :  { %v3606_v46 = vpop.xlane.xlu1 %3605 }
0x2152   :  { %v3610_v20 = vmul.f32 0.03125, %v3606_v46 }
0x2153   :  { %v3609_v21 = vpop.xlane.xlu0 %3608 }
0x2154   :  { %v3612_v4 = vsub.f32 %v3600_v17, %v3610_v20  ;;  %v3611_v22 = vmul.f32 0.03125, %v3609_v21 }
0x2156   :  { %v3613_v23 = vsub.f32 %v3601_v16, %v3611_v22  ;;  %v3614_v24 = vmul.f32 %v3612_v4, %v3612_v4 }
0x2158   :  { %v3616_v5 = vsel %vm434_vm1, %v3614_v24, 0.0  ;;  %v3615_v25 = vmul.f32 %v3613_v23, %v3613_v23 }
0x2159   :  { %3617 = vadd.xlane.f32.xlu1 %v3616_v5 }
0x215a   :  { %v3619_v14 = vsel %vm434_vm1, %v3615_v25, 0.0 }
0x215b   :  { %3620 = vadd.xlane.f32.xlu0 %v3619_v14 }
0x21e6   :  { %v3618_v26 = vpop.xlane.xlu1 %3617 }
0x21e7   :  { %v3622_v29 = vmul.f32 0.03125, %v3618_v26 }
0x21e8   :  { %v3621_v30 = vpop.xlane.xlu0 %3620 }
0x21e9   :  { %v3624_v31 = vadd.f32 1e-05, %v3622_v29  ;;  %v3623_v32 = vmul.f32 0.03125, %v3621_v30 }
0x21eb   :  { %4435 = vrsqrt.f32 %v3624_v31  ;;  %v3625_v33 = vadd.f32 1e-05, %v3623_v32 }
0x21ed   :  { %4437 = vrsqrt.f32 %v3625_v33 }
0x21f5   :  { %v4436_v34 = vpop.eup %4435 }
0x21f6   :  { %v3628_v27 = vmul.f32 %v4436_v34, %v3612_v4 }
0x21f7   :  { %v4438_v15 = vpop.eup %4437 }
0x21f8   :  { %v3629_v28 = vmul.f32 %v4438_v15, %v3613_v23  ;;  %v3636_v37 = vmul.f32 %v3786_v36, %v3628_v27 }
0x21fa   :  { %v3637_v39 = vmul.f32 %v3786_v36, %v3629_v28  ;;  %v3644_v40 = vadd.f32 %v3787_v11, %v3636_v37 }
0x21fc   :  { %v3645_v41 = vadd.f32 %v3787_v11, %v3637_v39  ;;  %3646 = vst.msk [vmem:[#allocation43] sm:$0xff] %vm434_vm1, %v3644_v40 }
0x21fe   :  { %3647 = vst.msk [vmem:[#allocation43 + $0x8] sm:$0xff] %vm434_vm1, %v3645_v41 }
0x21ff   :  { %5012 = shalt.err (!%p5009_p11)
}
0x2200   :  { %s6145_s23 = sld [smem:[#allocation72_spill]] }
0x2206   :  { %s5013_s8 = scalar_lea.hbm %s6145_s23, 256 }
0x2207   :  { %p5014_p12 = scmp.ne.s32.totalorder %s6145_s23, %s5013_s8  ;;  %p5017_p13 = scmp.lt.u32.totalorder %s5013_s8, %s6145_s23 }
0x2209   :  { %p5019_p0 = pnand %p5017_p13, %p5014_p12 }
0x220b   :  { %5022 = shalt.err (!%p5019_p0)
}
0x220c   :  { %3659 = dma.vmem_to_hbm [thread:$0]  %s3654_s15, 256, %s6145_s23, [#allocation4], %s6138_s25, %s6138_s25, %s5061_s7  }
0x220d   :  { %5051 = dma.done.wait [#allocation4], 256  }
0x220e   :  { %5052 = vsyncadd [#allocation4], 4294967040 }
0x220f   :  { %3663 = vsyncpa [#allocation3], 1 }
0x2210   :  { %3664 = vsyncpa [#allocation8], 1 }
0x2211   :  { %3665 = vsyncpa [#allocation11], 1 }
0x2212   :  { %3666 = vsyncpa [#allocation14], 1 }
0x2213   :  { %3667 = vsyncpa [#allocation17], 1 }
0x2214   :  { %3668 = vsyncpa [#allocation20], 1 }
0x2215   :  { %3669 = vsyncpa [#allocation23], 1 }
0x2216   :  { %3670 = vsyncpa [#allocation26], 1 }
0x2217   :  { %3671 = vsyncpa [#allocation29], 1 }
0x2218   :  { %3672 = vsyncpa [#allocation32], 1 }
0x2219   :  { %3673 = vsyncpa [#allocation35], 1 }
0x221a   :  { %3674 = vsyncpa [#allocation38], 1 }
0x221b   :  { %3675 = vsyncpa [#allocation41], 1 }
0x221c   :  { %3676 = vsyncpa [#allocation4], 1 }
0x221d   :  { %3677 = vsyncpa [#allocation5], 1 }

</bundles_post_ra>
